<compile_context>
chip_gen: v7x
topology: tpu7x:2x2x1
jax: 0.10.0
libtpu: 0.0.40
codegen_flags: <defaults>
</compile_context>

<pallas_src>
from typing import NamedTuple

import jax
import jax.numpy as jnp
import numpy as np
from jax import lax
from jax.experimental import pallas as pl
from jax.experimental.pallas import tpu as pltpu


_NB_MAX = 256  # batch rows per grid step at large batch (fills v6e/v7x MXU rows)


def _round_up(a, m):
    return -(-a // m) * m


class ModelMeta(NamedTuple):
    D: int
    H: int
    W: int
    Cin: int
    Cout: int
    Dp: int
    Hp: int
    Wp: int
    Kc: int   # (W+2)*Cin  : conv matmul contraction
    Lc: int   # 2*Wp*Cout  : conv matmul output lanes, order (wq, wp, c)
    Kb: int   # Wp*Cout    : pooled lanes per (dp, hp) block, order (wp, c)
    F1: int   # Dp*Hp*Kb
    Hpad: int
    F2: int


# ----------------------------------------------------------------------------
# Fused kernel: conv (9 banded matmuls) + maxpool + bias/ReLU + dense + out
# ----------------------------------------------------------------------------
def fused_kernel(xk_ref, wb_ref, bc_ref, w1_ref, b1_ref, w2_ref, b2_ref, o_ref):
    # xk_ref: (D+2, H+2, NB, (W+2)*Cin) bf16  zero-padded, batch/channels-minor volume block
    # wb_ref: (9, (W+2)*Cin, 2*Wp*Cout) bf16  banded conv weights, one tap per (kd, kh)
    # bc_ref: (1, Wp*Cout)   f32              conv bias tiled over wp (lane order wp*Cout + c)
    # w1_ref: (Dp*Hp*Wp*Cout, Hpad) bf16      dense weights, rows in (dp, hp, wp, c) order
    # b1_ref: (1, Hpad)      f32
    # w2_ref: (Hpad, F2)     bf16
    # b2_ref: (1, F2)        f32
    # o_ref : (NB, F2)       f32
    Dpp, Hpp, NB, Kc = xk_ref.shape
    D, H = Dpp - 2, Hpp - 2
    Dp, Hp = D // 2, H // 2
    D2, H2 = 2 * Dp, 2 * Hp
    Lc = wb_ref.shape[2]
    Kb = bc_ref.shape[1]
    Hpad = w1_ref.shape[1]
    F1 = w1_ref.shape[0]
    assert Lc == 2 * Kb and F1 == Dp * Hp * Kb
    M = D2 * H2 * NB

    # ---- Conv3d: accumulate 9 banded matmuls (one per (kd, kh) tap). Tap shifts are static
    #      leading-dim windows of the VMEM block; kw and the W outputs live in the banded weight,
    #      so the MXU output is Lc (=128 at demo) lanes wide instead of Cout (=16).
    acc = jnp.zeros((M, Lc), jnp.float32)
    for kd in range(3):
        for kh in range(3):
            xs = xk_ref[kd:kd + D2, kh:kh + H2, :, :]            # (D2, H2, NB, Kc)
            xs = xs.reshape(M, Kc)                               # free: NB % 8 == 0
            acc = acc + jnp.dot(xs, wb_ref[kd * 3 + kh],
                                preferred_element_type=jnp.float32)

    # ---- 2x2x2 max-pool: H and D pairs are leading-dim maxima, the W pair is the lane halves.
    y = acc.reshape(D2, Hp, 2, NB, Lc)
    y = jnp.maximum(y[:, :, 0], y[:, :, 1])                      # pool H -> (D2, Hp, NB, Lc)
    y = y.reshape(Dp, 2, Hp, NB, Lc)
    y = jnp.maximum(y[:, 0], y[:, 1])                            # pool D -> (Dp, Hp, NB, Lc)
    y = jnp.maximum(y[..., :Kb], y[..., Kb:])                    # pool W -> (Dp, Hp, NB, Kb)

    # Conv bias + ReLU once, after the max (per-channel constant bias, monotone ReLU -> exact).
    pooled = jnp.maximum(y + bc_ref[...], 0.0)                   # (Dp, Hp, NB, Kb)

    # ---- Dense layer, accumulated over the Dp*Hp feature blocks (no transpose of the pooled
    #      activations; the PyTorch channel-major flatten is folded into w1's row order).
    # TODO(synk): nn.Dropout(p=0.5) is identity in eval mode; train-mode masking omitted.
    pooled = pooled.reshape(Dp * Hp, NB, Kb)
    h = jnp.zeros((NB, Hpad), jnp.float32)
    for i in range(Dp * Hp):
        h = h + jnp.dot(pooled[i].astype(jnp.bfloat16),
                        w1_ref[i * Kb:(i + 1) * Kb, :],
                        preferred_element_type=jnp.float32)
    h = h + b1_ref[...]

    o_ref[...] = (jnp.dot(h.astype(jnp.bfloat16), w2_ref[...],
                          preferred_element_type=jnp.float32)
                  + b2_ref[...]).astype(o_ref.dtype)


# ----------------------------------------------------------------------------
# One-time parameter packing (review item 8: hoisted out of the forward path)
# ----------------------------------------------------------------------------
def prepare_params(params, grid_size, channels):
    D, H, W = grid_size
    conv_w = np.asarray(params["conv_w"], np.float32)            # (Cout, Cin, 3, 3, 3)
    Cout, Cin = conv_w.shape[0], conv_w.shape[1]
    assert Cin == channels
    Dp, Hp, Wp = D // 2, H // 2, W // 2
    assert Dp >= 1 and Hp >= 1 and Wp >= 1

    Kc = (W + 2) * Cin
    Kb = Wp * Cout
    Lc = 2 * Kb
    F1 = Dp * Hp * Kb

    dense_w = np.asarray(params["dense_w"], np.float32)          # (Hdim, F1) torch (out, in)
    Hdim = dense_w.shape[0]
    assert dense_w.shape[1] == Cout * Dp * Hp * Wp == F1
    Hpad = _round_up(Hdim, 128)
    out_w = np.asarray(params["out_w"], np.float32)              # (F2, Hdim)
    F2 = out_w.shape[0]

    # Banded conv weight: wb[(kd,kh), w'*Cin + ci, wq*Kb + wp*Cout + co] = conv_w[co, ci, kd, kh, w'-w]
    # with w = 2*wp + wq (only the 2*Wp outputs that survive the floor-pool are materialized).
    wb = np.zeros((3, 3, W + 2, Cin, 2, Wp, Cout), np.float32)
    for kw in range(3):
        tap = np.transpose(conv_w[:, :, :, :, kw], (2, 3, 1, 0))  # (kd, kh, ci, co)
        for w in range(2 * Wp):
            wb[:, :, w + kw, :, w % 2, w // 2, :] = tap
    wb = wb.reshape(9, Kc, Lc)

    # Conv bias in pooled lane order (wp, c).
    bc = np.tile(np.asarray(params["conv_b"], np.float32), Wp).reshape(1, Kb)

    # Dense weights with rows permuted from torch flatten order (c, dp, hp, wp) -> (dp, hp, wp, c),
    # hidden dim zero-padded 750 -> 768 (lane multiple).
    w1 = dense_w.reshape(Hdim, Cout, Dp, Hp, Wp)
    w1 = np.transpose(w1, (2, 3, 4, 1, 0)).reshape(F1, Hdim)
    w1 = np.pad(w1, ((0, 0), (0, Hpad - Hdim)))
    b1 = np.pad(np.asarray(params["dense_b"], np.float32), (0, Hpad - Hdim)).reshape(1, Hpad)
    w2 = np.pad(out_w.T, ((0, Hpad - Hdim), (0, 0)))
    b2 = np.asarray(params["out_b"], np.float32).reshape(1, F2)

    weights = dict(
        wb=jnp.asarray(wb, jnp.bfloat16),
        bc=jnp.asarray(bc, jnp.float32),
        w1=jnp.asarray(w1, jnp.bfloat16),
        b1=jnp.asarray(b1, jnp.float32),
        w2=jnp.asarray(w2, jnp.bfloat16),
        b2=jnp.asarray(b2, jnp.float32),
    )
    meta = ModelMeta(D, H, W, Cin, Cout, Dp, Hp, Wp, Kc, Lc, Kb, F1, Hpad, F2)
    return meta, weights


# ----------------------------------------------------------------------------
# Batch blocking + generation-aware VMEM budget
# ----------------------------------------------------------------------------
def _choose_batch_block(n):
    """NB (rows per grid step) and Npad.  Target a large dense-matmul M (<=256), but keep >=2
    grid steps whenever the batch allows so v7x's second TensorCore gets work."""
    n8 = _round_up(n, 8)
    if n8 <= 8:
        nb = n8
    elif n8 <= 2 * _NB_MAX:
        nb = _round_up(n8 // 2, 8)          # exactly two steps
    else:
        nb = _NB_MAX                        # many full-height steps
    return nb, _round_up(n8, nb)


def _vmem_limit_bytes():
    # ~96 MiB on v5e/v6e (128 MiB physical), ~48 MiB on v7x (64 MiB physical).
    cap = 128 * 1024 * 1024
    try:
        cap = int(getattr(pltpu.get_tpu_info(), "vmem_capacity_bytes", cap))
    except Exception:
        pass
    return int(min(cap * 3 // 4, 100 * 1024 * 1024))


# ----------------------------------------------------------------------------
# Forward pass wrapper (light glue: pad/transpose the raw input only)
# ----------------------------------------------------------------------------
def rmm_nn_2d3d_forward(x, weights, meta):
    N = x.shape[0]
    NB, Npad = _choose_batch_block(N)

    # Input layout for the kernel: (D+2, H+2, Npad, (W+2)*Cin) bf16, zero padding = 1 on D/H/W.
    xp = jnp.pad(x, ((0, 0), (0, 0), (1, 1), (1, 1), (1, 1)))
    xk = jnp.transpose(xp, (2, 3, 0, 4, 1))                      # (D+2, H+2, N, W+2, Cin)
    xk = xk.reshape(meta.D + 2, meta.H + 2, N, meta.Kc)
    if Npad != N:
        xk = jnp.pad(xk, ((0, 0), (0, 0), (0, Npad - N), (0, 0)))
    xk = xk.astype(jnp.bfloat16)

    out = pl.pallas_call(
        fused_kernel,
        out_shape=jax.ShapeDtypeStruct((Npad, meta.F2), jnp.float32),
        grid=(Npad // NB,),
        in_specs=[
            pl.BlockSpec((meta.D + 2, meta.H + 2, NB, meta.Kc), lambda i: (0, 0, i, 0)),
            pl.BlockSpec((9, meta.Kc, meta.Lc), lambda i: (0, 0, 0)),   # banded conv w (resident)
            pl.BlockSpec((1, meta.Kb), lambda i: (0, 0)),               # conv bias
            pl.BlockSpec((meta.F1, meta.Hpad), lambda i: (0, 0)),       # dense weight (resident)
            pl.BlockSpec((1, meta.Hpad), lambda i: (0, 0)),             # dense bias
            pl.BlockSpec((meta.Hpad, meta.F2), lambda i: (0, 0)),       # out weight (resident)
            pl.BlockSpec((1, meta.F2), lambda i: (0, 0)),               # out bias
        ],
        out_specs=pl.BlockSpec((NB, meta.F2), lambda i: (i, 0)),
        compiler_params=pltpu.CompilerParams(
            dimension_semantics=("parallel",),
            vmem_limit_bytes=_vmem_limit_bytes(),
        ),
    )(xk, weights["wb"], weights["bc"], weights["w1"], weights["b1"],
      weights["w2"], weights["b2"])
    return out[:N]                                               # drop zero-padded batch rows


# ----------------------------------------------------------------------------
if __name__ == "__main__":
    # Small shapes consistent with the module (grid_size=[Din, Hin, Win], channels=Cin).
    # N=16 also exercises the multi-step grid (2 steps of NB=8).
    N, Cin = 16, 2
    Din, Hin, Win = 8, 4, 8
    Cout = 16
    L_Fout1 = 750
    F1 = Cout * (Din // 2) * (Hin // 2) * (Win // 2)   # flattened conv+pool features
    F2 = Din * Hin * Win                               # output size

    key = jax.random.PRNGKey(0)
    ks = jax.random.split(key, 7)
    s = 0.05
    params = dict(
        conv_w=jax.random.normal(ks[0], (Cout, Cin, 3, 3, 3), jnp.float32) * s,
        conv_b=jax.random.normal(ks[1], (Cout,), jnp.float32) * s,
        dense_w=jax.random.normal(ks[2], (L_Fout1, F1), jnp.float32) * s,   # torch (out, in)
        dense_b=jax.random.normal(ks[3], (L_Fout1,), jnp.float32) * s,
        out_w=jax.random.normal(ks[4], (F2, L_Fout1), jnp.float32) * s,
        out_b=jax.random.normal(ks[5], (F2,), jnp.float32) * s,
    )
    x = jax.random.normal(ks[6], (N, Cin, Din, Hin, Win), jnp.float32)

    meta, weights = prepare_params(params, grid_size=(Din, Hin, Win), channels=Cin)
    fwd = jax.jit(rmm_nn_2d3d_forward, static_argnums=2)
    out = jax.block_until_ready(fwd(x, weights, meta))
    assert out.shape == (N, F2), out.shape

    # Pure-JAX f32 reference (eval-mode dropout = identity)
    conv = lax.conv_general_dilated(
        x, params["conv_w"], window_strides=(1, 1, 1), padding=[(1, 1)] * 3,
        dimension_numbers=("NCDHW", "OIDHW", "NCDHW"))
    conv = jnp.maximum(conv + params["conv_b"].reshape(1, -1, 1, 1, 1), 0.0)
    pooled_ref = lax.reduce_window(conv, -jnp.inf, lax.max,
                                   (1, 1, 2, 2, 2), (1, 1, 2, 2, 2), "VALID")
    feat_ref = pooled_ref.reshape(N, -1)
    ref = (feat_ref @ params["dense_w"].T + params["dense_b"]) @ params["out_w"].T + params["out_b"]

    np.testing.assert_allclose(np.asarray(out), np.asarray(ref), rtol=5e-2, atol=5e-2)
    print("KERNEL_OK")
</pallas_src>

<mosaic_0001>
module attributes {stable_mosaic.version = 11 : i64} {
  func.func @fused_kernel(%arg0: i32, %arg1: memref<10x6x8x20xbf16, #tpu.memory_space<vmem>>, %arg2: memref<9x20x128xbf16, #tpu.memory_space<vmem>>, %arg3: memref<1x64xf32, #tpu.memory_space<vmem>>, %arg4: memref<512x768xbf16, #tpu.memory_space<vmem>>, %arg5: memref<1x768xf32, #tpu.memory_space<vmem>>, %arg6: memref<768x256xbf16, #tpu.memory_space<vmem>>, %arg7: memref<1x256xf32, #tpu.memory_space<vmem>>, %arg8: memref<8x256xf32, #tpu.memory_space<vmem>>) attributes {dimension_semantics = [#tpu.dimension_semantics<parallel>], iteration_bounds = array<i64: 2>, scalar_prefetch = 0 : i64, scratch_operands = 0 : i64, tpu.core_type = #tpu.core_type<tc>, window_params = [{transform_indices = @transform_0, window_bounds = array<i64: 10, 6, 8, 20>}, {pipeline_mode = #tpu.pipeline_mode<synchronous>, transform_indices = @transform_1, window_bounds = array<i64: 9, 20, 128>}, {pipeline_mode = #tpu.pipeline_mode<synchronous>, transform_indices = @transform_2, window_bounds = array<i64: 1, 64>}, {pipeline_mode = #tpu.pipeline_mode<synchronous>, transform_indices = @transform_3, window_bounds = array<i64: 512, 768>}, {pipeline_mode = #tpu.pipeline_mode<synchronous>, transform_indices = @transform_4, window_bounds = array<i64: 1, 768>}, {pipeline_mode = #tpu.pipeline_mode<synchronous>, transform_indices = @transform_5, window_bounds = array<i64: 768, 256>}, {pipeline_mode = #tpu.pipeline_mode<synchronous>, transform_indices = @transform_6, window_bounds = array<i64: 1, 256>}, {transform_indices = @transform_7, window_bounds = array<i64: 8, 256>}]} {
    %cst = arith.constant 0.000000e+00 : f32
    %0 = vector.broadcast %cst : f32 to vector<256x128xf32>
    %c0 = arith.constant 0 : index
    %c0_0 = arith.constant 0 : index
    %c0_1 = arith.constant 0 : index
    %c0_2 = arith.constant 0 : index
    %1 = vector.load %arg1[%c0, %c0_0, %c0_1, %c0_2] : memref<10x6x8x20xbf16, #tpu.memory_space<vmem>>, vector<8x4x8x20xbf16>
    %2 = vector.shape_cast %1 : vector<8x4x8x20xbf16> to vector<256x20xbf16>
    %c0_3 = arith.constant 0 : index
    %c0_4 = arith.constant 0 : index
    %c0_5 = arith.constant 0 : index
    %3 = vector.load %arg2[%c0_3, %c0_4, %c0_5] : memref<9x20x128xbf16, #tpu.memory_space<vmem>>, vector<1x20x128xbf16>
    %4 = vector.shape_cast %3 : vector<1x20x128xbf16> to vector<20x128xbf16>
    %cst_6 = arith.constant dense<0.000000e+00> : vector<256x128xf32>
    %5 = tpu.matmul %2, %4, %cst_6 {dimension_numbers = #tpu.dot_dimension_numbers<[1], [0], [0], [1], [0, 0, 1, 1], [], []>} : vector<256x20xbf16>, vector<20x128xbf16>, vector<256x128xf32> -> vector<256x128xf32>
    %6 = arith.addf %0, %5 : vector<256x128xf32>
    %c0_7 = arith.constant 0 : index
    %c1 = arith.constant 1 : index
    %c0_8 = arith.constant 0 : index
    %c0_9 = arith.constant 0 : index
    %7 = vector.load %arg1[%c0_7, %c1, %c0_8, %c0_9] : memref<10x6x8x20xbf16, #tpu.memory_space<vmem>>, vector<8x4x8x20xbf16>
    %8 = vector.shape_cast %7 : vector<8x4x8x20xbf16> to vector<256x20xbf16>
    %c1_10 = arith.constant 1 : index
    %c0_11 = arith.constant 0 : index
    %c0_12 = arith.constant 0 : index
    %9 = vector.load %arg2[%c1_10, %c0_11, %c0_12] : memref<9x20x128xbf16, #tpu.memory_space<vmem>>, vector<1x20x128xbf16>
    %10 = vector.shape_cast %9 : vector<1x20x128xbf16> to vector<20x128xbf16>
    %cst_13 = arith.constant dense<0.000000e+00> : vector<256x128xf32>
    %11 = tpu.matmul %8, %10, %cst_13 {dimension_numbers = #tpu.dot_dimension_numbers<[1], [0], [0], [1], [0, 0, 1, 1], [], []>} : vector<256x20xbf16>, vector<20x128xbf16>, vector<256x128xf32> -> vector<256x128xf32>
    %12 = arith.addf %6, %11 : vector<256x128xf32>
    %c0_14 = arith.constant 0 : index
    %c2 = arith.constant 2 : index
    %c0_15 = arith.constant 0 : index
    %c0_16 = arith.constant 0 : index
    %13 = vector.load %arg1[%c0_14, %c2, %c0_15, %c0_16] : memref<10x6x8x20xbf16, #tpu.memory_space<vmem>>, vector<8x4x8x20xbf16>
    %14 = vector.shape_cast %13 : vector<8x4x8x20xbf16> to vector<256x20xbf16>
    %c2_17 = arith.constant 2 : index
    %c0_18 = arith.constant 0 : index
    %c0_19 = arith.constant 0 : index
    %15 = vector.load %arg2[%c2_17, %c0_18, %c0_19] : memref<9x20x128xbf16, #tpu.memory_space<vmem>>, vector<1x20x128xbf16>
    %16 = vector.shape_cast %15 : vector<1x20x128xbf16> to vector<20x128xbf16>
    %cst_20 = arith.constant dense<0.000000e+00> : vector<256x128xf32>
    %17 = tpu.matmul %14, %16, %cst_20 {dimension_numbers = #tpu.dot_dimension_numbers<[1], [0], [0], [1], [0, 0, 1, 1], [], []>} : vector<256x20xbf16>, vector<20x128xbf16>, vector<256x128xf32> -> vector<256x128xf32>
    %18 = arith.addf %12, %17 : vector<256x128xf32>
    %c1_21 = arith.constant 1 : index
    %c0_22 = arith.constant 0 : index
    %c0_23 = arith.constant 0 : index
    %c0_24 = arith.constant 0 : index
    %19 = vector.load %arg1[%c1_21, %c0_22, %c0_23, %c0_24] : memref<10x6x8x20xbf16, #tpu.memory_space<vmem>>, vector<8x4x8x20xbf16>
    %20 = vector.shape_cast %19 : vector<8x4x8x20xbf16> to vector<256x20xbf16>
    %c3 = arith.constant 3 : index
    %c0_25 = arith.constant 0 : index
    %c0_26 = arith.constant 0 : index
    %21 = vector.load %arg2[%c3, %c0_25, %c0_26] : memref<9x20x128xbf16, #tpu.memory_space<vmem>>, vector<1x20x128xbf16>
    %22 = vector.shape_cast %21 : vector<1x20x128xbf16> to vector<20x128xbf16>
    %cst_27 = arith.constant dense<0.000000e+00> : vector<256x128xf32>
    %23 = tpu.matmul %20, %22, %cst_27 {dimension_numbers = #tpu.dot_dimension_numbers<[1], [0], [0], [1], [0, 0, 1, 1], [], []>} : vector<256x20xbf16>, vector<20x128xbf16>, vector<256x128xf32> -> vector<256x128xf32>
    %24 = arith.addf %18, %23 : vector<256x128xf32>
    %c1_28 = arith.constant 1 : index
    %c1_29 = arith.constant 1 : index
    %c0_30 = arith.constant 0 : index
    %c0_31 = arith.constant 0 : index
    %25 = vector.load %arg1[%c1_28, %c1_29, %c0_30, %c0_31] : memref<10x6x8x20xbf16, #tpu.memory_space<vmem>>, vector<8x4x8x20xbf16>
    %26 = vector.shape_cast %25 : vector<8x4x8x20xbf16> to vector<256x20xbf16>
    %c4 = arith.constant 4 : index
    %c0_32 = arith.constant 0 : index
    %c0_33 = arith.constant 0 : index
    %27 = vector.load %arg2[%c4, %c0_32, %c0_33] : memref<9x20x128xbf16, #tpu.memory_space<vmem>>, vector<1x20x128xbf16>
    %28 = vector.shape_cast %27 : vector<1x20x128xbf16> to vector<20x128xbf16>
    %cst_34 = arith.constant dense<0.000000e+00> : vector<256x128xf32>
    %29 = tpu.matmul %26, %28, %cst_34 {dimension_numbers = #tpu.dot_dimension_numbers<[1], [0], [0], [1], [0, 0, 1, 1], [], []>} : vector<256x20xbf16>, vector<20x128xbf16>, vector<256x128xf32> -> vector<256x128xf32>
    %30 = arith.addf %24, %29 : vector<256x128xf32>
    %c1_35 = arith.constant 1 : index
    %c2_36 = arith.constant 2 : index
    %c0_37 = arith.constant 0 : index
    %c0_38 = arith.constant 0 : index
    %31 = vector.load %arg1[%c1_35, %c2_36, %c0_37, %c0_38] : memref<10x6x8x20xbf16, #tpu.memory_space<vmem>>, vector<8x4x8x20xbf16>
    %32 = vector.shape_cast %31 : vector<8x4x8x20xbf16> to vector<256x20xbf16>
    %c5 = arith.constant 5 : index
    %c0_39 = arith.constant 0 : index
    %c0_40 = arith.constant 0 : index
    %33 = vector.load %arg2[%c5, %c0_39, %c0_40] : memref<9x20x128xbf16, #tpu.memory_space<vmem>>, vector<1x20x128xbf16>
    %34 = vector.shape_cast %33 : vector<1x20x128xbf16> to vector<20x128xbf16>
    %cst_41 = arith.constant dense<0.000000e+00> : vector<256x128xf32>
    %35 = tpu.matmul %32, %34, %cst_41 {dimension_numbers = #tpu.dot_dimension_numbers<[1], [0], [0], [1], [0, 0, 1, 1], [], []>} : vector<256x20xbf16>, vector<20x128xbf16>, vector<256x128xf32> -> vector<256x128xf32>
    %36 = arith.addf %30, %35 : vector<256x128xf32>
    %c2_42 = arith.constant 2 : index
    %c0_43 = arith.constant 0 : index
    %c0_44 = arith.constant 0 : index
    %c0_45 = arith.constant 0 : index
    %37 = vector.load %arg1[%c2_42, %c0_43, %c0_44, %c0_45] : memref<10x6x8x20xbf16, #tpu.memory_space<vmem>>, vector<8x4x8x20xbf16>
    %38 = vector.shape_cast %37 : vector<8x4x8x20xbf16> to vector<256x20xbf16>
    %c6 = arith.constant 6 : index
    %c0_46 = arith.constant 0 : index
    %c0_47 = arith.constant 0 : index
    %39 = vector.load %arg2[%c6, %c0_46, %c0_47] : memref<9x20x128xbf16, #tpu.memory_space<vmem>>, vector<1x20x128xbf16>
    %40 = vector.shape_cast %39 : vector<1x20x128xbf16> to vector<20x128xbf16>
    %cst_48 = arith.constant dense<0.000000e+00> : vector<256x128xf32>
    %41 = tpu.matmul %38, %40, %cst_48 {dimension_numbers = #tpu.dot_dimension_numbers<[1], [0], [0], [1], [0, 0, 1, 1], [], []>} : vector<256x20xbf16>, vector<20x128xbf16>, vector<256x128xf32> -> vector<256x128xf32>
    %42 = arith.addf %36, %41 : vector<256x128xf32>
    %c2_49 = arith.constant 2 : index
    %c1_50 = arith.constant 1 : index
    %c0_51 = arith.constant 0 : index
    %c0_52 = arith.constant 0 : index
    %43 = vector.load %arg1[%c2_49, %c1_50, %c0_51, %c0_52] : memref<10x6x8x20xbf16, #tpu.memory_space<vmem>>, vector<8x4x8x20xbf16>
    %44 = vector.shape_cast %43 : vector<8x4x8x20xbf16> to vector<256x20xbf16>
    %c7 = arith.constant 7 : index
    %c0_53 = arith.constant 0 : index
    %c0_54 = arith.constant 0 : index
    %45 = vector.load %arg2[%c7, %c0_53, %c0_54] : memref<9x20x128xbf16, #tpu.memory_space<vmem>>, vector<1x20x128xbf16>
    %46 = vector.shape_cast %45 : vector<1x20x128xbf16> to vector<20x128xbf16>
    %cst_55 = arith.constant dense<0.000000e+00> : vector<256x128xf32>
    %47 = tpu.matmul %44, %46, %cst_55 {dimension_numbers = #tpu.dot_dimension_numbers<[1], [0], [0], [1], [0, 0, 1, 1], [], []>} : vector<256x20xbf16>, vector<20x128xbf16>, vector<256x128xf32> -> vector<256x128xf32>
    %48 = arith.addf %42, %47 : vector<256x128xf32>
    %c2_56 = arith.constant 2 : index
    %c2_57 = arith.constant 2 : index
    %c0_58 = arith.constant 0 : index
    %c0_59 = arith.constant 0 : index
    %49 = vector.load %arg1[%c2_56, %c2_57, %c0_58, %c0_59] : memref<10x6x8x20xbf16, #tpu.memory_space<vmem>>, vector<8x4x8x20xbf16>
    %50 = vector.shape_cast %49 : vector<8x4x8x20xbf16> to vector<256x20xbf16>
    %c8 = arith.constant 8 : index
    %c0_60 = arith.constant 0 : index
    %c0_61 = arith.constant 0 : index
    %51 = vector.load %arg2[%c8, %c0_60, %c0_61] : memref<9x20x128xbf16, #tpu.memory_space<vmem>>, vector<1x20x128xbf16>
    %52 = vector.shape_cast %51 : vector<1x20x128xbf16> to vector<20x128xbf16>
    %cst_62 = arith.constant dense<0.000000e+00> : vector<256x128xf32>
    %53 = tpu.matmul %50, %52, %cst_62 {dimension_numbers = #tpu.dot_dimension_numbers<[1], [0], [0], [1], [0, 0, 1, 1], [], []>} : vector<256x20xbf16>, vector<20x128xbf16>, vector<256x128xf32> -> vector<256x128xf32>
    %54 = arith.addf %48, %53 : vector<256x128xf32>
    %55 = vector.shape_cast %54 : vector<256x128xf32> to vector<8x2x2x8x128xf32>
    %56 = vector.extract_strided_slice %55 {offsets = [0, 0, 0, 0, 0], sizes = [8, 2, 1, 8, 128], strides = [1, 1, 1, 1, 1]} : vector<8x2x2x8x128xf32> to vector<8x2x1x8x128xf32>
    %57 = vector.shape_cast %56 : vector<8x2x1x8x128xf32> to vector<8x2x8x128xf32>
    %58 = vector.extract_strided_slice %55 {offsets = [0, 0, 1, 0, 0], sizes = [8, 2, 1, 8, 128], strides = [1, 1, 1, 1, 1]} : vector<8x2x2x8x128xf32> to vector<8x2x1x8x128xf32>
    %59 = vector.shape_cast %58 : vector<8x2x1x8x128xf32> to vector<8x2x8x128xf32>
    %60 = arith.maximumf %57, %59 : vector<8x2x8x128xf32>
    %61 = vector.shape_cast %60 : vector<8x2x8x128xf32> to vector<4x2x2x8x128xf32>
    %62 = vector.extract_strided_slice %61 {offsets = [0, 0, 0, 0, 0], sizes = [4, 1, 2, 8, 128], strides = [1, 1, 1, 1, 1]} : vector<4x2x2x8x128xf32> to vector<4x1x2x8x128xf32>
    %63 = vector.shape_cast %62 : vector<4x1x2x8x128xf32> to vector<4x2x8x128xf32>
    %64 = vector.extract_strided_slice %61 {offsets = [0, 1, 0, 0, 0], sizes = [4, 1, 2, 8, 128], strides = [1, 1, 1, 1, 1]} : vector<4x2x2x8x128xf32> to vector<4x1x2x8x128xf32>
    %65 = vector.shape_cast %64 : vector<4x1x2x8x128xf32> to vector<4x2x8x128xf32>
    %66 = arith.maximumf %63, %65 : vector<4x2x8x128xf32>
    %67 = vector.extract_strided_slice %66 {offsets = [0, 0, 0, 0], sizes = [4, 2, 8, 64], strides = [1, 1, 1, 1]} : vector<4x2x8x128xf32> to vector<4x2x8x64xf32>
    %68 = vector.extract_strided_slice %66 {offsets = [0, 0, 0, 64], sizes = [4, 2, 8, 64], strides = [1, 1, 1, 1]} : vector<4x2x8x128xf32> to vector<4x2x8x64xf32>
    %69 = arith.maximumf %67, %68 : vector<4x2x8x64xf32>
    %c0_63 = arith.constant 0 : index
    %c0_64 = arith.constant 0 : index
    %70 = vector.load %arg3[%c0_63, %c0_64] : memref<1x64xf32, #tpu.memory_space<vmem>>, vector<1x64xf32>
    %71 = vector.shape_cast %70 : vector<1x64xf32> to vector<1x1x1x64xf32>
    %72 = vector.broadcast %71 : vector<1x1x1x64xf32> to vector<4x2x8x64xf32>
    %73 = arith.addf %69, %72 : vector<4x2x8x64xf32>
    %cst_65 = arith.constant 0.000000e+00 : f32
    %74 = vector.broadcast %cst_65 : f32 to vector<4x2x8x64xf32>
    %75 = arith.maximumf %73, %74 : vector<4x2x8x64xf32>
    %76 = vector.shape_cast %75 : vector<4x2x8x64xf32> to vector<8x8x64xf32>
    %cst_66 = arith.constant 0.000000e+00 : f32
    %77 = vector.broadcast %cst_66 : f32 to vector<8x768xf32>
    %78 = vector.extract_strided_slice %76 {offsets = [0, 0, 0], sizes = [1, 8, 64], strides = [1, 1, 1]} : vector<8x8x64xf32> to vector<1x8x64xf32>
    %79 = vector.shape_cast %78 : vector<1x8x64xf32> to vector<8x64xf32>
    %80 = arith.truncf %79 : vector<8x64xf32> to vector<8x64xbf16>
    %c0_67 = arith.constant 0 : index
    %c0_68 = arith.constant 0 : index
    %81 = vector.load %arg4[%c0_67, %c0_68] : memref<512x768xbf16, #tpu.memory_space<vmem>>, vector<64x768xbf16>
    %cst_69 = arith.constant dense<0.000000e+00> : vector<8x768xf32>
    %82 = tpu.matmul %80, %81, %cst_69 {dimension_numbers = #tpu.dot_dimension_numbers<[1], [0], [0], [1], [0, 0, 1, 1], [], []>} : vector<8x64xbf16>, vector<64x768xbf16>, vector<8x768xf32> -> vector<8x768xf32>
    %83 = arith.addf %77, %82 : vector<8x768xf32>
    %84 = vector.extract_strided_slice %76 {offsets = [1, 0, 0], sizes = [1, 8, 64], strides = [1, 1, 1]} : vector<8x8x64xf32> to vector<1x8x64xf32>
    %85 = vector.shape_cast %84 : vector<1x8x64xf32> to vector<8x64xf32>
    %86 = arith.truncf %85 : vector<8x64xf32> to vector<8x64xbf16>
    %c64 = arith.constant 64 : index
    %c0_70 = arith.constant 0 : index
    %87 = vector.load %arg4[%c64, %c0_70] : memref<512x768xbf16, #tpu.memory_space<vmem>>, vector<64x768xbf16>
    %cst_71 = arith.constant dense<0.000000e+00> : vector<8x768xf32>
    %88 = tpu.matmul %86, %87, %cst_71 {dimension_numbers = #tpu.dot_dimension_numbers<[1], [0], [0], [1], [0, 0, 1, 1], [], []>} : vector<8x64xbf16>, vector<64x768xbf16>, vector<8x768xf32> -> vector<8x768xf32>
    %89 = arith.addf %83, %88 : vector<8x768xf32>
    %90 = vector.extract_strided_slice %76 {offsets = [2, 0, 0], sizes = [1, 8, 64], strides = [1, 1, 1]} : vector<8x8x64xf32> to vector<1x8x64xf32>
    %91 = vector.shape_cast %90 : vector<1x8x64xf32> to vector<8x64xf32>
    %92 = arith.truncf %91 : vector<8x64xf32> to vector<8x64xbf16>
    %c128 = arith.constant 128 : index
    %c0_72 = arith.constant 0 : index
    %93 = vector.load %arg4[%c128, %c0_72] : memref<512x768xbf16, #tpu.memory_space<vmem>>, vector<64x768xbf16>
    %cst_73 = arith.constant dense<0.000000e+00> : vector<8x768xf32>
    %94 = tpu.matmul %92, %93, %cst_73 {dimension_numbers = #tpu.dot_dimension_numbers<[1], [0], [0], [1], [0, 0, 1, 1], [], []>} : vector<8x64xbf16>, vector<64x768xbf16>, vector<8x768xf32> -> vector<8x768xf32>
    %95 = arith.addf %89, %94 : vector<8x768xf32>
    %96 = vector.extract_strided_slice %76 {offsets = [3, 0, 0], sizes = [1, 8, 64], strides = [1, 1, 1]} : vector<8x8x64xf32> to vector<1x8x64xf32>
    %97 = vector.shape_cast %96 : vector<1x8x64xf32> to vector<8x64xf32>
    %98 = arith.truncf %97 : vector<8x64xf32> to vector<8x64xbf16>
    %c192 = arith.constant 192 : index
    %c0_74 = arith.constant 0 : index
    %99 = vector.load %arg4[%c192, %c0_74] : memref<512x768xbf16, #tpu.memory_space<vmem>>, vector<64x768xbf16>
    %cst_75 = arith.constant dense<0.000000e+00> : vector<8x768xf32>
    %100 = tpu.matmul %98, %99, %cst_75 {dimension_numbers = #tpu.dot_dimension_numbers<[1], [0], [0], [1], [0, 0, 1, 1], [], []>} : vector<8x64xbf16>, vector<64x768xbf16>, vector<8x768xf32> -> vector<8x768xf32>
    %101 = arith.addf %95, %100 : vector<8x768xf32>
    %102 = vector.extract_strided_slice %76 {offsets = [4, 0, 0], sizes = [1, 8, 64], strides = [1, 1, 1]} : vector<8x8x64xf32> to vector<1x8x64xf32>
    %103 = vector.shape_cast %102 : vector<1x8x64xf32> to vector<8x64xf32>
    %104 = arith.truncf %103 : vector<8x64xf32> to vector<8x64xbf16>
    %c256 = arith.constant 256 : index
    %c0_76 = arith.constant 0 : index
    %105 = vector.load %arg4[%c256, %c0_76] : memref<512x768xbf16, #tpu.memory_space<vmem>>, vector<64x768xbf16>
    %cst_77 = arith.constant dense<0.000000e+00> : vector<8x768xf32>
    %106 = tpu.matmul %104, %105, %cst_77 {dimension_numbers = #tpu.dot_dimension_numbers<[1], [0], [0], [1], [0, 0, 1, 1], [], []>} : vector<8x64xbf16>, vector<64x768xbf16>, vector<8x768xf32> -> vector<8x768xf32>
    %107 = arith.addf %101, %106 : vector<8x768xf32>
    %108 = vector.extract_strided_slice %76 {offsets = [5, 0, 0], sizes = [1, 8, 64], strides = [1, 1, 1]} : vector<8x8x64xf32> to vector<1x8x64xf32>
    %109 = vector.shape_cast %108 : vector<1x8x64xf32> to vector<8x64xf32>
    %110 = arith.truncf %109 : vector<8x64xf32> to vector<8x64xbf16>
    %c320 = arith.constant 320 : index
    %c0_78 = arith.constant 0 : index
    %111 = vector.load %arg4[%c320, %c0_78] : memref<512x768xbf16, #tpu.memory_space<vmem>>, vector<64x768xbf16>
    %cst_79 = arith.constant dense<0.000000e+00> : vector<8x768xf32>
    %112 = tpu.matmul %110, %111, %cst_79 {dimension_numbers = #tpu.dot_dimension_numbers<[1], [0], [0], [1], [0, 0, 1, 1], [], []>} : vector<8x64xbf16>, vector<64x768xbf16>, vector<8x768xf32> -> vector<8x768xf32>
    %113 = arith.addf %107, %112 : vector<8x768xf32>
    %114 = vector.extract_strided_slice %76 {offsets = [6, 0, 0], sizes = [1, 8, 64], strides = [1, 1, 1]} : vector<8x8x64xf32> to vector<1x8x64xf32>
    %115 = vector.shape_cast %114 : vector<1x8x64xf32> to vector<8x64xf32>
    %116 = arith.truncf %115 : vector<8x64xf32> to vector<8x64xbf16>
    %c384 = arith.constant 384 : index
    %c0_80 = arith.constant 0 : index
    %117 = vector.load %arg4[%c384, %c0_80] : memref<512x768xbf16, #tpu.memory_space<vmem>>, vector<64x768xbf16>
    %cst_81 = arith.constant dense<0.000000e+00> : vector<8x768xf32>
    %118 = tpu.matmul %116, %117, %cst_81 {dimension_numbers = #tpu.dot_dimension_numbers<[1], [0], [0], [1], [0, 0, 1, 1], [], []>} : vector<8x64xbf16>, vector<64x768xbf16>, vector<8x768xf32> -> vector<8x768xf32>
    %119 = arith.addf %113, %118 : vector<8x768xf32>
    %120 = vector.extract_strided_slice %76 {offsets = [7, 0, 0], sizes = [1, 8, 64], strides = [1, 1, 1]} : vector<8x8x64xf32> to vector<1x8x64xf32>
    %121 = vector.shape_cast %120 : vector<1x8x64xf32> to vector<8x64xf32>
    %122 = arith.truncf %121 : vector<8x64xf32> to vector<8x64xbf16>
    %c448 = arith.constant 448 : index
    %c0_82 = arith.constant 0 : index
    %123 = vector.load %arg4[%c448, %c0_82] : memref<512x768xbf16, #tpu.memory_space<vmem>>, vector<64x768xbf16>
    %cst_83 = arith.constant dense<0.000000e+00> : vector<8x768xf32>
    %124 = tpu.matmul %122, %123, %cst_83 {dimension_numbers = #tpu.dot_dimension_numbers<[1], [0], [0], [1], [0, 0, 1, 1], [], []>} : vector<8x64xbf16>, vector<64x768xbf16>, vector<8x768xf32> -> vector<8x768xf32>
    %125 = arith.addf %119, %124 : vector<8x768xf32>
    %c0_84 = arith.constant 0 : index
    %c0_85 = arith.constant 0 : index
    %126 = vector.load %arg5[%c0_84, %c0_85] : memref<1x768xf32, #tpu.memory_space<vmem>>, vector<1x768xf32>
    %127 = vector.broadcast %126 : vector<1x768xf32> to vector<8x768xf32>
    %128 = arith.addf %125, %127 : vector<8x768xf32>
    %129 = arith.truncf %128 : vector<8x768xf32> to vector<8x768xbf16>
    %c0_86 = arith.constant 0 : index
    %c0_87 = arith.constant 0 : index
    %130 = vector.load %arg6[%c0_86, %c0_87] : memref<768x256xbf16, #tpu.memory_space<vmem>>, vector<768x256xbf16>
    %cst_88 = arith.constant dense<0.000000e+00> : vector<8x256xf32>
    %131 = tpu.matmul %129, %130, %cst_88 {dimension_numbers = #tpu.dot_dimension_numbers<[1], [0], [0], [1], [0, 0, 1, 1], [], []>} : vector<8x768xbf16>, vector<768x256xbf16>, vector<8x256xf32> -> vector<8x256xf32>
    %c0_89 = arith.constant 0 : index
    %c0_90 = arith.constant 0 : index
    %132 = vector.load %arg7[%c0_89, %c0_90] : memref<1x256xf32, #tpu.memory_space<vmem>>, vector<1x256xf32>
    %133 = vector.broadcast %132 : vector<1x256xf32> to vector<8x256xf32>
    %134 = arith.addf %131, %133 : vector<8x256xf32>
    %c0_91 = arith.constant 0 : index
    %c0_92 = arith.constant 0 : index
    %135 = vector.load %arg8[%c0_91, %c0_92] : memref<8x256xf32, #tpu.memory_space<vmem>>, vector<8x256xf32>
    tpu.vector_store %arg8[%c0_91, %c0_92], %134 {strides = array<i32>} : memref<8x256xf32, #tpu.memory_space<vmem>>, vector<8x256xf32>,
    return
  }
  func.func @transform_0(%arg0: i32) -> (i32, i32, i32, i32) {
    %c0_i32 = arith.constant 0 : i32
    %c0_i32_0 = arith.constant 0 : i32
    %c0_i32_1 = arith.constant 0 : i32
    %c0_i32_2 = arith.constant 0 : i32
    return %c0_i32, %c0_i32_0, %arg0, %c0_i32_1 : i32, i32, i32, i32
  }
  func.func @transform_1(%arg0: i32) -> (i32, i32, i32) {
    %c0_i32 = arith.constant 0 : i32
    %c0_i32_0 = arith.constant 0 : i32
    %c0_i32_1 = arith.constant 0 : i32
    %c0_i32_2 = arith.constant 0 : i32
    return %c0_i32, %c0_i32_0, %c0_i32_1 : i32, i32, i32
  }
  func.func @transform_2(%arg0: i32) -> (i32, i32) {
    %c0_i32 = arith.constant 0 : i32
    %c0_i32_0 = arith.constant 0 : i32
    %c0_i32_1 = arith.constant 0 : i32
    return %c0_i32, %c0_i32_0 : i32, i32
  }
  func.func @transform_3(%arg0: i32) -> (i32, i32) {
    %c0_i32 = arith.constant 0 : i32
    %c0_i32_0 = arith.constant 0 : i32
    %c0_i32_1 = arith.constant 0 : i32
    return %c0_i32, %c0_i32_0 : i32, i32
  }
  func.func @transform_4(%arg0: i32) -> (i32, i32) {
    %c0_i32 = arith.constant 0 : i32
    %c0_i32_0 = arith.constant 0 : i32
    %c0_i32_1 = arith.constant 0 : i32
    return %c0_i32, %c0_i32_0 : i32, i32
  }
  func.func @transform_5(%arg0: i32) -> (i32, i32) {
    %c0_i32 = arith.constant 0 : i32
    %c0_i32_0 = arith.constant 0 : i32
    %c0_i32_1 = arith.constant 0 : i32
    return %c0_i32, %c0_i32_0 : i32, i32
  }
  func.func @transform_6(%arg0: i32) -> (i32, i32) {
    %c0_i32 = arith.constant 0 : i32
    %c0_i32_0 = arith.constant 0 : i32
    %c0_i32_1 = arith.constant 0 : i32
    return %c0_i32, %c0_i32_0 : i32, i32
  }
  func.func @transform_7(%arg0: i32) -> (i32, i32) {
    %c0_i32 = arith.constant 0 : i32
    %c0_i32_0 = arith.constant 0 : i32
    return %arg0, %c0_i32 : i32, i32
  }
}

</mosaic_0001>

<bundles_post_ra>
// kernel: rmm_nn_2d3d_forward.1
= control target key start
LH: loop header
LB: loop body
LE: loop exit
PB: predicated region body
PF: predicated region fallthrough
CT: control target
= control target key end

     0   :  { %s10377_s0 = inlined_call_operand.hbm [shape: bf16[10,6,16,20], index: 0, kind: input, shape index: {}]   ;;  %s10378_s1 = inlined_call_operand.hbm [shape: bf16[9,20,128], index: 1, kind: input, shape index: {}]   ;;  %s10379_s2 = inlined_call_operand.hbm [shape: f32[1,64], index: 2, kind: input, shape index: {}]   ;;  %s10380_s3 = inlined_call_operand.hbm [shape: bf16[512,768], index: 3, kind: input, shape index: {}]   ;;  %s10381_s4 = inlined_call_operand.hbm [shape: f32[1,768], index: 4, kind: input, shape index: {}]   ;;  %s10382_s5 = inlined_call_operand.hbm [shape: bf16[768,256], index: 5, kind: input, shape index: {}]   ;;  %s10383_s6 = inlined_call_operand.hbm [shape: f32[1,256], index: 6, kind: input, shape index: {}]   ;;  %s10384_s7 = inlined_call_operand.hbm [shape: f32[16,256], index: 7, kind: output, shape index: {}]  }
   0x1   :  { %10391 = sst [smem:[#allocation20_spill]] %s10378_s1 }
   0x2   :  { %12 = vsyncpa [#allocation3], 0 }
   0x3   :  { %14 = vsyncpa [#allocation3 + $0x1], 0 }
   0x4   :  { %15 = vsyncpa [#allocation6], 0 }
   0x5   :  { %16 = vsyncpa [#allocation9], 0 }
   0x6   :  { %17 = vsyncpa [#allocation12], 0 }
   0x7   :  { %18 = vsyncpa [#allocation4], 0 }
   0x8   :  { %20 = vsyncpa [#allocation4 + $0x1], 0  ;;  %s9540_s24 = smov 0   ;;  %s9542_s25 = smov 0  }
   0x9   :  { %s9544_s26 = smov 0   ;;  %s9546_s27 = smov 0  }
   0xa LB: > { %s9484_s28 = smov [#allocation5]   ;;  %s9561_s30 = sadd.s32 4294967295, %s9482_s27   ;;  %s9482_s27 = sphi %s9546_s27, %s10417_s27   ;;  %s9478_s26 = sphi %s9544_s26, %s10416_s26   ;;  %s9474_s25 = sphi %s9542_s25, %s10415_s25   ;;  %s9470_s24 = sphi %s9540_s24, %s10414_s24  }
   0xb   : > { %s221_s29 = sshll.u32 %s9484_s28, 4  ;;  %p6836_p0 = scmp.ge.s32.totalorder %s9482_s27, 1  ;;  %s9566_s29 = int_to_ptr.vmem [resolvable:$true] %s221_s29 }
   0xc   : > { %p10385_p1 = scmp.eq.s32.totalorder %s9561_s30, 0  ;;  %p209_p2 = scmp.lt.s32.totalorder %s9482_s27, 3 }
   0xd   : > { %s9485_s9 = smov [#allocation8]   ;;  %s9486_s12 = smov [#allocation11]  }
   0xe   : > { %p9568_p3 = pnand %p6836_p0, %p209_p2  ;;  %s245_s10 = sshll.u32 %s9485_s9, 4  ;;  %s9581_s10 = int_to_ptr.vmem [resolvable:$true] %s245_s10 }
   0xf   : > { %s9583_s13 = sshll.u32 %s9486_s12, 4  ;;  %s10394_s1 = sld [smem:[#allocation20_spill]]  ;;  %s270_s13 = int_to_ptr.vmem [resolvable:$true] %s9583_s13 }
  0x10   : > { %s10392_s8 = scalar_select %p9568_p3, 1, 0 }
  0x11   : > { %p8525_p5 = pneg %p9568_p3 }
  0x13   : > { %p9577_p6 = pnand %p8525_p5, %p10385_p1 }
  0x15   : > { %s9206_s16 = scalar_lea.hbm %s10394_s1, 1728  ;;  %p9593_p8 = pneg %p9577_p6 }
  0x16   : > { %p9207_p7 = scmp.ne.s32.totalorder %s10394_s1, %s9206_s16  ;;  %p9213_p11 = scmp.lt.u32.totalorder %s9206_s16, %s10394_s1 }
  0x18   : > { %p9209_p9 = pnand %p9593_p8, %p9207_p7 }
  0x1a   : > { %p9210_p10 = pneg %p9209_p9 }
  0x1c   : > { %p9215_p12 = pnand %p9213_p11, %p9210_p10 }
  0x1e   : > { %9218 = shalt.err (!%p9215_p12)
}
  0x1f   : > { %s9219_s22 = scalar_lea.vmem %s9566_s29, 1728  ;;  %p9227_p5 = scmp.lt.s32.totalorder %s9566_s29, %s9566_s29 }
  0x20   : > { %p9220_p13 = scmp.ne.s32.totalorder %s9566_s29, %s9219_s22  ;;  %p9228_p4 = scmp.lt.s32.totalorder %s9219_s22, %s9219_s22 }
  0x22   : > { %p9222_p0 = pnand %p9220_p13, %p9593_p8  ;;  %p9229_p7 = por %p9228_p4, %p9227_p5 }
  0x24   : > { %p9223_p2 = pneg %p9222_p0 }
  0x26   : > { %p9230_p9 = pnand %p9229_p7, %p9223_p2 }
  0x28   : > { %9233 = shalt.err (!%p9230_p9)
}
  0x29   : > { %s10387_s23 = smov 64   ;;  %s10388_s28 = smov 4  }
  0x2a   : > { %8528 = dma.hbm_to_vmem [thread:$0]  (!%p9577_p6), %s10394_s1, 1728, %s9566_s29, [#allocation6], %s10387_s23, %s10387_s23, %s10388_s28  }
  0x2b   : > { %s9234_s16 = scalar_lea.hbm %s10380_s3, 24576 }
  0x2c   : > { %p9235_p4 = scmp.ne.s32.totalorder %s10380_s3, %s9234_s16  ;;  %p9241_p12 = scmp.lt.u32.totalorder %s9234_s16, %s10380_s3 }
  0x2e   : > { %p9237_p10 = pnand %p9235_p4, %p9593_p8 }
  0x30   : > { %p9238_p11 = pneg %p9237_p10 }
  0x32   : > { %p9243_p13 = pnand %p9241_p12, %p9238_p11 }
  0x34   : > { %9246 = shalt.err (!%p9243_p13)
}
  0x35   : > { %s9247_s29 = scalar_lea.vmem %s9581_s10, 24576  ;;  %p9255_p7 = scmp.lt.s32.totalorder %s9581_s10, %s9581_s10 }
  0x36   : > { %p9248_p0 = scmp.ne.s32.totalorder %s9581_s10, %s9247_s29  ;;  %p9256_p9 = scmp.lt.s32.totalorder %s9247_s29, %s9247_s29 }
  0x38   : > { %p9250_p2 = pnand %p9248_p0, %p9593_p8  ;;  %p9257_p4 = por %p9256_p9, %p9255_p7 }
  0x3a   : > { %p9251_p5 = pneg %p9250_p2 }
  0x3c   : > { %p9258_p10 = pnand %p9257_p4, %p9251_p5 }
  0x3e   : > { %9261 = shalt.err (!%p9258_p10)
}
  0x3f   : > { %s9489_s22 = smov 384   ;;  %s9490_s9 = smov 24  }
  0x40   : > { %8534 = dma.hbm_to_vmem [thread:$0]  (!%p9577_p6), %s10380_s3, 24576, %s9581_s10, [#allocation9], %s9489_s22, %s9489_s22, %s9490_s9  }
  0x41   : > { %s9262_s17 = scalar_lea.hbm %s10382_s5, 12288 }
  0x42   : > { %p9263_p11 = scmp.ne.s32.totalorder %s10382_s5, %s9262_s17  ;;  %p9269_p0 = scmp.lt.u32.totalorder %s9262_s17, %s10382_s5 }
  0x44   : > { %p9265_p12 = pnand %p9263_p11, %p9593_p8 }
  0x46   : > { %p9266_p13 = pneg %p9265_p12 }
  0x48   : > { %p9271_p2 = pnand %p9269_p0, %p9266_p13 }
  0x4a   : > { %9274 = shalt.err (!%p9271_p2)
}
  0x4b   : > { %s9275_s12 = scalar_lea.vmem %s270_s13, 12288  ;;  %p9283_p4 = scmp.lt.s32.totalorder %s270_s13, %s270_s13 }
  0x4c   : > { %p9276_p5 = scmp.ne.s32.totalorder %s270_s13, %s9275_s12  ;;  %p9284_p10 = scmp.lt.s32.totalorder %s9275_s12, %s9275_s12 }
  0x4e   : > { %p9278_p7 = pnand %p9276_p5, %p9593_p8  ;;  %p9285_p1 = por %p9284_p10, %p9283_p4 }
  0x50   : > { %p9279_p9 = pneg %p9278_p7 }
  0x52   : > { %p9286_p3 = pnand %p9285_p1, %p9279_p9 }
  0x54   : > { %9289 = shalt.err (!%p9286_p3)
}
  0x55   : > { %s10389_s10 = smov 128   ;;  %s9492_s22 = smov 8  }
  0x56   : > { %8540 = dma.hbm_to_vmem [thread:$0]  (!%p9577_p6), %s10382_s5, 12288, %s270_s13, [#allocation12], %s10389_s10, %s10389_s10, %s9492_s22  }
  0x57   : > { %s9493_s15 = smov [#allocation7]   ;;  %s9494_s17 = smov [#allocation10]  }
  0x58   : > { %s235_s16 = sshll.u32 %s9493_s15, 4  ;;  %s259_s18 = sshll.u32 %s9494_s17, 4  ;;  %s236_s16 = int_to_ptr.vmem [resolvable:$true] %s235_s16  ;;  %s260_s18 = int_to_ptr.vmem [resolvable:$true] %s259_s18 }
  0x59   : > { %s9290_s29 = scalar_lea.hbm %s10379_s2, 16 }
  0x5a   : > { %p9291_p1 = scmp.ne.s32.totalorder %s10379_s2, %s9290_s29  ;;  %p9297_p12 = scmp.lt.u32.totalorder %s9290_s29, %s10379_s2 }
  0x5c   : > { %p9293_p3 = pnand %p9291_p1, %p9593_p8 }
  0x5e   : > { %p9294_p11 = pneg %p9293_p3 }
  0x60   : > { %p9299_p13 = pnand %p9297_p12, %p9294_p11 }
  0x62   : > { %9302 = shalt.err (!%p9299_p13)
}
  0x63   : > { %s9303_s13 = scalar_lea.vmem %s236_s16, 16  ;;  %s9310_s22 = scalar_lea.vmem %s236_s16, 32 }
  0x64   : > { %p9304_p0 = scmp.ne.s32.totalorder %s236_s16, %s9303_s13  ;;  %p9311_p7 = scmp.lt.s32.totalorder %s236_s16, %s236_s16 }
  0x65   : > { %p9312_p9 = scmp.lt.s32.totalorder %s9310_s22, %s9303_s13 }
  0x66   : > { %p9306_p2 = pnand %p9304_p0, %p9593_p8 }
  0x67   : > { %p9313_p4 = por %p9312_p9, %p9311_p7 }
  0x68   : > { %p9307_p5 = pneg %p9306_p2 }
  0x6a   : > { %p9314_p10 = pnand %p9313_p4, %p9307_p5 }
  0x6c   : > { %9317 = shalt.err (!%p9314_p10)
}
  0x6d   : > { %8531 = dma.hbm_to_vmem [thread:$0]  (!%p9577_p6), %s10379_s2, 16, %s236_s16, [#allocation6]  }
  0x6e   : > { %s9318_s14 = scalar_lea.hbm %s10381_s4, 96 }
  0x6f   : > { %p9319_p1 = scmp.ne.s32.totalorder %s10381_s4, %s9318_s14  ;;  %p9325_p12 = scmp.lt.u32.totalorder %s9318_s14, %s10381_s4 }
  0x71   : > { %p9321_p3 = pnand %p9319_p1, %p9593_p8 }
  0x73   : > { %p9322_p11 = pneg %p9321_p3 }
  0x75   : > { %p9327_p13 = pnand %p9325_p12, %p9322_p11 }
  0x77   : > { %9330 = shalt.err (!%p9327_p13)
}
  0x78   : > { %s9331_s29 = scalar_lea.vmem %s260_s18, 96  ;;  %p9339_p7 = scmp.lt.s32.totalorder %s260_s18, %s260_s18 }
  0x79   : > { %p9332_p0 = scmp.ne.s32.totalorder %s260_s18, %s9331_s29  ;;  %p9340_p9 = scmp.lt.s32.totalorder %s9331_s29, %s9331_s29 }
  0x7b   : > { %p9334_p2 = pnand %p9332_p0, %p9593_p8  ;;  %p9341_p4 = por %p9340_p9, %p9339_p7 }
  0x7d   : > { %p9335_p5 = pneg %p9334_p2 }
  0x7f   : > { %p9342_p10 = pnand %p9341_p4, %p9335_p5 }
  0x81   : > { %9345 = shalt.err (!%p9342_p10)
}
  0x82   : > { %8537 = dma.hbm_to_vmem [thread:$0]  (!%p9577_p6), %s10381_s4, 96, %s260_s18, [#allocation9]  }
  0x83   : > { %s9495_s13 = smov [#allocation13]   ;;  %s9346_s1 = scalar_lea.hbm %s10383_s6, 32 }
  0x84   : > { %s283_s22 = sshll.u32 %s9495_s13, 4  ;;  %p9347_p1 = scmp.ne.s32.totalorder %s10383_s6, %s9346_s1  ;;  %s284_s22 = int_to_ptr.vmem [resolvable:$true] %s283_s22 }
  0x85   : > { %p9353_p12 = scmp.lt.u32.totalorder %s9346_s1, %s10383_s6 }
  0x86   : > { %p9349_p3 = pnand %p9347_p1, %p9593_p8 }
  0x88   : > { %p9350_p11 = pneg %p9349_p3 }
  0x8a   : > { %p9355_p13 = pnand %p9353_p12, %p9350_p11 }
  0x8c   : > { %9358 = shalt.err (!%p9355_p13)
}
  0x8d   : > { %s9359_s18 = scalar_lea.vmem %s284_s22, 32  ;;  %p9367_p7 = scmp.lt.s32.totalorder %s284_s22, %s284_s22 }
  0x8e   : > { %p9360_p0 = scmp.ne.s32.totalorder %s284_s22, %s9359_s18  ;;  %p9368_p9 = scmp.lt.s32.totalorder %s9359_s18, %s9359_s18 }
  0x90   : > { %p9362_p2 = pnand %p9360_p0, %p9593_p8  ;;  %p9369_p4 = por %p9368_p9, %p9367_p7 }
  0x92   : > { %p9363_p5 = pneg %p9362_p2 }
  0x94   : > { %p9370_p10 = pnand %p9369_p4, %p9363_p5 }
  0x96   : > { %9373 = shalt.err (!%p9370_p10)
}
  0x97   : > { %8543 = dma.hbm_to_vmem [thread:$0]  (!%p9577_p6), %s10383_s6, 32, %s284_s22, [#allocation12]  }
  0x98   : > { %s6835_s19 = sadd.s32 4294967294, %s9482_s27   ;;  %s9717_s11 = sadd.s32 1, %s9482_s27  }
  0x99   : > { %s30_s29 = ssub.s32 %s9482_s27, %s9717_s11  ;;  %s33_s16 = sadd.s32 1, %s9478_s26 }
  0x9a   : > { %p31_p8 = scmp.eq.s32.totalorder %s30_s29, 0  ;;  %p40_p1 = scmp.ne.s32.totalorder %s9478_s26, %s9474_s25 }
  0x9b   : > { %p41_p3 = scmp.eq.s32.totalorder %s9482_s27, 0  ;;  %p46_p11 = scmp.ne.s32.totalorder %s9474_s25, %s9470_s24 }
  0x9c   : > { %s9728_s12 = scalar_select %p31_p8, %s9478_s26, %s33_s16  }
  0x9d   : > { %p42_p12 = por %p41_p3, %p40_p1  ;;  %p10396_p13 = scmp.eq.s32.totalorder %s9561_s30, 0 }
  0x9e   : > { %p196_p6 = scmp.eq.s32.totalorder %s9561_s30, 1  ;;  %p202_p2 = scmp.eq.s32.totalorder %s6835_s19, 1 }
  0x9f   : > { %p9732_p0 = por %p10396_p13, %p46_p11  ;;  %p8558_p5 = scmp.lt.s32.totalorder %s9482_s27, 2 }
  0xa0   : > { %s294_s22 = sand.u32 1, %s9478_s26   ;;  %p9739_p7 = por %p196_p6, %p40_p1 }
  0xa1   : > { %p9743_p9 = por %p202_p2, %p46_p11  ;;  %s8495_s1 = smul.u32 240, %s294_s22 }
  0xa2   : > { %s10398_s23 = scalar_select %p9739_p7, 1, 0 }
  0xa3   : > { %s10399_s9 = scalar_select %p9743_p9, 1, 0 }
  0xa4   : > { %s6844_s28 = sshll.u32 %s9482_s27, 6  ;;  %p9748_p4 = pnand %p8558_p5, %p42_p12 }
  0xa5   : > { %s9755_s18 = scalar_lea.hbm %s10377_s0, %s6844_s28  ;;  %s298_s20 = scalar_lea.vmem [#allocation2], %s8495_s1 }
  0xa6   : > { %s304_s21 = sshll.u32 %s298_s20, 4  ;;  %s9759_s19 = scalar_lea.sflag [#allocation3], %s294_s22  ;;  %s9757_s21 = int_to_ptr.vmem [resolvable:$true] %s304_s21 }
  0xa7   : > { %s9374_s29 = scalar_lea.hbm %s9755_s18, 3840  ;;  %p9376_p8 = pneg %p9748_p4 }
  0xa8   : > { %p9375_p10 = scmp.ne.s32.totalorder %s9755_s18, %s9374_s29  ;;  %s9379_s15 = scalar_lea.hbm %s10377_s0, 7680 }
  0xa9   : > { %p9380_p11 = scmp.lt.u32.totalorder %s9755_s18, %s10377_s0  ;;  %p9381_p12 = scmp.lt.u32.totalorder %s9379_s15, %s9374_s29 }
  0xaa   : > { %p9377_p1 = pnand %p9376_p8, %p9375_p10  ;;  %p9383_p6 = scmp.lt.u32.totalorder %s9374_s29, %s9755_s18 }
  0xab   : > { %p9382_p13 = por %p9381_p12, %p9380_p11 }
  0xac   : > { %p9378_p3 = pneg %p9377_p1 }
  0xad   : > { %p9384_p2 = por %p9383_p6, %p9382_p13 }
  0xaf   : > { %p9385_p5 = pnand %p9384_p2, %p9378_p3 }
  0xb1   : > { %9388 = shalt.err (!%p9385_p5)
}
  0xb2   : > { %s9389_s22 = scalar_lea.vmem %s9757_s21, 3840  ;;  %s9496_s1 = smov [#allocation2]  }
  0xb3   : > { %p9390_p10 = scmp.ne.s32.totalorder %s9757_s21, %s9389_s22  ;;  %s9394_s20 = sshll.u32 %s9496_s1, 4  ;;  %s9395_s20 = int_to_ptr.vmem [resolvable:$false] %s9394_s20 }
  0xb4   : > { %s9396_s10 = scalar_lea.vmem %s9395_s20, 7680  ;;  %p9397_p7 = scmp.lt.s32.totalorder %s9757_s21, %s9395_s20 }
  0xb5   : > { %p9392_p1 = pnand %p9390_p10, %p9376_p8  ;;  %p9398_p11 = scmp.lt.s32.totalorder %s9396_s10, %s9389_s22 }
  0xb7   : > { %p9393_p9 = pneg %p9392_p1  ;;  %p9399_p12 = por %p9398_p11, %p9397_p7 }
  0xb9   : > { %p9400_p13 = pnand %p9399_p12, %p9393_p9 }
  0xbb   : > { %9403 = shalt.err (!%p9400_p13)
}
  0xbc   : > { %s10401_s29 = smov 4   ;;  %s10402_s16 = smov 64  }
  0xbd   : > { %s10403_s28 = smov 128   ;;  %p10404_p8 = scmp.ne.s32.totalorder %s10392_s8, 0 }
  0xbe   : > { %8547 = dma.hbm_to_vmem [thread:$0]  (!%p9748_p4), %s9755_s18, 3840, %s9757_s21, %s9759_s19, %s10403_s28, %s10402_s16, %s10401_s29  }
  0xbf   : > { %316 = sbr.rel (%p10404_p8) target bundleno = 1992 (0x7c8), region = 48  ;;  %s9793_s15 = sand.u32 (!%p10404_p8), 1, %s9474_s25  }
  0xc0   : > { %s8496_s17 = smul.u32 (!%p10404_p8), 240, %s9793_s15  ;;  %s319_s22 = scalar_lea.sflag (!%p10404_p8), [#allocation3], %s9793_s15 }
  0xc2   : > { %s9797_s1 = scalar_lea.vmem (!%p10404_p8), [#allocation2], %s8496_s17 }
  0xc6   : > { %9449 = dma.done.wait (%p9732_p0), %s319_s22, 3840  }
  0xc7   : > { %9451 = vsyncadd (%p9732_p0), %s319_s22, 4294963456  ;;  %p10405_p7 = scmp.eq.s32.totalorder %s9561_s30, 0 }
  0xc9   : > { %9453 = dma.done.wait (%p10405_p7), [#allocation6], 1744   ;;  %p10406_p9 = pmov %p10405_p7 }
  0xca   : > { %p10407_p4 = pmov %p10405_p7 }
  0xcb   : > { %9455 = vsyncadd (%p10406_p9), [#allocation6], 4294965552 }
  0xcc   : > { %9457 = dma.done.wait (%p10407_p4), [#allocation9], 24672   ;;  %p10408_p3 = pmov %p10407_p4 }
  0xce   : > { %9459 = vsyncadd (%p10408_p3), [#allocation9], 4294942624  ;;  %p10409_p6 = pmov %p10408_p3 }
  0xcf   : > { %p10410_p2 = pmov %p10408_p3 }
  0xd0   : > { %9461 = dma.done.wait (%p10409_p6), [#allocation12], 12320  }
  0xd1   : > { %9463 = vsyncadd (%p10410_p2), [#allocation12], 4294954976  ;;  %vm588_vm0 = vcmask 1041408   ;;  %v8612_v0 = vld [vmem:[#allocation5 + $0xc] sm:$0xff]   ;;  %vm539_vm1 = vcmask 162816   ;;  %v8614_v2 = vld [vmem:[%s9797_s1 + $0x4] sm:$0xff]  }
  0xd2   : > { %v8613_v1 = vld [vmem:[#allocation5 + $0x14] ss:$0 sps:$4 sm:$0x33]   ;;  %7896 = vmatprep.subr.bf16.mxu0 %v8612_v0  ;;  %7900 = vmatprep.mubr.msk.bf16.mxu0 %vm539_vm1, %v8614_v2  ;;  %v8616_v4 = vld [vmem:[#allocation5] sm:$0xff]   ;;  %v8634_v12 = vld [vmem:[#allocation5 + $0x18] sm:$0xff]   ;;  %s9498_s8 = smov 64  }
  0xd3   : > { %7897 = vmatpush3.bf16.msra.mxu0 %v8612_v0  ;;  %v590_v3 = vsel %vm588_vm0, %v8613_v1, 0  ;;  %v8615_v5 = vld [vmem:[%s9797_s1 + $0xc] sm:$0xff]   ;;  %v8617_v6 = vld [vmem:[%s9797_s1 + $0x1c] sm:$0xff]   ;;  %v8618_v7 = vld [vmem:[%s9797_s1 + $0x24] sm:$0xff]   ;;  %vm3901_vm2 = vcmask 523264   ;;  %s6852_s13 = sshll.u32 %s9793_s15, 4 }
  0xd4   : > { %8486 = vmatprep.subr.msk.bf16.mxu0 %vm588_vm0, %v8613_v1  ;;  %v8625_v8 = vld [vmem:[#allocation5 + $0x8] ss:$0 sps:$4 sm:$0x33]   ;;  %v8620_v11 = vld [vmem:[%s9797_s1 + $0x3c] sm:$0xff]   ;;  %v8621_v13 = vld [vmem:[%s9797_s1 + $0x4c] sm:$0xff]   ;;  %s7733_s14 = sshll.u32 %s9561_s30, 8 }
  0xd5   : > { %v8619_v9 = vld [vmem:[%s9797_s1 + $0x34] sm:$0xff]   ;;  %v891_v10 = vsel %vm588_vm0, %v8625_v8, 0  ;;  %v8623_v15 = vld [vmem:[%s9797_s1 + $0x64] sm:$0xff]   ;;  %v8624_v16 = vld [vmem:[%s9797_s1 + $0x6c] sm:$0xff]   ;;  %s376_s18 = scalar_lea.vmem [#allocation14], %s6852_s13  ;;  %s10333_s10 = scalar_lea.hbm %s10384_s7, %s7733_s14 }
  0xd6   : > { %v8622_v14 = vld [vmem:[%s9797_s1 + $0x54] sm:$0xff]   ;;  %v8626_v17 = vld [vmem:[%s9797_s1 + $0x7c] sm:$0xff]   ;;  %v8627_v18 = vld [vmem:[%s9797_s1 + $0x84] sm:$0xff]   ;;  %s6708_s21 = sshll.u32 %s376_s18, 4  ;;  %s6694_s30 = scalar_lea.sflag [#allocation4], %s9793_s15  ;;  %s10335_s21 = int_to_ptr.vmem [resolvable:$true] %s6708_s21 }
  0xd7   : > { %7899 = vmatpush3.bf16.msra.mxu0 %v590_v3  ;;  %v8628_v19 = vld [vmem:[%s9797_s1 + $0x94] sm:$0xff]   ;;  %v8629_v20 = vld [vmem:[%s9797_s1 + $0x9c] sm:$0xff]   ;;  %v8630_v21 = vld [vmem:[%s9797_s1 + $0xac] sm:$0xff]   ;;  %s9404_s29 = scalar_lea.vmem %s10335_s21, 256  ;;  %p10411_p5 = scmp.ne.s32.totalorder %s10398_s23, 0 }
  0xd8   : > { %7932 = vmatprep.subr.bf16.mxu0 %v8616_v4  ;;  %v8631_v22 = vld [vmem:[%s9797_s1 + $0xb4] sm:$0xff]   ;;  %v8632_v23 = vld [vmem:[%s9797_s1] sm:$0xff]   ;;  %v8633_v24 = vld [vmem:[%s9797_s1 + $0x8] sm:$0xff]   ;;  %p9405_p0 = scmp.ne.s32.totalorder %s10335_s21, %s9404_s29  ;;  %s9499_s16 = smov [#allocation14]  }
  0xd9   : > { %v8635_v25 = vld [vmem:[%s9797_s1 + $0x18] sm:$0xff]   ;;  %v8643_v26 = vld [vmem:[#allocation5 + $0x20] ss:$0 sps:$4 sm:$0x33]   ;;  %v8639_v32 = vld [vmem:[%s9797_s1 + $0x48] sm:$0xff]   ;;  %s9408_s28 = sshll.u32 %s9499_s16, 4  ;;  %s9409_s28 = int_to_ptr.vmem [resolvable:$false] %s9408_s28 }
  0xda   : > { %7901 = vmatmul.mubr.msk.bf16.vlgmr.msra.gmra.mrb[0].mxu0 %vm539_vm1, %v8615_v5  ;;  %v1229_v27 = vsel %vm588_vm0, %v8643_v26, 0  ;;  %v8652_v28 = vld [vmem:[#allocation5 + $0x24] sm:$0xff]   ;;  %v8661_v45 = vld [vmem:[#allocation5 + $0x2c] ss:$0 sps:$4 sm:$0x33]   ;;  %v8670_v46 = vld [vmem:[#allocation5 + $0x30] sm:$0xff]   ;;  %p9406_p10 = pnand %p9405_p0, %p10411_p5  ;;  %p9411_p11 = scmp.lt.s32.totalorder %s10335_s21, %s9409_s28 }
  0xdb   : > { %7933 = vmatpush3.bf16.msra.mxu0 %v8616_v4  ;;  %7904 = vmatprep.mubr.msk.bf16.mxu0 %vm539_vm1, %v8617_v6  ;;  %v8636_v29 = vld [vmem:[%s9797_s1 + $0x20] sm:$0xff]   ;;  %v8637_v30 = vld [vmem:[%s9797_s1 + $0x30] sm:$0xff]   ;;  %v8638_v31 = vld [vmem:[%s9797_s1 + $0x38] sm:$0xff]   ;;  %v1599_v48 = vsel %vm588_vm0, %v8661_v45, 0  ;;  %s9410_s17 = scalar_lea.vmem %s9409_s28, 512 }
  0xdc   : > { %8487 = vmatprep.subr.msk.bf16.mxu0 %vm588_vm0, %v8625_v8  ;;  %v8640_v33 = vld [vmem:[%s9797_s1 + $0x50] sm:$0xff]   ;;  %v8641_v34 = vld [vmem:[%s9797_s1 + $0x60] sm:$0xff]   ;;  %v8642_v35 = vld [vmem:[%s9797_s1 + $0x68] sm:$0xff]   ;;  %p9407_p1 = pneg %p9406_p10  ;;  %p9412_p12 = scmp.lt.s32.totalorder %s9410_s17, %s9404_s29 }
  0xdd   : > { %v8644_v36 = vld [vmem:[%s9797_s1 + $0x78] sm:$0xff]   ;;  %v8645_v37 = vld [vmem:[%s9797_s1 + $0x80] sm:$0xff]   ;;  %v8646_v38 = vld [vmem:[%s9797_s1 + $0x90] sm:$0xff]  }
  0xde   : > { %v8647_v39 = vld [vmem:[%s9797_s1 + $0x98] sm:$0xff]   ;;  %v8648_v40 = vld [vmem:[%s9797_s1 + $0xa8] sm:$0xff]   ;;  %v8649_v41 = vld [vmem:[%s9797_s1 + $0xb0] sm:$0xff]   ;;  %p9413_p13 = por %p9412_p12, %p9411_p11 }
  0xdf   : > { %7935 = vmatpush3.bf16.msra.mxu0 %v891_v10  ;;  %v8650_v42 = vld [vmem:[%s9797_s1 + $0x8] sm:$0xff]   ;;  %v8651_v43 = vld [vmem:[%s9797_s1 + $0x10] sm:$0xff]   ;;  %v8653_v44 = vld [vmem:[%s9797_s1 + $0x20] sm:$0xff]  }
  0xe0   : > { %7968 = vmatprep.subr.bf16.mxu0 %v8634_v12  ;;  %v8654_v47 = vld [vmem:[%s9797_s1 + $0x28] sm:$0xff]   ;;  %v8655_v49 = vld [vmem:[%s9797_s1 + $0x38] sm:$0xff]   ;;  %v8656_v50 = vld [vmem:[%s9797_s1 + $0x40] sm:$0xff]   ;;  %p9414_p8 = pnand %p9413_p13, %p9407_p1 }
  0xe1   : > { %v8657_v51 = vld [vmem:[%s9797_s1 + $0x50] sm:$0xff]   ;;  %v8658_v52 = vld [vmem:[%s9797_s1 + $0x58] sm:$0xff]   ;;  %v8659_v53 = vld [vmem:[%s9797_s1 + $0x68] sm:$0xff]  }
  0xe2   : > { %7905 = vmatmul.mubr.msk.bf16.gmra.mrb[4].mxu0 %vm539_vm1, %v8618_v7  ;;  %v8660_v54 = vld [vmem:[%s9797_s1 + $0x70] sm:$0xff]   ;;  %v8662_v55 = vld [vmem:[%s9797_s1 + $0x80] sm:$0xff]   ;;  %v8663_v56 = vld [vmem:[%s9797_s1 + $0x88] sm:$0xff]  }
  0xe3   : > { %7908 = vmatprep.mubr.msk.bf16.mxu0 %vm539_vm1, %v8619_v9  ;;  %v8664_v57 = vld [vmem:[%s9797_s1 + $0x98] sm:$0xff]   ;;  %v8665_v58 = vld [vmem:[%s9797_s1 + $0xa0] sm:$0xff]   ;;  %v8666_v59 = vld [vmem:[%s9797_s1 + $0xb0] sm:$0xff]  }
  0xe4   : > { %v8667_v60 = vld [vmem:[%s9797_s1 + $0xb8] sm:$0xff]   ;;  %v8669_v62 = vld [vmem:[%s9797_s1 + $0x20] sm:$0xff]   ;;  %v8671_v63 = vld [vmem:[%s9797_s1 + $0x30] sm:$0xff]  }
  0xe5   : > { %v8668_v61 = vld [vmem:[%s9797_s1 + $0x18] sm:$0xff]   ;;  %v8673_v4 = vld [vmem:[%s9797_s1 + $0x48] sm:$0xff]   ;;  %v8674_v5 = vld [vmem:[%s9797_s1 + $0x50] sm:$0xff]  }
  0xe6   : > { %v8679_v0 = vld [vmem:[#allocation5 + $0x38] ss:$0 sps:$4 sm:$0x33]   ;;  %v8688_v1 = vld [vmem:[#allocation5 + $0x3c] sm:$0xff]  }
  0xe7   : > { %v8672_v2 = vld [vmem:[%s9797_s1 + $0x38] sm:$0xff]   ;;  %v1969_v3 = vsel %vm588_vm0, %v8679_v0, 0  ;;  %v8675_v6 = vld [vmem:[%s9797_s1 + $0x60] sm:$0xff]   ;;  %v8676_v7 = vld [vmem:[%s9797_s1 + $0x68] sm:$0xff]  }
  0xe8   : > { %v8677_v8 = vld [vmem:[%s9797_s1 + $0x78] sm:$0xff]   ;;  %v8678_v9 = vld [vmem:[%s9797_s1 + $0x80] sm:$0xff]   ;;  %v8680_v10 = vld [vmem:[%s9797_s1 + $0x90] sm:$0xff]  }
  0xea   : > { %7909 = vmatmul.mubr.msk.bf16.gmra.mrb[8].mxu0 %vm539_vm1, %v8620_v11  ;;  %v8681_v11 = vld [vmem:[%s9797_s1 + $0x98] sm:$0xff]  }
  0xeb   : > { %7912 = vmatprep.mubr.msk.bf16.mxu0 %vm539_vm1, %v8621_v13  ;;  %v8683_v13 = vld [vmem:[%s9797_s1 + $0xb0] sm:$0xff]  }
  0xf2   : > { %7913 = vmatmul.mubr.msk.bf16.gmra.mrb[12].mxu0 %vm539_vm1, %v8622_v14  ;;  %v8684_v14 = vld [vmem:[%s9797_s1 + $0xc0] sm:$0xff]  }
  0xf3   : > { %7916 = vmatprep.mubr.msk.bf16.mxu0 %vm539_vm1, %v8623_v15  ;;  %v8685_v15 = vld [vmem:[%s9797_s1 + $0xc8] sm:$0xff]  }
  0xfa   : > { %7917 = vmatmul.mubr.msk.bf16.gmra.mrb[16].mxu0 %vm539_vm1, %v8624_v16  ;;  %v8686_v16 = vld [vmem:[%s9797_s1 + $0x1c] sm:$0xff]  }
  0xfb   : > { %7920 = vmatprep.mubr.msk.bf16.mxu0 %vm539_vm1, %v8626_v17  ;;  %v8687_v17 = vld [vmem:[%s9797_s1 + $0x24] sm:$0xff]  }
 0x102   : > { %7921 = vmatmul.mubr.msk.bf16.gmra.mrb[20].mxu0 %vm539_vm1, %v8627_v18  ;;  %v8689_v18 = vld [vmem:[%s9797_s1 + $0x34] sm:$0xff]  }
 0x103   : > { %7924 = vmatprep.mubr.msk.bf16.mxu0 %vm539_vm1, %v8628_v19  ;;  %v8697_v19 = vld [vmem:[#allocation5 + $0x44] ss:$0 sps:$4 sm:$0x33]  }
 0x10a   : > { %7925 = vmatmul.mubr.msk.bf16.gmra.mrb[24].mxu0 %vm539_vm1, %v8629_v20  ;;  %v2339_v20 = vsel %vm588_vm0, %v8697_v19, 0 }
 0x10b   : > { %7928 = vmatprep.mubr.msk.bf16.mxu0 %vm539_vm1, %v8630_v21  ;;  %v8706_v21 = vld [vmem:[#allocation5 + $0x48] sm:$0xff]  }
 0x112   : > { %7929 = vmatmul.mubr.msk.bf16.gmra.mrb[28].mxu0 %vm539_vm1, %v8631_v22  ;;  %v8690_v22 = vld [vmem:[%s9797_s1 + $0x3c] sm:$0xff]  }
 0x113   : > { %7936 = vmatprep.mubr.msk.bf16.mxu0 %vm539_vm1, %v8632_v23  ;;  %v8691_v23 = vld [vmem:[%s9797_s1 + $0x4c] sm:$0xff]  }
 0x11a   : > { %7937 = vmatmul.mubr.msk.bf16.vlgmr.msra.gmra.mrb[0].mxu0 %vm539_vm1, %v8633_v24  ;;  %v8692_v24 = vld [vmem:[%s9797_s1 + $0x54] sm:$0xff]  }
 0x11b   : > { %7969 = vmatpush3.bf16.msra.mxu0 %v8634_v12  ;;  %7940 = vmatprep.mubr.msk.bf16.mxu0 %vm539_vm1, %v8635_v25  ;;  %v8682_v12 = vld [vmem:[%s9797_s1 + $0xa8] sm:$0xff]  }
 0x11c   : > { %8488 = vmatprep.subr.msk.bf16.mxu0 %vm588_vm0, %v8643_v26  ;;  %v8693_v25 = vld [vmem:[%s9797_s1 + $0x64] sm:$0xff]   ;;  %v8694_v26 = vld [vmem:[%s9797_s1 + $0x6c] sm:$0xff]  }
 0x11f   : > { %7971 = vmatpush3.bf16.msra.mxu0 %v1229_v27  ;;  %v8695_v27 = vld [vmem:[%s9797_s1 + $0x7c] sm:$0xff]  }
 0x120   : > { %8004 = vmatprep.subr.bf16.mxu0 %v8652_v28 }
 0x122   : > { %7941 = vmatmul.mubr.msk.bf16.gmra.mrb[4].mxu0 %vm539_vm1, %v8636_v29  ;;  %v8698_v29 = vld [vmem:[%s9797_s1 + $0x94] sm:$0xff]  }
 0x123   : > { %7944 = vmatprep.mubr.msk.bf16.mxu0 %vm539_vm1, %v8637_v30  ;;  %v8699_v30 = vld [vmem:[%s9797_s1 + $0x9c] sm:$0xff]  }
 0x12a   : > { %7945 = vmatmul.mubr.msk.bf16.gmra.mrb[8].mxu0 %vm539_vm1, %v8638_v31  ;;  %v8700_v31 = vld [vmem:[%s9797_s1 + $0xac] sm:$0xff]  }
 0x12b   : > { %7948 = vmatprep.mubr.msk.bf16.mxu0 %vm539_vm1, %v8639_v32  ;;  %v8701_v32 = vld [vmem:[%s9797_s1 + $0xb4] sm:$0xff]  }
 0x132   : > { %7949 = vmatmul.mubr.msk.bf16.gmra.mrb[12].mxu0 %vm539_vm1, %v8640_v33  ;;  %v8702_v33 = vld [vmem:[%s9797_s1 + $0xc4] sm:$0xff]  }
 0x133   : > { %7952 = vmatprep.mubr.msk.bf16.mxu0 %vm539_vm1, %v8641_v34  ;;  %v8703_v34 = vld [vmem:[%s9797_s1 + $0xcc] sm:$0xff]  }
 0x13a   : > { %7953 = vmatmul.mubr.msk.bf16.gmra.mrb[16].mxu0 %vm539_vm1, %v8642_v35  ;;  %v8704_v35 = vld [vmem:[%s9797_s1 + $0x20] sm:$0xff]  }
 0x13b   : > { %7956 = vmatprep.mubr.msk.bf16.mxu0 %vm539_vm1, %v8644_v36  ;;  %v8705_v36 = vld [vmem:[%s9797_s1 + $0x28] sm:$0xff]  }
 0x142   : > { %7957 = vmatmul.mubr.msk.bf16.gmra.mrb[20].mxu0 %vm539_vm1, %v8645_v37  ;;  %v8707_v37 = vld [vmem:[%s9797_s1 + $0x38] sm:$0xff]  }
 0x143   : > { %7960 = vmatprep.mubr.msk.bf16.mxu0 %vm539_vm1, %v8646_v38  ;;  %v8715_v38 = vld [vmem:[#allocation5 + $0x50] ss:$0 sps:$4 sm:$0x33]  }
 0x14a   : > { %7961 = vmatmul.mubr.msk.bf16.gmra.mrb[24].mxu0 %vm539_vm1, %v8647_v39  ;;  %v2709_v39 = vsel %vm588_vm0, %v8715_v38, 0 }
 0x14b   : > { %7964 = vmatprep.mubr.msk.bf16.mxu0 %vm539_vm1, %v8648_v40  ;;  %v8724_v40 = vld [vmem:[#allocation5 + $0x54] sm:$0xff]  }
 0x152   : > { %7965 = vmatmul.mubr.msk.bf16.gmra.mrb[28].mxu0 %vm539_vm1, %v8649_v41  ;;  %v8708_v41 = vld [vmem:[%s9797_s1 + $0x40] sm:$0xff]  }
 0x153   : > { %7972 = vmatprep.mubr.msk.bf16.mxu0 %vm539_vm1, %v8650_v42  ;;  %v8709_v42 = vld [vmem:[%s9797_s1 + $0x50] sm:$0xff]  }
 0x15a   : > { %7973 = vmatmul.mubr.msk.bf16.vlgmr.msra.gmra.mrb[0].mxu0 %vm539_vm1, %v8651_v43  ;;  %v8710_v43 = vld [vmem:[%s9797_s1 + $0x58] sm:$0xff]  }
 0x15b   : > { %8005 = vmatpush3.bf16.msra.mxu0 %v8652_v28  ;;  %7976 = vmatprep.mubr.msk.bf16.mxu0 %vm539_vm1, %v8653_v44  ;;  %v8696_v28 = vld [vmem:[%s9797_s1 + $0x84] sm:$0xff]  }
 0x15c   : > { %8489 = vmatprep.subr.msk.bf16.mxu0 %vm588_vm0, %v8661_v45  ;;  %v8711_v44 = vld [vmem:[%s9797_s1 + $0x68] sm:$0xff]   ;;  %v8712_v45 = vld [vmem:[%s9797_s1 + $0x70] sm:$0xff]  }
 0x15f   : > { %8007 = vmatpush3.bf16.msra.mxu0 %v1599_v48  ;;  %v8716_v48 = vld [vmem:[%s9797_s1 + $0x98] sm:$0xff]  }
 0x160   : > { %8040 = vmatprep.subr.bf16.mxu0 %v8670_v46 }
 0x162   : > { %7977 = vmatmul.mubr.msk.bf16.gmra.mrb[4].mxu0 %vm539_vm1, %v8654_v47  ;;  %v8714_v47 = vld [vmem:[%s9797_s1 + $0x88] sm:$0xff]  }
 0x163   : > { %7980 = vmatprep.mubr.msk.bf16.mxu0 %vm539_vm1, %v8655_v49  ;;  %v8717_v49 = vld [vmem:[%s9797_s1 + $0xa0] sm:$0xff]  }
 0x16a   : > { %7981 = vmatmul.mubr.msk.bf16.gmra.mrb[8].mxu0 %vm539_vm1, %v8656_v50  ;;  %v8718_v50 = vld [vmem:[%s9797_s1 + $0xb0] sm:$0xff]  }
 0x16b   : > { %7984 = vmatprep.mubr.msk.bf16.mxu0 %vm539_vm1, %v8657_v51  ;;  %v8719_v51 = vld [vmem:[%s9797_s1 + $0xb8] sm:$0xff]  }
 0x172   : > { %7985 = vmatmul.mubr.msk.bf16.gmra.mrb[12].mxu0 %vm539_vm1, %v8658_v52  ;;  %v8720_v52 = vld [vmem:[%s9797_s1 + $0xc8] sm:$0xff]  }
 0x173   : > { %7988 = vmatprep.mubr.msk.bf16.mxu0 %vm539_vm1, %v8659_v53  ;;  %v8721_v53 = vld [vmem:[%s9797_s1 + $0xd0] sm:$0xff]  }
 0x17a   : > { %7989 = vmatmul.mubr.msk.bf16.gmra.mrb[16].mxu0 %vm539_vm1, %v8660_v54  ;;  %v8722_v54 = vld [vmem:[%s9797_s1 + $0x30] sm:$0xff]  }
 0x17b   : > { %7992 = vmatprep.mubr.msk.bf16.mxu0 %vm539_vm1, %v8662_v55  ;;  %v8723_v55 = vld [vmem:[%s9797_s1 + $0x38] sm:$0xff]  }
 0x182   : > { %7993 = vmatmul.mubr.msk.bf16.gmra.mrb[20].mxu0 %vm539_vm1, %v8663_v56  ;;  %v8725_v56 = vld [vmem:[%s9797_s1 + $0x48] sm:$0xff]  }
 0x183   : > { %7996 = vmatprep.mubr.msk.bf16.mxu0 %vm539_vm1, %v8664_v57  ;;  %v8733_v57 = vld [vmem:[#allocation5 + $0x5c] ss:$0 sps:$4 sm:$0x33]  }
 0x18a   : > { %7997 = vmatmul.mubr.msk.bf16.gmra.mrb[24].mxu0 %vm539_vm1, %v8665_v58  ;;  %v3079_v58 = vsel %vm588_vm0, %v8733_v57, 0 }
 0x18b   : > { %8000 = vmatprep.mubr.msk.bf16.mxu0 %vm539_vm1, %v8666_v59  ;;  %v8742_v59 = vld [vmem:[#allocation5 + $0x60] sm:$0xff]  }
 0x192   : > { %8001 = vmatmul.mubr.msk.bf16.gmra.mrb[28].mxu0 %vm539_vm1, %v8667_v60  ;;  %v8726_v60 = vld [vmem:[%s9797_s1 + $0x50] sm:$0xff]  }
 0x193   : > { %8008 = vmatprep.mubr.msk.bf16.mxu0 %vm539_vm1, %v8668_v61  ;;  %v8727_v61 = vld [vmem:[%s9797_s1 + $0x60] sm:$0xff]  }
 0x19a   : > { %8009 = vmatmul.mubr.msk.bf16.vlgmr.msra.gmra.mrb[0].mxu0 %vm539_vm1, %v8669_v62  ;;  %v8728_v62 = vld [vmem:[%s9797_s1 + $0x68] sm:$0xff]  }
 0x19b   : > { %8041 = vmatpush3.bf16.msra.mxu0 %v8670_v46  ;;  %8012 = vmatprep.mubr.msk.bf16.mxu0 %vm539_vm1, %v8671_v63  ;;  %v8713_v46 = vld [vmem:[%s9797_s1 + $0x80] sm:$0xff]   ;;  %v8729_v63 = vld [vmem:[%s9797_s1 + $0x78] sm:$0xff]  }
 0x19c   : > { %8490 = vmatprep.subr.msk.bf16.mxu0 %vm588_vm0, %v8679_v0  ;;  %v8730_v0 = vld [vmem:[%s9797_s1 + $0x80] sm:$0xff]  }
 0x19f   : > { %8043 = vmatpush3.bf16.msra.mxu0 %v1969_v3  ;;  %v8734_v3 = vld [vmem:[%s9797_s1 + $0xa8] sm:$0xff]  }
 0x1a0   : > { %8076 = vmatprep.subr.bf16.mxu0 %v8688_v1 }
 0x1a2   : > { %8013 = vmatmul.mubr.msk.bf16.gmra.mrb[4].mxu0 %vm539_vm1, %v8672_v2  ;;  %v8732_v2 = vld [vmem:[%s9797_s1 + $0x98] sm:$0xff]  }
 0x1a3   : > { %8016 = vmatprep.mubr.msk.bf16.mxu0 %vm539_vm1, %v8673_v4  ;;  %v8735_v4 = vld [vmem:[%s9797_s1 + $0xb0] sm:$0xff]  }
 0x1aa   : > { %8017 = vmatmul.mubr.msk.bf16.gmra.mrb[8].mxu0 %vm539_vm1, %v8674_v5  ;;  %v8736_v5 = vld [vmem:[%s9797_s1 + $0xc0] sm:$0xff]  }
 0x1ab   : > { %8020 = vmatprep.mubr.msk.bf16.mxu0 %vm539_vm1, %v8675_v6  ;;  %v8737_v6 = vld [vmem:[%s9797_s1 + $0xc8] sm:$0xff]  }
 0x1b2   : > { %8021 = vmatmul.mubr.msk.bf16.gmra.mrb[12].mxu0 %vm539_vm1, %v8676_v7  ;;  %v8738_v7 = vld [vmem:[%s9797_s1 + $0xd8] sm:$0xff]  }
 0x1b3   : > { %8024 = vmatprep.mubr.msk.bf16.mxu0 %vm539_vm1, %v8677_v8  ;;  %v8739_v8 = vld [vmem:[%s9797_s1 + $0xe0] sm:$0xff]  }
 0x1ba   : > { %8025 = vmatmul.mubr.msk.bf16.gmra.mrb[16].mxu0 %vm539_vm1, %v8678_v9  ;;  %v8740_v9 = vld [vmem:[%s9797_s1 + $0x34] sm:$0xff]  }
 0x1bb   : > { %8028 = vmatprep.mubr.msk.bf16.mxu0 %vm539_vm1, %v8680_v10  ;;  %v8741_v10 = vld [vmem:[%s9797_s1 + $0x3c] sm:$0xff]  }
 0x1c2   : > { %8029 = vmatmul.mubr.msk.bf16.gmra.mrb[20].mxu0 %vm539_vm1, %v8681_v11  ;;  %v8743_v11 = vld [vmem:[%s9797_s1 + $0x4c] sm:$0xff]  }
 0x1c3   : > { %8032 = vmatprep.mubr.msk.bf16.mxu0 %vm539_vm1, %v8682_v12  ;;  %v8751_v12 = vld [vmem:[#allocation5 + $0x68] ss:$0 sps:$4 sm:$0x33]  }
 0x1ca   : > { %8033 = vmatmul.mubr.msk.bf16.gmra.mrb[24].mxu0 %vm539_vm1, %v8683_v13  ;;  %v3449_v13 = vsel %vm588_vm0, %v8751_v12, 0 }
 0x1cb   : > { %8036 = vmatprep.mubr.msk.bf16.mxu0 %vm539_vm1, %v8684_v14  ;;  %v8744_v14 = vld [vmem:[%s9797_s1 + $0x54] sm:$0xff]  }
 0x1d2   : > { %8037 = vmatmul.mubr.msk.bf16.gmra.mrb[28].mxu0 %vm539_vm1, %v8685_v15  ;;  %v8745_v15 = vld [vmem:[%s9797_s1 + $0x64] sm:$0xff]  }
 0x1d3   : > { %8044 = vmatprep.mubr.msk.bf16.mxu0 %vm539_vm1, %v8686_v16  ;;  %v8746_v16 = vld [vmem:[%s9797_s1 + $0x6c] sm:$0xff]  }
 0x1da   : > { %8045 = vmatmul.mubr.msk.bf16.vlgmr.msra.gmra.mrb[0].mxu0 %vm539_vm1, %v8687_v17  ;;  %v8747_v17 = vld [vmem:[%s9797_s1 + $0x7c] sm:$0xff]  }
 0x1db   : > { %8077 = vmatpush3.bf16.msra.mxu0 %v8688_v1  ;;  %8048 = vmatprep.mubr.msk.bf16.mxu0 %vm539_vm1, %v8689_v18  ;;  %v8731_v1 = vld [vmem:[%s9797_s1 + $0x90] sm:$0xff]   ;;  %v8748_v18 = vld [vmem:[%s9797_s1 + $0x84] sm:$0xff]  }
 0x1dc   : > { %8491 = vmatprep.subr.msk.bf16.mxu0 %vm588_vm0, %v8697_v19  ;;  %v8749_v19 = vld [vmem:[%s9797_s1 + $0x94] sm:$0xff]  }
 0x1df   : > { %8079 = vmatpush3.bf16.msra.mxu0 %v2339_v20  ;;  %v8750_v20 = vld [vmem:[%s9797_s1 + $0x9c] sm:$0xff]  }
 0x1e0   : > { %8112 = vmatprep.subr.bf16.mxu0 %v8706_v21 }
 0x1e2   : > { %8049 = vmatmul.mubr.msk.bf16.gmra.mrb[4].mxu0 %vm539_vm1, %v8690_v22  ;;  %v8753_v22 = vld [vmem:[%s9797_s1 + $0xb4] sm:$0xff]  }
 0x1e3   : > { %8052 = vmatprep.mubr.msk.bf16.mxu0 %vm539_vm1, %v8691_v23  ;;  %v8754_v23 = vld [vmem:[%s9797_s1 + $0xc4] sm:$0xff]  }
 0x1ea   : > { %8053 = vmatmul.mubr.msk.bf16.gmra.mrb[8].mxu0 %vm539_vm1, %v8692_v24  ;;  %v8755_v24 = vld [vmem:[%s9797_s1 + $0xcc] sm:$0xff]  }
 0x1eb   : > { %8056 = vmatprep.mubr.msk.bf16.mxu0 %vm539_vm1, %v8693_v25  ;;  %v8756_v25 = vld [vmem:[%s9797_s1 + $0xdc] sm:$0xff]  }
 0x1f2   : > { %8057 = vmatmul.mubr.msk.bf16.gmra.mrb[12].mxu0 %vm539_vm1, %v8694_v26  ;;  %v8757_v26 = vld [vmem:[%s9797_s1 + $0xe4] sm:$0xff]  }
 0x1f3   : > { %8060 = vmatprep.mubr.msk.bf16.mxu0 %vm539_vm1, %v8695_v27  ;;  %v8758_v27 = vld [vmem:[%s9797_s1 + $0x38] sm:$0xff]  }
 0x1fa   : > { %8061 = vmatmul.mubr.msk.bf16.gmra.mrb[16].mxu0 %vm539_vm1, %v8696_v28  ;;  %v8759_v28 = vld [vmem:[%s9797_s1 + $0x40] sm:$0xff]  }
 0x1fb   : > { %8064 = vmatprep.mubr.msk.bf16.mxu0 %vm539_vm1, %v8698_v29  ;;  %v8760_v29 = vld [vmem:[%s9797_s1 + $0x50] sm:$0xff]  }
 0x202   : > { %8065 = vmatmul.mubr.msk.bf16.gmra.mrb[20].mxu0 %vm539_vm1, %v8699_v30  ;;  %v8761_v30 = vld [vmem:[%s9797_s1 + $0x58] sm:$0xff]  }
 0x203   : > { %8068 = vmatprep.mubr.msk.bf16.mxu0 %vm539_vm1, %v8700_v31  ;;  %v8762_v31 = vld [vmem:[%s9797_s1 + $0x68] sm:$0xff]  }
 0x20a   : > { %8069 = vmatmul.mubr.msk.bf16.gmra.mrb[24].mxu0 %vm539_vm1, %v8701_v32  ;;  %v8763_v32 = vld [vmem:[%s9797_s1 + $0x70] sm:$0xff]  }
 0x20b   : > { %8072 = vmatprep.mubr.msk.bf16.mxu0 %vm539_vm1, %v8702_v33  ;;  %v8764_v33 = vld [vmem:[%s9797_s1 + $0x80] sm:$0xff]  }
 0x212   : > { %8073 = vmatmul.mubr.msk.bf16.gmra.mrb[28].mxu0 %vm539_vm1, %v8703_v34  ;;  %v8765_v34 = vld [vmem:[%s9797_s1 + $0x88] sm:$0xff]  }
 0x213   : > { %8080 = vmatprep.mubr.msk.bf16.mxu0 %vm539_vm1, %v8704_v35  ;;  %v8766_v35 = vld [vmem:[%s9797_s1 + $0x98] sm:$0xff]  }
 0x21a   : > { %8081 = vmatmul.mubr.msk.bf16.vlgmr.msra.gmra.mrb[0].mxu0 %vm539_vm1, %v8705_v36  ;;  %v8767_v36 = vld [vmem:[%s9797_s1 + $0xa0] sm:$0xff]  }
 0x21b   : > { %8113 = vmatpush3.bf16.msra.mxu0 %v8706_v21  ;;  %8084 = vmatprep.mubr.msk.bf16.mxu0 %vm539_vm1, %v8707_v37  ;;  %v8752_v21 = vld [vmem:[%s9797_s1 + $0xac] sm:$0xff]  }
 0x21c   : > { %8492 = vmatprep.subr.msk.bf16.mxu0 %vm588_vm0, %v8715_v38  ;;  %v8768_v37 = vld [vmem:[%s9797_s1 + $0xb0] sm:$0xff]   ;;  %v8769_v38 = vld [vmem:[%s9797_s1 + $0xb8] sm:$0xff]  }
 0x21f   : > { %8115 = vmatpush3.bf16.msra.mxu0 %v2709_v39  ;;  %v8770_v39 = vld [vmem:[%s9797_s1 + $0xc8] sm:$0xff]  }
 0x220   : > { %8148 = vmatprep.subr.bf16.mxu0 %v8724_v40 }
 0x222   : > { %8085 = vmatmul.mubr.msk.bf16.gmra.mrb[4].mxu0 %vm539_vm1, %v8708_v41  ;;  %v8772_v41 = vld [vmem:[%s9797_s1 + $0xe0] sm:$0xff]  }
 0x223   : > { %8088 = vmatprep.mubr.msk.bf16.mxu0 %vm539_vm1, %v8709_v42  ;;  %v8773_v42 = vld [vmem:[%s9797_s1 + $0xe8] sm:$0xff]  }
 0x22a   : > { %8089 = vmatmul.mubr.msk.bf16.gmra.mrb[8].mxu0 %vm539_vm1, %v8710_v43  ;;  %v8774_v43 = vld [vmem:[#allocation8 + $0xc4] ss:$24 sps:$4 sm:$0xff]  }
 0x22b   : > { %8092 = vmatprep.mubr.msk.bf16.mxu0 %vm539_vm1, %v8711_v44  ;;  %v8776_v44 = vld [vmem:[#allocation8 + $0xc0] ss:$24 sps:$4 sm:$0xff]   ;;  %3905 = vmatprep.subr.bf16.mxu1 %v8774_v43 }
 0x22c   : > { %3906 = vmatpush1.bf16.msra.mxu1 %v8776_v44 }
 0x232   : > { %8093 = vmatmul.mubr.msk.bf16.gmra.mrb[12].mxu0 %vm539_vm1, %v8712_v45  ;;  %v8777_v45 = vld [vmem:[#allocation8 + $0xf4] ss:$24 sps:$4 sm:$0xff]  }
 0x233   : > { %8096 = vmatprep.mubr.msk.bf16.mxu0 %vm539_vm1, %v8713_v46  ;;  %v8779_v46 = vld [vmem:[#allocation8 + $0xf0] ss:$24 sps:$4 sm:$0xff]   ;;  %3907 = vmatprep.subr.bf16.mxu1 %v8777_v45  ;;  %v10151_v45 = vld [vmem:[#allocation7] ss:$0 sm:$0xff] }
 0x234   : > { %3908 = vmatpush1.bf16.msra.mxu1 %v8779_v46 }
 0x23a   : > { %8097 = vmatmul.mubr.msk.bf16.gmra.mrb[16].mxu0 %vm539_vm1, %v8714_v47  ;;  %v8780_v47 = vld [vmem:[#allocation8 + $0x124] ss:$24 sps:$4 sm:$0xff]  }
 0x23b   : > { %8100 = vmatprep.mubr.msk.bf16.mxu0 %vm539_vm1, %v8716_v48  ;;  %3909 = vmatprep.subr.bf16.mxu1 %v8780_v47 }
 0x242   : > { %8101 = vmatmul.mubr.msk.bf16.gmra.mrb[20].mxu0 %vm539_vm1, %v8717_v49  ;;  %v8782_v49 = vld [vmem:[#allocation8 + $0x120] ss:$24 sps:$4 sm:$0xff]  }
 0x243   : > { %8104 = vmatprep.mubr.msk.bf16.mxu0 %vm539_vm1, %v8718_v50  ;;  %3910 = vmatpush1.bf16.msra.mxu1 %v8782_v49 }
 0x24a   : > { %8105 = vmatmul.mubr.msk.bf16.gmra.mrb[24].mxu0 %vm539_vm1, %v8719_v51 }
 0x24b   : > { %8108 = vmatprep.mubr.msk.bf16.mxu0 %vm539_vm1, %v8720_v52 }
 0x252   : > { %8109 = vmatmul.mubr.msk.bf16.gmra.mrb[28].mxu0 %vm539_vm1, %v8721_v53 }
 0x253   : > { %8116 = vmatprep.mubr.msk.bf16.mxu0 %vm539_vm1, %v8722_v54  ;;  %v8783_v54 = vld [vmem:[#allocation8 + $0x154] ss:$24 sps:$4 sm:$0xff]  }
 0x254   : > { %3911 = vmatprep.subr.bf16.mxu1 %v8783_v54  ;;  %v8794_v54 = vld [vmem:[#allocation8 + $0x12c] ss:$24 sps:$4 sm:$0xff]  }
 0x25a   : > { %8117 = vmatmul.mubr.msk.bf16.vlgmr.msra.gmra.mrb[0].mxu0 %vm539_vm1, %v8723_v55 }
 0x25b   : > { %8149 = vmatpush3.bf16.msra.mxu0 %v8724_v40  ;;  %8120 = vmatprep.mubr.msk.bf16.mxu0 %vm539_vm1, %v8725_v56  ;;  %v8771_v40 = vld [vmem:[%s9797_s1 + $0xd0] sm:$0xff]  }
 0x25c   : > { %8493 = vmatprep.subr.msk.bf16.mxu0 %vm588_vm0, %v8733_v57  ;;  %v8785_v56 = vld [vmem:[#allocation8 + $0x150] ss:$24 sps:$4 sm:$0xff]   ;;  %v8788_v57 = vld [vmem:[#allocation8 + $0xcc] ss:$24 sps:$4 sm:$0xff]  }
 0x25d   : > { %3912 = vmatpush1.bf16.msra.mxu1 %v8785_v56  ;;  %v8797_v56 = vld [vmem:[#allocation8 + $0x15c] ss:$24 sps:$4 sm:$0xff]  }
 0x25e   : > { %3946 = vmatprep.subr.bf16.mxu1 %v8788_v57  ;;  %v8795_v57 = vld [vmem:[#allocation8 + $0x158] ss:$24 sps:$4 sm:$0xff]  }
 0x25f   : > { %8151 = vmatpush3.bf16.msra.mxu0 %v3079_v58 }
 0x260   : > { %8184 = vmatprep.subr.bf16.mxu0 %v8742_v59 }
 0x262   : > { %8121 = vmatmul.mubr.msk.bf16.gmra.mrb[4].mxu0 %vm539_vm1, %v8726_v60  ;;  %v9497_v60 = vmov 0  }
 0x263   : > { %8124 = vmatprep.mubr.msk.bf16.mxu0 %vm539_vm1, %v8727_v61  ;;  %3937 = vmatprep.mubr.bf16.mxu1 %v9497_v60 }
 0x26a   : > { %8125 = vmatmul.mubr.msk.bf16.gmra.mrb[8].mxu0 %vm539_vm1, %v8728_v62 }
 0x26b   : > { %8128 = vmatprep.mubr.msk.bf16.mxu0 %vm539_vm1, %v8729_v63 }
 0x272   : > { %8129 = vmatmul.mubr.msk.bf16.gmra.mrb[12].mxu0 %vm539_vm1, %v8730_v0 }
 0x273   : > { %8132 = vmatprep.mubr.msk.bf16.mxu0 %vm539_vm1, %v8731_v1 }
 0x27a   : > { %8133 = vmatmul.mubr.msk.bf16.gmra.mrb[16].mxu0 %vm539_vm1, %v8732_v2 }
 0x27b   : > { %8136 = vmatprep.mubr.msk.bf16.mxu0 %vm539_vm1, %v8734_v3 }
 0x282   : > { %8137 = vmatmul.mubr.msk.bf16.gmra.mrb[20].mxu0 %vm539_vm1, %v8735_v4 }
 0x283   : > { %8140 = vmatprep.mubr.msk.bf16.mxu0 %vm539_vm1, %v8736_v5 }
 0x28a   : > { %8141 = vmatmul.mubr.msk.bf16.gmra.mrb[24].mxu0 %vm539_vm1, %v8737_v6 }
 0x28b   : > { %8144 = vmatprep.mubr.msk.bf16.mxu0 %vm539_vm1, %v8738_v7 }
 0x292   : > { %8145 = vmatmul.mubr.msk.bf16.gmra.mrb[28].mxu0 %vm539_vm1, %v8739_v8 }
 0x293   : > { %8152 = vmatprep.mubr.msk.bf16.mxu0 %vm539_vm1, %v8740_v9 }
 0x29a   : > { %8153 = vmatmul.mubr.msk.bf16.vlgmr.msra.gmra.mrb[0].mxu0 %vm539_vm1, %v8741_v10 }
 0x29b   : > { %8185 = vmatpush3.bf16.msra.mxu0 %v8742_v59  ;;  %8156 = vmatprep.mubr.msk.bf16.mxu0 %vm539_vm1, %v8743_v11 }
 0x29c   : > { %8494 = vmatprep.subr.msk.bf16.mxu0 %vm588_vm0, %v8751_v12 }
 0x29f   : > { %8187 = vmatpush3.bf16.msra.mxu0 %v3449_v13 }
 0x2a2   : > { %8157 = vmatmul.mubr.msk.bf16.gmra.mrb[4].mxu0 %vm539_vm1, %v8744_v14 }
 0x2a3   : > { %8160 = vmatprep.mubr.msk.bf16.mxu0 %vm539_vm1, %v8745_v15 }
 0x2aa   : > { %8161 = vmatmul.mubr.msk.bf16.gmra.mrb[8].mxu0 %vm539_vm1, %v8746_v16 }
 0x2ab   : > { %8164 = vmatprep.mubr.msk.bf16.mxu0 %vm539_vm1, %v8747_v17 }
 0x2b2   : > { %8165 = vmatmul.mubr.msk.bf16.gmra.mrb[12].mxu0 %vm539_vm1, %v8748_v18 }
 0x2b3   : > { %8168 = vmatprep.mubr.msk.bf16.mxu0 %vm539_vm1, %v8749_v19 }
 0x2ba   : > { %8169 = vmatmul.mubr.msk.bf16.gmra.mrb[16].mxu0 %vm539_vm1, %v8750_v20 }
 0x2bb   : > { %8172 = vmatprep.mubr.msk.bf16.mxu0 %vm539_vm1, %v8752_v21 }
 0x2c2   : > { %8173 = vmatmul.mubr.msk.bf16.gmra.mrb[20].mxu0 %vm539_vm1, %v8753_v22 }
 0x2c3   : > { %8176 = vmatprep.mubr.msk.bf16.mxu0 %vm539_vm1, %v8754_v23 }
 0x2ca   : > { %8177 = vmatmul.mubr.msk.bf16.gmra.mrb[24].mxu0 %vm539_vm1, %v8755_v24 }
 0x2cb   : > { %8180 = vmatprep.mubr.msk.bf16.mxu0 %vm539_vm1, %v8756_v25 }
 0x2d2   : > { %8181 = vmatmul.mubr.msk.bf16.gmra.mrb[28].mxu0 %vm539_vm1, %v8757_v26 }
 0x2d3   : > { %8188 = vmatprep.mubr.msk.bf16.mxu0 %vm539_vm1, %v8758_v27 }
 0x2da   : > { %8189 = vmatmul.mubr.msk.bf16.vlgmr.msra.gmra.mrb[0].mxu0 %vm539_vm1, %v8759_v28 }
 0x2db   : > { %8192 = vmatprep.mubr.msk.bf16.mxu0 %vm539_vm1, %v8760_v29 }
 0x2e2   : > { %8193 = vmatmul.mubr.msk.bf16.gmra.mrb[4].mxu0 %vm539_vm1, %v8761_v30 }
 0x2e3   : > { %8196 = vmatprep.mubr.msk.bf16.mxu0 %vm539_vm1, %v8762_v31 }
 0x2ea   : > { %8197 = vmatmul.mubr.msk.bf16.gmra.mrb[8].mxu0 %vm539_vm1, %v8763_v32 }
 0x2eb   : > { %8200 = vmatprep.mubr.msk.bf16.mxu0 %vm539_vm1, %v8764_v33 }
 0x2f2   : > { %8201 = vmatmul.mubr.msk.bf16.gmra.mrb[12].mxu0 %vm539_vm1, %v8765_v34 }
 0x2f3   : > { %8204 = vmatprep.mubr.msk.bf16.mxu0 %vm539_vm1, %v8766_v35 }
 0x2fa   : > { %8205 = vmatmul.mubr.msk.bf16.gmra.mrb[16].mxu0 %vm539_vm1, %v8767_v36 }
 0x2fb   : > { %8208 = vmatprep.mubr.msk.bf16.mxu0 %vm539_vm1, %v8768_v37 }
 0x302   : > { %8209 = vmatmul.mubr.msk.bf16.gmra.mrb[20].mxu0 %vm539_vm1, %v8769_v38 }
 0x303   : > { %8212 = vmatprep.mubr.msk.bf16.mxu0 %vm539_vm1, %v8770_v39 }
 0x30a   : > { %8213 = vmatmul.mubr.msk.bf16.gmra.mrb[24].mxu0 %vm539_vm1, %v8771_v40 }
 0x30b   : > { %8216 = vmatprep.mubr.msk.bf16.mxu0 %vm539_vm1, %v8772_v41 }
 0x312   : > { %8217 = vmatmul.mubr.msk.bf16.gmra.mrb[28].mxu0 %vm539_vm1, %v8773_v42 }
 0x3ad   : > { %v8190_v48 = vpop.f32.mrb[0].mxu0 }
 0x3ae   : > { %v3485_v50 = vpop.f32.mrb[1].mxu0 }
 0x3af   : > { %v8191_v51 = vpop.f32.mrb[2].mxu0 }
 0x3b0   : > { %v3645_v52 = vmax.f32 %v8190_v48, %v8191_v51  ;;  %v3488_v53 = vpop.f32.mrb[3].mxu0 }
 0x3b1   : > { %v3644_v55 = vmax.f32 %v3485_v50, %v3488_v53  ;;  %v8786_v50 = vld [vmem:[#allocation8 + $0xc8] ss:$24 sps:$4 sm:$0xff]   ;;  %v8789_v53 = vld [vmem:[#allocation8 + $0xf8] ss:$24 sps:$4 sm:$0xff]  }
 0x3b5   : > { %v8194_v58 = vpop.f32.mrb[4].mxu0 }
 0x3b6   : > { %v3501_v59 = vpop.f32.mrb[5].mxu0 }
 0x3b7   : > { %v8195_v61 = vpop.f32.mrb[6].mxu0 }
 0x3b8   : > { %v3647_v62 = vmax.f32 %v8194_v58, %v8195_v61  ;;  %v3504_v63 = vpop.f32.mrb[7].mxu0  ;;  %v8800_v58 = vld [vmem:[#allocation8 + $0xd4] ss:$24 sps:$4 sm:$0xff]   ;;  %v8803_v61 = vld [vmem:[#allocation8 + $0x104] ss:$24 sps:$4 sm:$0xff]  }
 0x3b9   : > { %v3646_v0 = vmax.f32 %v3501_v59, %v3504_v63  ;;  %v8798_v59 = vld [vmem:[#allocation8 + $0xd0] ss:$24 sps:$4 sm:$0xff]   ;;  %v8806_v63 = vld [vmem:[#allocation8 + $0x134] ss:$24 sps:$4 sm:$0xff]  }
 0x3ba   : > { %v3661_v1 = vmax.f32 %v3645_v52, %v3647_v62  ;;  %v8791_v52 = vld [vmem:[#allocation8 + $0xfc] ss:$24 sps:$4 sm:$0xff]   ;;  %v8801_v62 = vld [vmem:[#allocation8 + $0x100] ss:$24 sps:$4 sm:$0xff]  }
 0x3bb   : > { %v10122_v2 = vmax.f32 %v3644_v55, %v3646_v0  ;;  %v8792_v55 = vld [vmem:[#allocation8 + $0x128] ss:$24 sps:$4 sm:$0xff]  }
 0x3bc   : > { %3678 = vrot.lane.b32.xlu0 %v3661_v1, %s9498_s8  ;;  %v8804_v0 = vld [vmem:[#allocation8 + $0x130] ss:$24 sps:$4 sm:$0xff]  }
 0x3bd   : > { %v8198_v3 = vpop.f32.mrb[8].mxu0 }
 0x3be   : > { %v3517_v4 = vpop.f32.mrb[9].mxu0 }
 0x3bf   : > { %v8199_v5 = vpop.f32.mrb[10].mxu0 }
 0x3c0   : > { %v3649_v6 = vmax.f32 %v8198_v3, %v8199_v5  ;;  %3676 = vrot.lane.b32.xlu0 %v10122_v2, %s9498_s8  ;;  %v3520_v7 = vpop.f32.mrb[11].mxu0  ;;  %v8807_v3 = vld [vmem:[#allocation8 + $0x160] ss:$24 sps:$4 sm:$0xff]  }
 0x3c1   : > { %v3648_v8 = vmax.f32 %v3517_v4, %v3520_v7  ;;  %v8812_v4 = vld [vmem:[#allocation8 + $0x4] ss:$24 sps:$4 sm:$0xff]   ;;  %v8810_v5 = vld [vmem:[#allocation8] ss:$24 sps:$4 sm:$0xff]  }
 0x3c5   : > { %v8202_v9 = vpop.f32.mrb[12].mxu0 }
 0x3c6   : > { %v3533_v10 = vpop.f32.mrb[13].mxu0 }
 0x3c7   : > { %v8203_v11 = vpop.f32.mrb[14].mxu0 }
 0x3c8   : > { %v3651_v12 = vmax.f32 %v8202_v9, %v8203_v11  ;;  %v3536_v13 = vpop.f32.mrb[15].mxu0  ;;  %v8816_v11 = vld [vmem:[#allocation8 + $0x60] ss:$24 sps:$4 sm:$0xff]  }
 0x3c9   : > { %v3650_v14 = vmax.f32 %v3533_v10, %v3536_v13  ;;  %v8818_v10 = vld [vmem:[#allocation8 + $0x64] ss:$24 sps:$4 sm:$0xff]   ;;  %v8821_v13 = vld [vmem:[#allocation8 + $0x94] ss:$24 sps:$4 sm:$0xff]  }
 0x3ca   : > { %v10127_v15 = vmax.f32 %v3649_v6, %v3651_v12  ;;  %v8815_v6 = vld [vmem:[#allocation8 + $0x34] ss:$24 sps:$4 sm:$0xff]  }
 0x3cb   : > { %v10129_v16 = vmax.f32 %v3648_v8, %v3650_v14  ;;  %v8813_v8 = vld [vmem:[#allocation8 + $0x30] ss:$24 sps:$4 sm:$0xff]  }
 0x3cc   : > { %v8819_v14 = vld [vmem:[#allocation8 + $0x90] ss:$24 sps:$4 sm:$0xff]  }
 0x3cd   : > { %3680 = vrot.lane.b32.xlu1 %v10129_v16, %s9498_s8  ;;  %v8206_v17 = vpop.f32.mrb[16].mxu0 }
 0x3ce   : > { %v3549_v18 = vpop.f32.mrb[17].mxu0 }
 0x3cf   : > { %v8207_v19 = vpop.f32.mrb[18].mxu0 }
 0x3d0   : > { %v3653_v20 = vmax.f32 %v8206_v17, %v8207_v19  ;;  %v3552_v21 = vpop.f32.mrb[19].mxu0  ;;  %v8822_v19 = vld [vmem:[#allocation8 + $0x8] ss:$24 sps:$4 sm:$0xff]  }
 0x3d1   : > { %v3652_v22 = vmax.f32 %v3549_v18, %v3552_v21  ;;  %3682 = vrot.lane.b32.xlu1 %v10127_v15, %s9498_s8  ;;  %v8824_v18 = vld [vmem:[#allocation8 + $0xc] ss:$24 sps:$4 sm:$0xff]   ;;  %v8827_v21 = vld [vmem:[#allocation8 + $0x3c] ss:$24 sps:$4 sm:$0xff]  }
 0x3d5   : > { %v8210_v23 = vpop.f32.mrb[20].mxu0 }
 0x3d6   : > { %v3565_v24 = vpop.f32.mrb[21].mxu0 }
 0x3d7   : > { %v8211_v25 = vpop.f32.mrb[22].mxu0 }
 0x3d8   : > { %v3655_v26 = vmax.f32 %v8210_v23, %v8211_v25  ;;  %v3568_v27 = vpop.f32.mrb[23].mxu0  ;;  %v8828_v23 = vld [vmem:[#allocation8 + $0x68] ss:$24 sps:$4 sm:$0xff]   ;;  %v8831_v25 = vld [vmem:[#allocation8 + $0x98] ss:$24 sps:$4 sm:$0xff]  }
 0x3d9   : > { %v3654_v28 = vmax.f32 %v3565_v24, %v3568_v27  ;;  %v8833_v24 = vld [vmem:[#allocation8 + $0x9c] ss:$24 sps:$4 sm:$0xff]   ;;  %v8834_v27 = vld [vmem:[#allocation8 + $0x10] ss:$24 sps:$4 sm:$0xff]  }
 0x3da   : > { %v10135_v29 = vmax.f32 %v3653_v20, %v3655_v26  ;;  %v8836_v26 = vld [vmem:[#allocation8 + $0x14] ss:$24 sps:$4 sm:$0xff]  }
 0x3db   : > { %v10137_v30 = vmax.f32 %v3652_v22, %v3654_v28  ;;  %v8830_v22 = vld [vmem:[#allocation8 + $0x6c] ss:$24 sps:$4 sm:$0xff]  }
 0x3dc   : > { %3686 = vrot.lane.b32.xlu1 %v10135_v29, %s9498_s8  ;;  %v8839_v28 = vld [vmem:[#allocation8 + $0x44] ss:$24 sps:$4 sm:$0xff]  }
 0x3dd   : > { %3684 = vrot.lane.b32.xlu0 %v10137_v30, %s9498_s8  ;;  %v8214_v31 = vpop.f32.mrb[24].mxu0 }
 0x3de   : > { %v3581_v32 = vpop.f32.mrb[25].mxu0 }
 0x3df   : > { %v8215_v33 = vpop.f32.mrb[26].mxu0 }
 0x3e0   : > { %v3657_v34 = vmax.f32 %v8214_v31, %v8215_v33  ;;  %v3584_v35 = vpop.f32.mrb[27].mxu0  ;;  %v8837_v31 = vld [vmem:[#allocation8 + $0x40] ss:$24 sps:$4 sm:$0xff]   ;;  %v8840_v33 = vld [vmem:[#allocation8 + $0x70] ss:$24 sps:$4 sm:$0xff]  }
 0x3e1   : > { %v3656_v36 = vmax.f32 %v3581_v32, %v3584_v35  ;;  %v8842_v32 = vld [vmem:[#allocation8 + $0x74] ss:$24 sps:$4 sm:$0xff]   ;;  %v8843_v35 = vld [vmem:[#allocation8 + $0xa0] ss:$24 sps:$4 sm:$0xff]  }
 0x3e5   : > { %v8218_v37 = vpop.f32.mrb[28].mxu0 }
 0x3e6   : > { %v3597_v38 = vpop.f32.mrb[29].mxu0 }
 0x3e7   : > { %v8219_v39 = vpop.f32.mrb[30].mxu0 }
 0x3e8   : > { %v3659_v40 = vmax.f32 %v8218_v37, %v8219_v39  ;;  %v3600_v41 = vpop.f32.mrb[31].mxu0  ;;  %v8846_v37 = vld [vmem:[#allocation8 + $0x180] ss:$24 sps:$4 sm:$0xff]  }
 0x3e9   : > { %v3658_v42 = vmax.f32 %v3597_v38, %v3600_v41  ;;  %v8851_v38 = vld [vmem:[#allocation8 + $0x1b4] ss:$24 sps:$4 sm:$0xff]  }
 0x3ea   : > { %v10143_v43 = vmax.f32 %v3657_v34, %v3659_v40  ;;  %v8845_v34 = vld [vmem:[#allocation8 + $0xa4] ss:$24 sps:$4 sm:$0xff]   ;;  %v8849_v40 = vld [vmem:[#allocation8 + $0x1b0] ss:$24 sps:$4 sm:$0xff]  }
 0x3eb   : > { %v10145_v44 = vmax.f32 %v3656_v36, %v3658_v42  ;;  %v8848_v36 = vld [vmem:[#allocation8 + $0x184] ss:$24 sps:$4 sm:$0xff]  }
 0x3ec   : > { %3690 = vrot.lane.b32.xlu1 %v10143_v43, %s9498_s8  ;;  %v8854_v42 = vld [vmem:[#allocation8 + $0x1e4] ss:$24 sps:$4 sm:$0xff]  }
 0x3ed   : > { %3688 = vrot.lane.b32.xlu0 %v10145_v44, %s9498_s8 }
 0x42e   : > { %v3679_v46 = vpop.permute.xlu0 %3678 }
 0x42f   : > { %v3701_v47 = vmax.f32 %v3661_v1, %v3679_v46  ;;  %v8809_v1 = vld [vmem:[#allocation8 + $0x164] ss:$24 sps:$4 sm:$0xff]   ;;  %v8852_v46 = vld [vmem:[#allocation8 + $0x1e0] ss:$24 sps:$4 sm:$0xff]  }
 0x431   : > { %v3716_v48 = vadd.f32 %v10151_v45, %v3701_v47 }
 0x432   : > { %v3677_v7 = vpop.permute.xlu0 %3676 }
 0x433   : > { %v3724_v49 = vmax.f32 %v3716_v48, 0.0  ;;  %v3700_v9 = vmax.f32 %v10122_v2, %v3677_v7  ;;  %v8825_v2 = vld [vmem:[#allocation8 + $0x38] ss:$24 sps:$4 sm:$0xff]   ;;  %v8857_v48 = vld [vmem:[#allocation8 + $0x214] ss:$24 sps:$4 sm:$0xff]  }
 0x434   : > { %v8887_v7 = vld [vmem:[#allocation8 + $0x274] ss:$24 sps:$4 sm:$0xff]  }
 0x435   : > { %v3756_v51 = vpack.c.bf16 %v3724_v49, %v3724_v49  ;;  %v3715_v12 = vadd.f32 %v10151_v45, %v3700_v9  ;;  %v8855_v49 = vld [vmem:[#allocation8 + $0x210] ss:$24 sps:$4 sm:$0xff]  }
 0x436   : > { %v8885_v9 = vld [vmem:[#allocation8 + $0x270] ss:$24 sps:$4 sm:$0xff]  }
 0x437   : > { %7440 = vmatmul.mubr.msk.bf16.vlgmr.msra.gmra.mrb[0].mxu1 %vm3901_vm2, %v3756_v51  ;;  %v3723_v17 = vmax.f32 %v3715_v12, 0.0  ;;  %v8888_v12 = vld [vmem:[#allocation8 + $0x2a0] ss:$24 sps:$4 sm:$0xff]  }
 0x438   : > { %3947 = vmatpush1.bf16.msra.mxu1 %v8786_v50  ;;  %3978 = vmatprep.mubr.bf16.mxu1 %v9497_v60 }
 0x439   : > { %3948 = vmatprep.subr.bf16.mxu1 %v8791_v52  ;;  %v3731_v20 = vpack.c.bf16 %v3723_v17, %v3723_v17  ;;  %v8858_v52 = vld [vmem:[#allocation8 + $0x188] ss:$24 sps:$4 sm:$0xff]  }
 0x43a   : > { %v8891_v17 = vld [vmem:[#allocation8 + $0x2d0] ss:$24 sps:$4 sm:$0xff]  }
 0x43c   : > { %3949 = vmatpush1.bf16.msra.mxu1 %v8789_v53 }
 0x43d   : > { %3950 = vmatprep.subr.bf16.mxu1 %v8794_v54  ;;  %v8863_v54 = vld [vmem:[#allocation8 + $0x1bc] ss:$24 sps:$4 sm:$0xff]  }
 0x43f   : > { %v3681_v39 = vpop.permute.xlu1 %3680 }
 0x440   : > { %3951 = vmatpush1.bf16.msra.mxu1 %v8792_v55  ;;  %v3702_v41 = vmax.f32 %v10129_v16, %v3681_v39  ;;  %v8861_v16 = vld [vmem:[#allocation8 + $0x1b8] ss:$24 sps:$4 sm:$0xff]   ;;  %v8866_v55 = vld [vmem:[#allocation8 + $0x1ec] ss:$24 sps:$4 sm:$0xff]  }
 0x441   : > { %3952 = vmatprep.subr.bf16.mxu1 %v8797_v56  ;;  %v8864_v56 = vld [vmem:[#allocation8 + $0x1e8] ss:$24 sps:$4 sm:$0xff]  }
 0x442   : > { %v3717_v47 = vadd.f32 %v10151_v45, %v3702_v41 }
 0x444   : > { %3953 = vmatpush1.bf16.msra.mxu1 %v8795_v57  ;;  %v3725_v50 = vmax.f32 %v3717_v47, 0.0  ;;  %v8869_v57 = vld [vmem:[#allocation8 + $0x21c] ss:$24 sps:$4 sm:$0xff]  }
 0x445   : > { %3987 = vmatprep.subr.bf16.mxu1 %v8800_v58  ;;  %v8867_v58 = vld [vmem:[#allocation8 + $0x218] ss:$24 sps:$4 sm:$0xff]  }
 0x446   : > { %v4274_v53 = vpack.c.bf16 %v3725_v50, %v3725_v50 }
 0x447   : > { %7441 = vmatmul.mubr.msk.bf16.vlgmr.msra.gmra.mrb[4].mxu1 %vm3901_vm2, %v3756_v51 }
 0x448   : > { %3988 = vmatpush1.bf16.msra.mxu1 %v8798_v59  ;;  %4019 = vmatprep.mubr.bf16.mxu1 %v9497_v60  ;;  %v8872_v59 = vld [vmem:[#allocation8 + $0x194] ss:$24 sps:$4 sm:$0xff]  }
 0x449   : > { %3989 = vmatprep.subr.bf16.mxu1 %v8803_v61  ;;  %v8870_v61 = vld [vmem:[#allocation8 + $0x190] ss:$24 sps:$4 sm:$0xff]  }
 0x44c   : > { %3990 = vmatpush1.bf16.msra.mxu1 %v8801_v62  ;;  %v8875_v62 = vld [vmem:[#allocation8 + $0x1c4] ss:$24 sps:$4 sm:$0xff]  }
 0x44d   : > { %3991 = vmatprep.subr.bf16.mxu1 %v8806_v63  ;;  %v8873_v63 = vld [vmem:[#allocation8 + $0x1c0] ss:$24 sps:$4 sm:$0xff]  }
 0x44f   : > { %v3685_v39 = vpop.permute.xlu0 %3684 }
 0x450   : > { %3992 = vmatpush1.bf16.msra.mxu1 %v8804_v0  ;;  %v8878_v0 = vld [vmem:[#allocation8 + $0x1f4] ss:$24 sps:$4 sm:$0xff]   ;;  %v3704_v41 = vmax.f32 %v10137_v30, %v3685_v39  ;;  %v8933_v30 = vld [vmem:[#allocation8 + $0x338] ss:$24 sps:$4 sm:$0xff]  }
 0x451   : > { %3993 = vmatprep.subr.bf16.mxu1 %v8809_v1  ;;  %v8876_v1 = vld [vmem:[#allocation8 + $0x1f0] ss:$24 sps:$4 sm:$0xff]  }
 0x452   : > { %v3719_v47 = vadd.f32 %v10151_v45, %v3704_v41  ;;  %v8978_v39 = vld [vmem:[#allocation8 + $0x3d0] ss:$24 sps:$4 sm:$0xff]   ;;  %v8981_v41 = vld [vmem:[#allocation8 + $0x400] ss:$24 sps:$4 sm:$0xff]  }
 0x454   : > { %3994 = vmatpush1.bf16.msra.mxu1 %v8807_v3  ;;  %v8881_v3 = vld [vmem:[#allocation8 + $0x224] ss:$24 sps:$4 sm:$0xff]   ;;  %v3727_v50 = vmax.f32 %v3719_v47, 0.0 }
 0x455   : > { %4151 = vmatprep.subr.bf16.mxu1 %v8812_v4  ;;  %v8879_v4 = vld [vmem:[#allocation8 + $0x220] ss:$24 sps:$4 sm:$0xff]  }
 0x457   : > { %7442 = vmatmul.mubr.msk.bf16.vlgmr.msra.gmra.mrb[8].mxu1 %vm3901_vm2, %v3756_v51  ;;  %v8860_v51 = vld [vmem:[#allocation8 + $0x18c] ss:$24 sps:$4 sm:$0xff]  }
 0x458   : > { %4152 = vmatpush1.bf16.msra.mxu1 %v8810_v5  ;;  %4183 = vmatprep.mubr.bf16.mxu1 %v9497_v60  ;;  %v8884_v5 = vld [vmem:[#allocation8 + $0x244] ss:$24 sps:$4 sm:$0xff]  }
 0x459   : > { %4153 = vmatprep.subr.bf16.mxu1 %v8815_v6  ;;  %v8882_v6 = vld [vmem:[#allocation8 + $0x240] ss:$24 sps:$4 sm:$0xff]  }
 0x45c   : > { %4154 = vmatpush1.bf16.msra.mxu1 %v8813_v8  ;;  %v3683_v8 = vpop.permute.xlu1 %3682 }
 0x45d   : > { %4155 = vmatprep.subr.bf16.mxu1 %v8818_v10  ;;  %v3703_v10 = vmax.f32 %v10127_v15, %v3683_v8  ;;  %v8897_v15 = vld [vmem:[#allocation8 + $0x278] ss:$24 sps:$4 sm:$0xff]   ;;  %v8956_v8 = vld [vmem:[#allocation8 + $0x3c4] ss:$24 sps:$4 sm:$0xff]  }
 0x460   : > { %4156 = vmatpush1.bf16.msra.mxu1 %v8816_v11  ;;  %v8890_v11 = vld [vmem:[#allocation8 + $0x2a4] ss:$24 sps:$4 sm:$0xff]  }
 0x461   : > { %4157 = vmatprep.subr.bf16.mxu1 %v8821_v13  ;;  %v3718_v13 = vadd.f32 %v10151_v45, %v3703_v10  ;;  %v8959_v10 = vld [vmem:[#allocation8 + $0x3f4] ss:$24 sps:$4 sm:$0xff]  }
 0x464   : > { %4158 = vmatpush1.bf16.msra.mxu1 %v8819_v14  ;;  %v8893_v14 = vld [vmem:[#allocation8 + $0x2d4] ss:$24 sps:$4 sm:$0xff]  }
 0x465   : > { %4192 = vmatprep.subr.bf16.mxu1 %v8824_v18  ;;  %v3726_v18 = vmax.f32 %v3718_v13, 0.0 }
 0x467   : > { %7467 = vmatmul.mubr.msk.bf16.vlgmr.msra.gmra.mrb[12].mxu1 %vm3901_vm2, %v3731_v20 }
 0x468   : > { %4193 = vmatpush1.bf16.msra.mxu1 %v8822_v19  ;;  %4224 = vmatprep.mubr.bf16.mxu1 %v9497_v60  ;;  %v8896_v19 = vld [vmem:[#allocation8 + $0x24c] ss:$24 sps:$4 sm:$0xff]  }
 0x469   : > { %4194 = vmatprep.subr.bf16.mxu1 %v8827_v21  ;;  %v4551_v21 = vpack.c.bf16 %v3726_v18, %v3726_v18 }
 0x46c   : > { %4195 = vmatpush1.bf16.msra.mxu1 %v8825_v2  ;;  %v8899_v2 = vld [vmem:[#allocation8 + $0x27c] ss:$24 sps:$4 sm:$0xff]  }
 0x46d   : > { %4196 = vmatprep.subr.bf16.mxu1 %v8830_v22  ;;  %v8902_v22 = vld [vmem:[#allocation8 + $0x2ac] ss:$24 sps:$4 sm:$0xff]  }
 0x470   : > { %4197 = vmatpush1.bf16.msra.mxu1 %v8828_v23  ;;  %v8900_v23 = vld [vmem:[#allocation8 + $0x2a8] ss:$24 sps:$4 sm:$0xff]  }
 0x471   : > { %4198 = vmatprep.subr.bf16.mxu1 %v8833_v24  ;;  %v8905_v24 = vld [vmem:[#allocation8 + $0x2dc] ss:$24 sps:$4 sm:$0xff]  }
 0x474   : > { %4199 = vmatpush1.bf16.msra.mxu1 %v8831_v25  ;;  %v8903_v25 = vld [vmem:[#allocation8 + $0x2d8] ss:$24 sps:$4 sm:$0xff]  }
 0x475   : > { %4233 = vmatprep.subr.bf16.mxu1 %v8836_v26  ;;  %v8908_v26 = vld [vmem:[#allocation8 + $0x254] ss:$24 sps:$4 sm:$0xff]  }
 0x477   : > { %7468 = vmatmul.mubr.msk.bf16.vlgmr.msra.gmra.mrb[16].mxu1 %vm3901_vm2, %v3731_v20 }
 0x478   : > { %4234 = vmatpush1.bf16.msra.mxu1 %v8834_v27  ;;  %4265 = vmatprep.mubr.bf16.mxu1 %v9497_v60  ;;  %v8906_v27 = vld [vmem:[#allocation8 + $0x250] ss:$24 sps:$4 sm:$0xff]  }
 0x479   : > { %4235 = vmatprep.subr.bf16.mxu1 %v8839_v28  ;;  %v8911_v28 = vld [vmem:[#allocation8 + $0x284] ss:$24 sps:$4 sm:$0xff]  }
 0x47c   : > { %4236 = vmatpush1.bf16.msra.mxu1 %v8837_v31  ;;  %v8909_v31 = vld [vmem:[#allocation8 + $0x280] ss:$24 sps:$4 sm:$0xff]  }
 0x47d   : > { %4237 = vmatprep.subr.bf16.mxu1 %v8842_v32  ;;  %v8914_v32 = vld [vmem:[#allocation8 + $0x2b4] ss:$24 sps:$4 sm:$0xff]  }
 0x480   : > { %4238 = vmatpush1.bf16.msra.mxu1 %v8840_v33  ;;  %v8912_v33 = vld [vmem:[#allocation8 + $0x2b0] ss:$24 sps:$4 sm:$0xff]  }
 0x481   : > { %4239 = vmatprep.subr.bf16.mxu1 %v8845_v34  ;;  %v8917_v34 = vld [vmem:[#allocation8 + $0x2e4] ss:$24 sps:$4 sm:$0xff]  }
 0x484   : > { %4240 = vmatpush1.bf16.msra.mxu1 %v8843_v35  ;;  %v8915_v35 = vld [vmem:[#allocation8 + $0x2e0] ss:$24 sps:$4 sm:$0xff]  }
 0x485   : > { %4422 = vmatprep.subr.bf16.mxu1 %v8848_v36  ;;  %v8920_v36 = vld [vmem:[#allocation8 + $0x304] ss:$24 sps:$4 sm:$0xff]  }
 0x487   : > { %7469 = vmatmul.mubr.msk.bf16.vlgmr.msra.gmra.mrb[20].mxu1 %vm3901_vm2, %v3731_v20  ;;  %v8894_v20 = vld [vmem:[#allocation8 + $0x248] ss:$24 sps:$4 sm:$0xff]  }
 0x488   : > { %4423 = vmatpush1.bf16.msra.mxu1 %v8846_v37  ;;  %4454 = vmatprep.mubr.bf16.mxu1 %v9497_v60  ;;  %v8918_v37 = vld [vmem:[#allocation8 + $0x300] ss:$24 sps:$4 sm:$0xff]  }
 0x489   : > { %4424 = vmatprep.subr.bf16.mxu1 %v8851_v38  ;;  %v8923_v38 = vld [vmem:[#allocation8 + $0x334] ss:$24 sps:$4 sm:$0xff]  }
 0x48c   : > { %4425 = vmatpush1.bf16.msra.mxu1 %v8849_v40  ;;  %v8921_v40 = vld [vmem:[#allocation8 + $0x330] ss:$24 sps:$4 sm:$0xff]  }
 0x48d   : > { %4426 = vmatprep.subr.bf16.mxu1 %v8854_v42  ;;  %v8926_v42 = vld [vmem:[#allocation8 + $0x364] ss:$24 sps:$4 sm:$0xff]  }
 0x490   : > { %4427 = vmatpush1.bf16.msra.mxu1 %v8852_v46  ;;  %v8924_v46 = vld [vmem:[#allocation8 + $0x360] ss:$24 sps:$4 sm:$0xff]  }
 0x491   : > { %4428 = vmatprep.subr.bf16.mxu1 %v8857_v48  ;;  %v8929_v48 = vld [vmem:[#allocation8 + $0x394] ss:$24 sps:$4 sm:$0xff]  }
 0x494   : > { %4429 = vmatpush1.bf16.msra.mxu1 %v8855_v49  ;;  %v8927_v49 = vld [vmem:[#allocation8 + $0x390] ss:$24 sps:$4 sm:$0xff]  }
 0x495   : > { %4463 = vmatprep.subr.bf16.mxu1 %v8860_v51  ;;  %v8932_v51 = vld [vmem:[#allocation8 + $0x30c] ss:$24 sps:$4 sm:$0xff]  }
 0x497   : > { %7494 = vmatmul.mubr.msk.bf16.vlgmr.msra.gmra.mrb[24].mxu1 %vm3901_vm2, %v4274_v53 }
 0x498   : > { %4464 = vmatpush1.bf16.msra.mxu1 %v8858_v52  ;;  %4495 = vmatprep.mubr.bf16.mxu1 %v9497_v60  ;;  %v8930_v52 = vld [vmem:[#allocation8 + $0x308] ss:$24 sps:$4 sm:$0xff]  }
 0x499   : > { %4465 = vmatprep.subr.bf16.mxu1 %v8863_v54  ;;  %v8935_v54 = vld [vmem:[#allocation8 + $0x33c] ss:$24 sps:$4 sm:$0xff]  }
 0x49c   : > { %4466 = vmatpush1.bf16.msra.mxu1 %v8861_v16  ;;  %v8938_v16 = vld [vmem:[#allocation8 + $0x36c] ss:$24 sps:$4 sm:$0xff]  }
 0x49d   : > { %4467 = vmatprep.subr.bf16.mxu1 %v8866_v55  ;;  %v8936_v55 = vld [vmem:[#allocation8 + $0x368] ss:$24 sps:$4 sm:$0xff]  }
 0x4a0   : > { %4468 = vmatpush1.bf16.msra.mxu1 %v8864_v56  ;;  %v8941_v56 = vld [vmem:[#allocation8 + $0x39c] ss:$24 sps:$4 sm:$0xff]  }
 0x4a1   : > { %4469 = vmatprep.subr.bf16.mxu1 %v8869_v57  ;;  %v8939_v57 = vld [vmem:[#allocation8 + $0x398] ss:$24 sps:$4 sm:$0xff]  }
 0x4a4   : > { %4470 = vmatpush1.bf16.msra.mxu1 %v8867_v58  ;;  %v8944_v58 = vld [vmem:[#allocation8 + $0x314] ss:$24 sps:$4 sm:$0xff]  }
 0x4a5   : > { %4504 = vmatprep.subr.bf16.mxu1 %v8872_v59  ;;  %v8942_v59 = vld [vmem:[#allocation8 + $0x310] ss:$24 sps:$4 sm:$0xff]  }
 0x4a7   : > { %7495 = vmatmul.mubr.msk.bf16.vlgmr.msra.gmra.mrb[28].mxu1 %vm3901_vm2, %v4274_v53 }
 0x4a8   : > { %4505 = vmatpush1.bf16.msra.mxu1 %v8870_v61  ;;  %4536 = vmatprep.mubr.bf16.mxu1 %v9497_v60  ;;  %v8947_v61 = vld [vmem:[#allocation8 + $0x344] ss:$24 sps:$4 sm:$0xff]  }
 0x4a9   : > { %4506 = vmatprep.subr.bf16.mxu1 %v8875_v62  ;;  %v8945_v62 = vld [vmem:[#allocation8 + $0x340] ss:$24 sps:$4 sm:$0xff]  }
 0x4ac   : > { %4507 = vmatpush1.bf16.msra.mxu1 %v8873_v63  ;;  %v8950_v63 = vld [vmem:[#allocation8 + $0x374] ss:$24 sps:$4 sm:$0xff]  }
 0x4ad   : > { %4508 = vmatprep.subr.bf16.mxu1 %v8878_v0 }
 0x4b0   : > { %4509 = vmatpush1.bf16.msra.mxu1 %v8876_v1 }
 0x4b1   : > { %4510 = vmatprep.subr.bf16.mxu1 %v8881_v3 }
 0x4b4   : > { %4511 = vmatpush1.bf16.msra.mxu1 %v8879_v4  ;;  %v8948_v4 = vld [vmem:[#allocation8 + $0x370] ss:$24 sps:$4 sm:$0xff]  }
 0x4b5   : > { %4699 = vmatprep.subr.bf16.mxu1 %v8884_v5 }
 0x4b7   : > { %7496 = vmatmul.mubr.msk.bf16.vlgmr.msra.gmra.mrb[32].mxu1 %vm3901_vm2, %v4274_v53  ;;  %v4828_v53 = vpack.c.bf16 %v3727_v50, %v3727_v50 }
 0x4b8   : > { %4700 = vmatpush1.bf16.msra.mxu1 %v8882_v6  ;;  %4731 = vmatprep.mubr.bf16.mxu1 %v9497_v60  ;;  %v8953_v6 = vld [vmem:[#allocation8 + $0x3a4] ss:$24 sps:$4 sm:$0xff]  }
 0x4b9   : > { %4701 = vmatprep.subr.bf16.mxu1 %v8887_v7  ;;  %v8951_v7 = vld [vmem:[#allocation8 + $0x3a0] ss:$24 sps:$4 sm:$0xff]  }
 0x4bc   : > { %4702 = vmatpush1.bf16.msra.mxu1 %v8885_v9  ;;  %v8954_v9 = vld [vmem:[#allocation8 + $0x3c0] ss:$24 sps:$4 sm:$0xff]  }
 0x4bd   : > { %4703 = vmatprep.subr.bf16.mxu1 %v8890_v11  ;;  %v3687_v11 = vpop.permute.xlu1 %3686 }
 0x4be   : > { %v3705_v13 = vmax.f32 %v10135_v29, %v3687_v11  ;;  %v8966_v29 = vld [vmem:[#allocation8 + $0x3c8] ss:$24 sps:$4 sm:$0xff]   ;;  %v9007_v11 = vld [vmem:[#allocation8 + $0x4bc] ss:$24 sps:$4 sm:$0xff]  }
 0x4c0   : > { %4704 = vmatpush1.bf16.msra.mxu1 %v8888_v12  ;;  %v8957_v12 = vld [vmem:[#allocation8 + $0x3f0] ss:$24 sps:$4 sm:$0xff]  }
 0x4c1   : > { %4705 = vmatprep.subr.bf16.mxu1 %v8893_v14  ;;  %v8962_v14 = vld [vmem:[#allocation8 + $0x424] ss:$24 sps:$4 sm:$0xff]  }
 0x4c4   : > { %4706 = vmatpush1.bf16.msra.mxu1 %v8891_v17 }
 0x4c5   : > { %4740 = vmatprep.subr.bf16.mxu1 %v8896_v19 }
 0x4c7   : > { %7521 = vmatmul.mubr.msk.bf16.vlgmr.msra.gmra.mrb[36].mxu1 %vm3901_vm2, %v4551_v21 }
 0x4c8   : > { %4741 = vmatpush1.bf16.msra.mxu1 %v8894_v20  ;;  %4772 = vmatprep.mubr.bf16.mxu1 %v9497_v60  ;;  %v8960_v20 = vld [vmem:[#allocation8 + $0x420] ss:$24 sps:$4 sm:$0xff]  }
 0x4c9   : > { %4742 = vmatprep.subr.bf16.mxu1 %v8899_v2 }
 0x4cc   : > { %4743 = vmatpush1.bf16.msra.mxu1 %v8897_v15  ;;  %v8965_v15 = vld [vmem:[#allocation8 + $0x454] ss:$24 sps:$4 sm:$0xff]  }
 0x4cd   : > { %4744 = vmatprep.subr.bf16.mxu1 %v8902_v22  ;;  %v8963_v22 = vld [vmem:[#allocation8 + $0x450] ss:$24 sps:$4 sm:$0xff]  }
 0x4d0   : > { %4745 = vmatpush1.bf16.msra.mxu1 %v8900_v23 }
 0x4d1   : > { %4746 = vmatprep.subr.bf16.mxu1 %v8905_v24  ;;  %v8968_v24 = vld [vmem:[#allocation8 + $0x3cc] ss:$24 sps:$4 sm:$0xff]  }
 0x4d4   : > { %4747 = vmatpush1.bf16.msra.mxu1 %v8903_v25 }
 0x4d5   : > { %4781 = vmatprep.subr.bf16.mxu1 %v8908_v26  ;;  %v8971_v26 = vld [vmem:[#allocation8 + $0x3fc] ss:$24 sps:$4 sm:$0xff]  }
 0x4d7   : > { %7522 = vmatmul.mubr.msk.bf16.vlgmr.msra.gmra.mrb[40].mxu1 %vm3901_vm2, %v4551_v21 }
 0x4d8   : > { %4782 = vmatpush1.bf16.msra.mxu1 %v8906_v27  ;;  %4813 = vmatprep.mubr.bf16.mxu1 %v9497_v60  ;;  %v8969_v27 = vld [vmem:[#allocation8 + $0x3f8] ss:$24 sps:$4 sm:$0xff]  }
 0x4d9   : > { %4783 = vmatprep.subr.bf16.mxu1 %v8911_v28  ;;  %v8974_v28 = vld [vmem:[#allocation8 + $0x42c] ss:$24 sps:$4 sm:$0xff]  }
 0x4dc   : > { %4784 = vmatpush1.bf16.msra.mxu1 %v8909_v31 }
 0x4dd   : > { %4785 = vmatprep.subr.bf16.mxu1 %v8914_v32 }
 0x4e0   : > { %4786 = vmatpush1.bf16.msra.mxu1 %v8912_v33 }
 0x4e1   : > { %4787 = vmatprep.subr.bf16.mxu1 %v8917_v34  ;;  %v8972_v34 = vld [vmem:[#allocation8 + $0x428] ss:$24 sps:$4 sm:$0xff]  }
 0x4e4   : > { %4788 = vmatpush1.bf16.msra.mxu1 %v8915_v35 }
 0x4e5   : > { %4976 = vmatprep.subr.bf16.mxu1 %v8920_v36  ;;  %v8977_v36 = vld [vmem:[#allocation8 + $0x45c] ss:$24 sps:$4 sm:$0xff]  }
 0x4e7   : > { %7523 = vmatmul.mubr.msk.bf16.vlgmr.msra.gmra.mrb[44].mxu1 %vm3901_vm2, %v4551_v21  ;;  %v3720_v21 = vadd.f32 %v10151_v45, %v3705_v13  ;;  %v9010_v13 = vld [vmem:[#allocation8 + $0x4ec] ss:$24 sps:$4 sm:$0xff]  }
 0x4e8   : > { %4977 = vmatpush1.bf16.msra.mxu1 %v8918_v37  ;;  %5008 = vmatprep.mubr.bf16.mxu1 %v9497_v60  ;;  %v8975_v37 = vld [vmem:[#allocation8 + $0x458] ss:$24 sps:$4 sm:$0xff]  }
 0x4e9   : > { %4978 = vmatprep.subr.bf16.mxu1 %v8923_v38  ;;  %v3728_v23 = vmax.f32 %v3720_v21, 0.0  ;;  %v8980_v38 = vld [vmem:[#allocation8 + $0x3d4] ss:$24 sps:$4 sm:$0xff]   ;;  %v9008_v21 = vld [vmem:[#allocation8 + $0x4e8] ss:$24 sps:$4 sm:$0xff]  }
 0x4eb   : > { %v5105_v25 = vpack.c.bf16 %v3728_v23, %v3728_v23  ;;  %v9016_v23 = vld [vmem:[#allocation8 + $0x494] ss:$24 sps:$4 sm:$0xff]  }
 0x4ec   : > { %4979 = vmatpush1.bf16.msra.mxu1 %v8921_v40  ;;  %v8983_v40 = vld [vmem:[#allocation8 + $0x404] ss:$24 sps:$4 sm:$0xff]  }
 0x4ed   : > { %4980 = vmatprep.subr.bf16.mxu1 %v8926_v42  ;;  %v8986_v42 = vld [vmem:[#allocation8 + $0x434] ss:$24 sps:$4 sm:$0xff]  }
 0x4f0   : > { %4981 = vmatpush1.bf16.msra.mxu1 %v8924_v46 }
 0x4f1   : > { %4982 = vmatprep.subr.bf16.mxu1 %v8929_v48 }
 0x4f4   : > { %4983 = vmatpush1.bf16.msra.mxu1 %v8927_v49 }
 0x4f5   : > { %5017 = vmatprep.subr.bf16.mxu1 %v8932_v51  ;;  %v8984_v51 = vld [vmem:[#allocation8 + $0x430] ss:$24 sps:$4 sm:$0xff]  }
 0x4f7   : > { %7548 = vmatmul.mubr.msk.bf16.vlgmr.msra.gmra.mrb[48].mxu1 %vm3901_vm2, %v4828_v53 }
 0x4f8   : > { %5018 = vmatpush1.bf16.msra.mxu1 %v8930_v52  ;;  %5049 = vmatprep.mubr.bf16.mxu1 %v9497_v60 }
 0x4f9   : > { %5019 = vmatprep.subr.bf16.mxu1 %v8935_v54  ;;  %v8987_v54 = vld [vmem:[#allocation8 + $0x460] ss:$24 sps:$4 sm:$0xff]  }
 0x4fc   : > { %5020 = vmatpush1.bf16.msra.mxu1 %v8933_v30  ;;  %v8992_v30 = vld [vmem:[#allocation8 + $0x484] ss:$24 sps:$4 sm:$0xff]  }
 0x4fd   : > { %5021 = vmatprep.subr.bf16.mxu1 %v8938_v16  ;;  %v8990_v16 = vld [vmem:[#allocation8 + $0x480] ss:$24 sps:$4 sm:$0xff]  }
 0x500   : > { %5022 = vmatpush1.bf16.msra.mxu1 %v8936_v55  ;;  %v8995_v55 = vld [vmem:[#allocation8 + $0x4b4] ss:$24 sps:$4 sm:$0xff]  }
 0x501   : > { %5023 = vmatprep.subr.bf16.mxu1 %v8941_v56  ;;  %v3689_v56 = vpop.permute.xlu0 %3688 }
 0x504   : > { %5024 = vmatpush1.bf16.msra.mxu1 %v8939_v57  ;;  %v8993_v57 = vld [vmem:[#allocation8 + $0x4b0] ss:$24 sps:$4 sm:$0xff]  }
 0x505   : > { %5058 = vmatprep.subr.bf16.mxu1 %v8944_v58  ;;  %v3706_v58 = vmax.f32 %v10145_v44, %v3689_v56  ;;  %v8999_v44 = vld [vmem:[#allocation8 + $0x510] ss:$24 sps:$4 sm:$0xff]   ;;  %v9040_v56 = vld [vmem:[#allocation8 + $0x54c] ss:$24 sps:$4 sm:$0xff]  }
 0x507   : > { %7549 = vmatmul.mubr.msk.bf16.vlgmr.msra.gmra.mrb[52].mxu1 %vm3901_vm2, %v4828_v53 }
 0x508   : > { %5059 = vmatpush1.bf16.msra.mxu1 %v8942_v59  ;;  %5090 = vmatprep.mubr.bf16.mxu1 %v9497_v60  ;;  %v8998_v59 = vld [vmem:[#allocation8 + $0x4e4] ss:$24 sps:$4 sm:$0xff]  }
 0x509   : > { %5060 = vmatprep.subr.bf16.mxu1 %v8947_v61 }
 0x50a   : > { %v10190_v0 = vpop.f32.mrb[0].mxu1 }
 0x50b   : > { %v10192_v1 = vpop.f32.mrb[1].mxu1 }
 0x50c   : > { %5061 = vmatpush1.bf16.msra.mxu1 %v8945_v62  ;;  %v3943_v3 = vpop.f32.mrb[2].mxu1 }
 0x50d   : > { %v3944_v5 = vpop.f32.mrb[3].mxu1  ;;  %5062 = vmatprep.subr.bf16.mxu1 %v8950_v63  ;;  %v8996_v3 = vld [vmem:[#allocation8 + $0x4e0] ss:$24 sps:$4 sm:$0xff]  }
 0x510   : > { %5063 = vmatpush1.bf16.msra.mxu1 %v8948_v4  ;;  %v3721_v4 = vadd.f32 %v10151_v45, %v3706_v58 }
 0x511   : > { %5064 = vmatprep.subr.bf16.mxu1 %v8953_v6  ;;  %v9001_v6 = vld [vmem:[#allocation8 + $0x514] ss:$24 sps:$4 sm:$0xff]  }
 0x514   : > { %5065 = vmatpush1.bf16.msra.mxu1 %v8951_v7  ;;  %v3729_v7 = vmax.f32 %v3721_v4, 0.0  ;;  %v9044_v4 = vld [vmem:[#allocation8 + $0x5a8] ss:$24 sps:$4 sm:$0xff]  }
 0x515   : > { %5253 = vmatprep.subr.bf16.mxu1 %v8956_v8  ;;  %v9004_v8 = vld [vmem:[#allocation8 + $0x48c] ss:$24 sps:$4 sm:$0xff]  }
 0x517   : > { %7550 = vmatmul.mubr.msk.bf16.vlgmr.msra.gmra.mrb[56].mxu1 %vm3901_vm2, %v4828_v53  ;;  %v8989_v53 = vld [vmem:[#allocation8 + $0x464] ss:$24 sps:$4 sm:$0xff]  }
 0x518   : > { %5254 = vmatpush1.bf16.msra.mxu1 %v8954_v9  ;;  %5285 = vmatprep.mubr.bf16.mxu1 %v9497_v60  ;;  %v9002_v9 = vld [vmem:[#allocation8 + $0x488] ss:$24 sps:$4 sm:$0xff]  }
 0x519   : > { %5255 = vmatprep.subr.bf16.mxu1 %v8959_v10  ;;  %v5382_v10 = vpack.c.bf16 %v3729_v7, %v3729_v7  ;;  %v9052_v7 = vld [vmem:[#allocation8 + $0x554] ss:$24 sps:$4 sm:$0xff]  }
 0x51a   : > { %v10197_v17 = vpop.f32.mrb[4].mxu1 }
 0x51b   : > { %v10199_v18 = vpop.f32.mrb[5].mxu1 }
 0x51c   : > { %v3984_v19 = vpop.f32.mrb[6].mxu1  ;;  %5256 = vmatpush1.bf16.msra.mxu1 %v8957_v12  ;;  %v9005_v12 = vld [vmem:[#allocation8 + $0x4b8] ss:$24 sps:$4 sm:$0xff]  }
 0x51d   : > { %v3985_v2 = vpop.f32.mrb[7].mxu1  ;;  %5257 = vmatprep.subr.bf16.mxu1 %v8962_v14 }
 0x520   : > { %5258 = vmatpush1.bf16.msra.mxu1 %v8960_v20 }
 0x521   : > { %5259 = vmatprep.subr.bf16.mxu1 %v8965_v15  ;;  %v9013_v15 = vld [vmem:[#allocation8 + $0x51c] ss:$24 sps:$4 sm:$0xff]  }
 0x524   : > { %5260 = vmatpush1.bf16.msra.mxu1 %v8963_v22  ;;  %v9011_v22 = vld [vmem:[#allocation8 + $0x518] ss:$24 sps:$4 sm:$0xff]  }
 0x525   : > { %5294 = vmatprep.subr.bf16.mxu1 %v8968_v24  ;;  %v9014_v24 = vld [vmem:[#allocation8 + $0x490] ss:$24 sps:$4 sm:$0xff]  }
 0x527   : > { %7575 = vmatmul.mubr.msk.bf16.vlgmr.msra.gmra.mrb[60].mxu1 %vm3901_vm2, %v5105_v25 }
 0x528   : > { %5295 = vmatpush1.bf16.msra.mxu1 %v8966_v29  ;;  %5326 = vmatprep.mubr.bf16.mxu1 %v9497_v60  ;;  %v9019_v29 = vld [vmem:[#allocation8 + $0x4c4] ss:$24 sps:$4 sm:$0xff]  }
 0x529   : > { %5296 = vmatprep.subr.bf16.mxu1 %v8971_v26  ;;  %v9022_v26 = vld [vmem:[#allocation8 + $0x4f4] ss:$24 sps:$4 sm:$0xff]  }
 0x52a   : > { %v10204_v31 = vpop.f32.mrb[8].mxu1 }
 0x52b   : > { %v10206_v32 = vpop.f32.mrb[9].mxu1 }
 0x52c   : > { %v4025_v33 = vpop.f32.mrb[10].mxu1  ;;  %5297 = vmatpush1.bf16.msra.mxu1 %v8969_v27 }
 0x52d   : > { %v4026_v35 = vpop.f32.mrb[11].mxu1  ;;  %5298 = vmatprep.subr.bf16.mxu1 %v8974_v28 }
 0x530   : > { %5299 = vmatpush1.bf16.msra.mxu1 %v8972_v34  ;;  %v9020_v34 = vld [vmem:[#allocation8 + $0x4f0] ss:$24 sps:$4 sm:$0xff]  }
 0x531   : > { %5300 = vmatprep.subr.bf16.mxu1 %v8977_v36  ;;  %v9025_v36 = vld [vmem:[#allocation8 + $0x524] ss:$24 sps:$4 sm:$0xff]  }
 0x534   : > { %5301 = vmatpush1.bf16.msra.mxu1 %v8975_v37  ;;  %v9023_v37 = vld [vmem:[#allocation8 + $0x520] ss:$24 sps:$4 sm:$0xff]  }
 0x535   : > { %5335 = vmatprep.subr.bf16.mxu1 %v8980_v38  ;;  %v9028_v38 = vld [vmem:[#allocation8 + $0x544] ss:$24 sps:$4 sm:$0xff]  }
 0x537   : > { %7576 = vmatmul.mubr.msk.bf16.vlgmr.msra.gmra.mrb[64].mxu1 %vm3901_vm2, %v5105_v25 }
 0x538   : > { %5336 = vmatpush1.bf16.msra.mxu1 %v8978_v39  ;;  %5367 = vmatprep.mubr.bf16.mxu1 %v9497_v60  ;;  %v9026_v39 = vld [vmem:[#allocation8 + $0x540] ss:$24 sps:$4 sm:$0xff]  }
 0x539   : > { %5337 = vmatprep.subr.bf16.mxu1 %v8983_v40  ;;  %v9031_v40 = vld [vmem:[#allocation8 + $0x574] ss:$24 sps:$4 sm:$0xff]  }
 0x53a   : > { %v4185_v46 = vpop.f32.mrb[12].mxu1 }
 0x53b   : > { %v10211_v47 = vadd.f32 %v4185_v46, %v10190_v0  ;;  %v4187_v48 = vpop.f32.mrb[13].mxu1 }
 0x53c   : > { %v10214_v49 = vadd.f32 %v4187_v48, %v10192_v1  ;;  %v4189_v50 = vpop.f32.mrb[14].mxu1  ;;  %5338 = vmatpush1.bf16.msra.mxu1 %v8981_v41  ;;  %v3691_v41 = vpop.permute.xlu1 %3690 }
 0x53d   : > { %v4190_v52 = vpop.f32.mrb[15].mxu1  ;;  %5339 = vmatprep.subr.bf16.mxu1 %v8986_v42  ;;  %v9029_v42 = vld [vmem:[#allocation8 + $0x570] ss:$24 sps:$4 sm:$0xff]   ;;  %v3707_v46 = vmax.f32 %v10143_v43, %v3691_v41 }
 0x53e   : > { %v9035_v43 = vld [vmem:[#allocation8 + $0x5d0] ss:$24 sps:$4 sm:$0xff]  }
 0x540   : > { %5340 = vmatpush1.bf16.msra.mxu1 %v8984_v51 }
 0x541   : > { %5341 = vmatprep.subr.bf16.mxu1 %v8989_v53  ;;  %v9032_v53 = vld [vmem:[#allocation8 + $0x5a0] ss:$24 sps:$4 sm:$0xff]  }
 0x544   : > { %5342 = vmatpush1.bf16.msra.mxu1 %v8987_v54  ;;  %v3722_v54 = vadd.f32 %v10151_v45, %v3707_v46  ;;  %v9046_v45 = vld [vmem:[#allocation8 + $0x5ac] ss:$24 sps:$4 sm:$0xff]  }
 0x545   : > { %5530 = vmatprep.subr.bf16.mxu1 %v8992_v30 }
 0x547   : > { %7577 = vmatmul.mubr.msk.bf16.vlgmr.msra.gmra.mrb[68].mxu1 %vm3901_vm2, %v5105_v25  ;;  %v9017_v25 = vld [vmem:[#allocation8 + $0x4c0] ss:$24 sps:$4 sm:$0xff]  }
 0x548   : > { %5531 = vmatpush1.bf16.msra.mxu1 %v8990_v16  ;;  %5562 = vmatprep.mubr.bf16.mxu1 %v9497_v60  ;;  %v9037_v16 = vld [vmem:[#allocation8 + $0x5d4] ss:$24 sps:$4 sm:$0xff]  }
 0x549   : > { %5532 = vmatprep.subr.bf16.mxu1 %v8995_v55  ;;  %v3730_v55 = vmax.f32 %v3722_v54, 0.0  ;;  %v9091_v54 = vld [vmem:[#allocation11 + $0x94] ss:$8 sps:$4 sm:$0xff]  }
 0x54a   : > { %v4226_v61 = vpop.f32.mrb[16].mxu1 }
 0x54b   : > { %v10220_v62 = vadd.f32 %v4226_v61, %v10197_v17  ;;  %v4228_v63 = vpop.f32.mrb[17].mxu1  ;;  %v5659_v58 = vpack.c.bf16 %v3730_v55, %v3730_v55  ;;  %v9041_v61 = vld [vmem:[#allocation8 + $0x578] ss:$24 sps:$4 sm:$0xff]  }
 0x54c   : > { %v10223_v0 = vadd.f32 %v4228_v63, %v10199_v18  ;;  %v4230_v1 = vpop.f32.mrb[18].mxu1  ;;  %5533 = vmatpush1.bf16.msra.mxu1 %v8993_v57  ;;  %v9038_v57 = vld [vmem:[#allocation8 + $0x548] ss:$24 sps:$4 sm:$0xff]  }
 0x54d   : > { %v4231_v5 = vpop.f32.mrb[19].mxu1  ;;  %5534 = vmatprep.subr.bf16.mxu1 %v8998_v59  ;;  %v9043_v59 = vld [vmem:[#allocation8 + $0x57c] ss:$24 sps:$4 sm:$0xff]  }
 0x550   : > { %5535 = vmatpush1.bf16.msra.mxu1 %v8996_v3 }
 0x551   : > { %5536 = vmatprep.subr.bf16.mxu1 %v9001_v6  ;;  %v9049_v6 = vld [vmem:[#allocation8 + $0x5dc] ss:$24 sps:$4 sm:$0xff]  }
 0x554   : > { %5537 = vmatpush1.bf16.msra.mxu1 %v8999_v44  ;;  %v9047_v44 = vld [vmem:[#allocation8 + $0x5d8] ss:$24 sps:$4 sm:$0xff]  }
 0x555   : > { %5571 = vmatprep.subr.bf16.mxu1 %v9004_v8  ;;  %v9050_v8 = vld [vmem:[#allocation8 + $0x550] ss:$24 sps:$4 sm:$0xff]  }
 0x557   : > { %7602 = vmatmul.mubr.msk.bf16.vlgmr.msra.gmra.mrb[72].mxu1 %vm3901_vm2, %v5382_v10 }
 0x558   : > { %5572 = vmatpush1.bf16.msra.mxu1 %v9002_v9  ;;  %5603 = vmatprep.mubr.bf16.mxu1 %v9497_v60  ;;  %v9055_v9 = vld [vmem:[#allocation8 + $0x584] ss:$24 sps:$4 sm:$0xff]  }
 0x559   : > { %5573 = vmatprep.subr.bf16.mxu1 %v9007_v11  ;;  %v9058_v11 = vld [vmem:[#allocation8 + $0x5b4] ss:$24 sps:$4 sm:$0xff]  }
 0x55a   : > { %v4267_v14 = vpop.f32.mrb[20].mxu1 }
 0x55b   : > { %v10229_v17 = vadd.f32 %v4267_v14, %v10204_v31  ;;  %v4269_v18 = vpop.f32.mrb[21].mxu1 }
 0x55c   : > { %v10232_v19 = vadd.f32 %v4269_v18, %v10206_v32  ;;  %v4271_v20 = vpop.f32.mrb[22].mxu1  ;;  %5574 = vmatpush1.bf16.msra.mxu1 %v9005_v12 }
 0x55d   : > { %v4272_v2 = vpop.f32.mrb[23].mxu1  ;;  %5575 = vmatprep.subr.bf16.mxu1 %v9010_v13 }
 0x55e   : > { %v9059_v2 = vld [vmem:[#allocation8 + $0x5e0] ss:$24 sps:$4 sm:$0xff]  }
 0x560   : > { %5576 = vmatpush1.bf16.msra.mxu1 %v9008_v21  ;;  %v9061_v21 = vld [vmem:[#allocation8 + $0x5e4] ss:$24 sps:$4 sm:$0xff]  }
 0x561   : > { %5577 = vmatprep.subr.bf16.mxu1 %v9013_v15  ;;  %v9062_v15 = vld [vmem:[#allocation11] ss:$8 sps:$4 sm:$0xff]  }
 0x564   : > { %5578 = vmatpush1.bf16.msra.mxu1 %v9011_v22  ;;  %v9067_v22 = vld [vmem:[#allocation11 + $0x14] ss:$8 sps:$4 sm:$0xff]  }
 0x565   : > { %5612 = vmatprep.subr.bf16.mxu1 %v9016_v23  ;;  %v9065_v23 = vld [vmem:[#allocation11 + $0x10] ss:$8 sps:$4 sm:$0xff]  }
 0x567   : > { %7603 = vmatmul.mubr.msk.bf16.vlgmr.msra.gmra.mrb[76].mxu1 %vm3901_vm2, %v5382_v10 }
 0x568   : > { %5613 = vmatpush1.bf16.msra.mxu1 %v9014_v24  ;;  %5644 = vmatprep.mubr.bf16.mxu1 %v9497_v60  ;;  %v9070_v24 = vld [vmem:[#allocation11 + $0x24] ss:$8 sps:$4 sm:$0xff]  }
 0x569   : > { %5614 = vmatprep.subr.bf16.mxu1 %v9019_v29 }
 0x56a   : > { %v4456_v27 = vpop.f32.mrb[24].mxu1 }
 0x56b   : > { %v10237_v28 = vadd.f32 %v4456_v27, %v10211_v47  ;;  %v4458_v31 = vpop.f32.mrb[25].mxu1  ;;  %v9034_v47 = vld [vmem:[#allocation8 + $0x5a4] ss:$24 sps:$4 sm:$0xff]  }
 0x56c   : > { %v10240_v32 = vadd.f32 %v4458_v31, %v10214_v49  ;;  %v4460_v33 = vpop.f32.mrb[26].mxu1  ;;  %5615 = vmatpush1.bf16.msra.mxu1 %v9017_v25  ;;  %v9068_v31 = vld [vmem:[#allocation11 + $0x20] ss:$8 sps:$4 sm:$0xff]  }
 0x56d   : > { %v4461_v35 = vpop.f32.mrb[27].mxu1  ;;  %5616 = vmatprep.subr.bf16.mxu1 %v9022_v26  ;;  %v9073_v33 = vld [vmem:[#allocation11 + $0x34] ss:$8 sps:$4 sm:$0xff]  }
 0x56e   : > { %v9076_v35 = vld [vmem:[#allocation11 + $0x44] ss:$8 sps:$4 sm:$0xff]  }
 0x570   : > { %5617 = vmatpush1.bf16.msra.mxu1 %v9020_v34  ;;  %v9071_v34 = vld [vmem:[#allocation11 + $0x30] ss:$8 sps:$4 sm:$0xff]  }
 0x571   : > { %5618 = vmatprep.subr.bf16.mxu1 %v9025_v36  ;;  %v9074_v36 = vld [vmem:[#allocation11 + $0x40] ss:$8 sps:$4 sm:$0xff]  }
 0x574   : > { %5619 = vmatpush1.bf16.msra.mxu1 %v9023_v37  ;;  %v9079_v37 = vld [vmem:[#allocation11 + $0x54] ss:$8 sps:$4 sm:$0xff]  }
 0x575   : > { %5807 = vmatprep.subr.bf16.mxu1 %v9028_v38  ;;  %v9077_v38 = vld [vmem:[#allocation11 + $0x50] ss:$8 sps:$4 sm:$0xff]  }
 0x577   : > { %7604 = vmatmul.mubr.msk.bf16.vlgmr.msra.gmra.mrb[80].mxu1 %vm3901_vm2, %v5382_v10  ;;  %v9053_v10 = vld [vmem:[#allocation8 + $0x580] ss:$24 sps:$4 sm:$0xff]  }
 0x578   : > { %5808 = vmatpush1.bf16.msra.mxu1 %v9026_v39  ;;  %5839 = vmatprep.mubr.bf16.mxu1 %v9497_v60  ;;  %v9082_v39 = vld [vmem:[#allocation11 + $0x64] ss:$8 sps:$4 sm:$0xff]  }
 0x579   : > { %5809 = vmatprep.subr.bf16.mxu1 %v9031_v40 }
 0x57a   : > { %v4497_v48 = vpop.f32.mrb[28].mxu1 }
 0x57b   : > { %v10246_v49 = vadd.f32 %v4497_v48, %v10220_v62  ;;  %v4499_v50 = vpop.f32.mrb[29].mxu1  ;;  %v9080_v48 = vld [vmem:[#allocation11 + $0x60] ss:$8 sps:$4 sm:$0xff]  }
 0x57c   : > { %v10249_v51 = vadd.f32 %v4499_v50, %v10223_v0  ;;  %v4501_v52 = vpop.f32.mrb[30].mxu1  ;;  %5810 = vmatpush1.bf16.msra.mxu1 %v9029_v42  ;;  %v9085_v50 = vld [vmem:[#allocation11 + $0x74] ss:$8 sps:$4 sm:$0xff]  }
 0x57d   : > { %v4502_v30 = vpop.f32.mrb[31].mxu1  ;;  %5811 = vmatprep.subr.bf16.mxu1 %v9034_v47  ;;  %v9088_v52 = vld [vmem:[#allocation11 + $0x84] ss:$8 sps:$4 sm:$0xff]  }
 0x57e   : > { %v9089_v30 = vld [vmem:[#allocation11 + $0x90] ss:$8 sps:$4 sm:$0xff]  }
 0x580   : > { %5812 = vmatpush1.bf16.msra.mxu1 %v9032_v53  ;;  %v9086_v53 = vld [vmem:[#allocation11 + $0x80] ss:$8 sps:$4 sm:$0xff]  }
 0x581   : > { %5813 = vmatprep.subr.bf16.mxu1 %v9037_v16  ;;  %v9094_v16 = vld [vmem:[#allocation11 + $0xa4] ss:$8 sps:$4 sm:$0xff]  }
 0x584   : > { %5814 = vmatpush1.bf16.msra.mxu1 %v9035_v43 }
 0x585   : > { %5848 = vmatprep.subr.bf16.mxu1 %v9040_v56 }
 0x587   : > { %7629 = vmatmul.mubr.msk.bf16.vlgmr.msra.gmra.mrb[84].mxu1 %vm3901_vm2, %v5659_v58 }
 0x588   : > { %5849 = vmatpush1.bf16.msra.mxu1 %v9038_v57  ;;  %5880 = vmatprep.mubr.bf16.mxu1 %v9497_v60 }
 0x589   : > { %5850 = vmatprep.subr.bf16.mxu1 %v9043_v59  ;;  %v9092_v59 = vld [vmem:[#allocation11 + $0xa0] ss:$8 sps:$4 sm:$0xff]  }
 0x58a   : > { %v4538_v62 = vpop.f32.mrb[32].mxu1 }
 0x58b   : > { %v10255_v63 = vadd.f32 %v4538_v62, %v10229_v17  ;;  %v4540_v0 = vpop.f32.mrb[33].mxu1  ;;  %v9095_v62 = vld [vmem:[#allocation11 + $0xb0] ss:$8 sps:$4 sm:$0xff]  }
 0x58c   : > { %v10258_v1 = vadd.f32 %v4540_v0, %v10232_v19  ;;  %v4542_v3 = vpop.f32.mrb[34].mxu1  ;;  %5851 = vmatpush1.bf16.msra.mxu1 %v9041_v61  ;;  %v9056_v19 = vld [vmem:[#allocation8 + $0x5b0] ss:$24 sps:$4 sm:$0xff]  }
 0x58d   : > { %v4543_v5 = vpop.f32.mrb[35].mxu1  ;;  %5852 = vmatprep.subr.bf16.mxu1 %v9046_v45  ;;  %v9097_v45 = vld [vmem:[#allocation11 + $0xb4] ss:$8 sps:$4 sm:$0xff]   ;;  %v9098_v0 = vld [vmem:[#allocation11 + $0xc0] ss:$8 sps:$4 sm:$0xff]  }
 0x58e   : > { %v9101_v3 = vld [vmem:[#allocation11 + $0xd0] ss:$8 sps:$4 sm:$0xff]  }
 0x590   : > { %5853 = vmatpush1.bf16.msra.mxu1 %v9044_v4  ;;  %v9106_v4 = vld [vmem:[#allocation11 + $0xe4] ss:$8 sps:$4 sm:$0xff]  }
 0x591   : > { %5854 = vmatprep.subr.bf16.mxu1 %v9049_v6 }
 0x594   : > { %5855 = vmatpush1.bf16.msra.mxu1 %v9047_v44 }
 0x595   : > { %5889 = vmatprep.subr.bf16.mxu1 %v9052_v7 }
 0x597   : > { %7630 = vmatmul.mubr.msk.bf16.vlgmr.msra.gmra.mrb[88].mxu1 %vm3901_vm2, %v5659_v58 }
 0x598   : > { %5890 = vmatpush1.bf16.msra.mxu1 %v9050_v8  ;;  %5921 = vmatprep.mubr.bf16.mxu1 %v9497_v60  ;;  %v9064_v60 = vld [vmem:[#allocation11 + $0x4] ss:$8 sps:$4 sm:$0xff]  }
 0x599   : > { %5891 = vmatprep.subr.bf16.mxu1 %v9055_v9  ;;  %v9104_v9 = vld [vmem:[#allocation11 + $0xe0] ss:$8 sps:$4 sm:$0xff]  }
 0x59a   : > { %v4733_v12 = vpop.f32.mrb[36].mxu1 }
 0x59b   : > { %v10263_v13 = vadd.f32 %v4733_v12, %v10237_v28  ;;  %v4735_v14 = vpop.f32.mrb[37].mxu1  ;;  %v9107_v12 = vld [vmem:[#allocation11 + $0xf0] ss:$8 sps:$4 sm:$0xff]  }
 0x59c   : > { %v10266_v17 = vadd.f32 %v4735_v14, %v10240_v32  ;;  %v4737_v18 = vpop.f32.mrb[38].mxu1  ;;  %5892 = vmatpush1.bf16.msra.mxu1 %v9053_v10  ;;  %v5938_v14 = vlaneseq }
 0x59d   : > { %v4738_v20 = vpop.f32.mrb[39].mxu1  ;;  %5893 = vmatprep.subr.bf16.mxu1 %v9058_v11  ;;  %v9109_v11 = vld [vmem:[#allocation11 + $0xf4] ss:$8 sps:$4 sm:$0xff]  }
 0x5a0   : > { %5894 = vmatpush1.bf16.msra.mxu1 %v9056_v19 }
 0x5a1   : > { %5895 = vmatprep.subr.bf16.mxu1 %v9061_v21 }
 0x5a4   : > { %5896 = vmatpush1.bf16.msra.mxu1 %v9059_v2  ;;  %v10289_v2 = vld [vmem:[#allocation10] sm:$0x3f] }
 0x5a5   : > { %6568 = vmatprep.subr.bf16.mxu1 %v9064_v60 }
 0x5a7   : > { %7631 = vmatmul.mubr.msk.bf16.vlgmr.msra.gmra.mrb[92].mxu1 %vm3901_vm2, %v5659_v58 }
 0x5a8   : > { %6569 = vmatpush1.bf16.msra.mxu1 %v9062_v15 }
 0x5a9   : > { %6570 = vmatprep.subr.bf16.mxu1 %v9067_v22 }
 0x5aa   : > { %v4774_v29 = vpop.f32.mrb[40].mxu1 }
 0x5ab   : > { %v10270_v25 = vadd.f32 %v4774_v29, %v10246_v49  ;;  %v4776_v26 = vpop.f32.mrb[41].mxu1 }
 0x5ac   : > { %v10273_v27 = vadd.f32 %v4776_v26, %v10249_v51  ;;  %v4778_v28 = vpop.f32.mrb[42].mxu1  ;;  %6571 = vmatpush1.bf16.msra.mxu1 %v9065_v23  ;;  %v9083_v51 = vld [vmem:[#allocation11 + $0x70] ss:$8 sps:$4 sm:$0xff]  }
 0x5ad   : > { %v4779_v32 = vpop.f32.mrb[43].mxu1  ;;  %6572 = vmatprep.subr.bf16.mxu1 %v9070_v24 }
 0x5b0   : > { %6573 = vmatpush1.bf16.msra.mxu1 %v9068_v31 }
 0x5b1   : > { %6574 = vmatprep.subr.bf16.mxu1 %v9073_v33 }
 0x5b4   : > { %6575 = vmatpush1.bf16.msra.mxu1 %v9071_v34 }
 0x5b5   : > { %6576 = vmatprep.subr.bf16.mxu1 %v9076_v35 }
 0x5b8   : > { %6577 = vmatpush1.bf16.msra.mxu1 %v9074_v36 }
 0x5b9   : > { %6578 = vmatprep.subr.bf16.mxu1 %v9079_v37 }
 0x5ba   : > { %v4815_v40 = vpop.f32.mrb[44].mxu1 }
 0x5bb   : > { %v10276_v41 = vadd.f32 %v4815_v40, %v10255_v63  ;;  %v4817_v42 = vpop.f32.mrb[45].mxu1  ;;  %v9100_v63 = vld [vmem:[#allocation11 + $0xc4] ss:$8 sps:$4 sm:$0xff]  }
 0x5bc   : > { %v10279_v46 = vadd.f32 %v4817_v42, %v10258_v1  ;;  %v4819_v47 = vpop.f32.mrb[46].mxu1  ;;  %6579 = vmatpush1.bf16.msra.mxu1 %v9077_v38  ;;  %v9103_v1 = vld [vmem:[#allocation11 + $0xd4] ss:$8 sps:$4 sm:$0xff]  }
 0x5bd   : > { %v4820_v49 = vpop.f32.mrb[47].mxu1  ;;  %6580 = vmatprep.subr.bf16.mxu1 %v9082_v39 }
 0x5c0   : > { %6581 = vmatpush1.bf16.msra.mxu1 %v9080_v48 }
 0x5c1   : > { %6582 = vmatprep.subr.bf16.mxu1 %v9085_v50 }
 0x5c4   : > { %6583 = vmatpush1.bf16.msra.mxu1 %v9083_v51 }
 0x5c5   : > { %6584 = vmatprep.subr.bf16.mxu1 %v9088_v52 }
 0x5c8   : > { %6585 = vmatpush1.bf16.msra.mxu1 %v9086_v53 }
 0x5c9   : > { %6586 = vmatprep.subr.bf16.mxu1 %v9091_v54 }
 0x5ca   : > { %v5010_v43 = vpop.f32.mrb[48].mxu1 }
 0x5cb   : > { %v5099_v55 = vadd.f32 %v5010_v43, %v10263_v13  ;;  %v5012_v56 = vpop.f32.mrb[49].mxu1  ;;  %v9112_v13 = vld [vmem:[#allocation11 + $0x104] ss:$8 sps:$4 sm:$0xff]  }
 0x5cc   : > { %v5100_v57 = vadd.f32 %v5012_v56, %v10266_v17  ;;  %v5014_v58 = vpop.f32.mrb[50].mxu1  ;;  %6587 = vmatpush1.bf16.msra.mxu1 %v9089_v30  ;;  %v10285_v17 = vshrl.u32 %v5938_v14, 7  ;;  %v9110_v14 = vld [vmem:[#allocation11 + $0x100] ss:$8 sps:$4 sm:$0xff]  }
 0x5cd   : > { %v5015_v61 = vpop.f32.mrb[51].mxu1  ;;  %6588 = vmatprep.subr.bf16.mxu1 %v9094_v16 }
 0x5ce   : > { %v5948_v19 = vsub.s32 2, %v10285_v17  ;;  %v5956_v29 = vsub.s32 4, %v10285_v17 }
 0x5d0   : > { %6589 = vmatpush1.bf16.msra.mxu1 %v9092_v59  ;;  %v10293_v22 = vrot.slane %v10289_v2, %v5948_v19  ;;  %v10298_v32 = vrot.slane %v10289_v2, %v5956_v29  ;;  %v9115_v19 = vld [vmem:[#allocation11 + $0x114] ss:$8 sps:$4 sm:$0xff]  }
 0x5d1   : > { %6590 = vmatprep.subr.bf16.mxu1 %v9097_v45 }
 0x5d4   : > { %6591 = vmatpush1.bf16.msra.mxu1 %v9095_v62 }
 0x5d5   : > { %6592 = vmatprep.subr.bf16.mxu1 %v9100_v63 }
 0x5d8   : > { %6593 = vmatpush1.bf16.msra.mxu1 %v9098_v0 }
 0x5d9   : > { %6594 = vmatprep.subr.bf16.mxu1 %v9103_v1  ;;  %v5940_v1 = vsub.s32 0, %v10285_v17 }
 0x5da   : > { %v5051_v5 = vpop.f32.mrb[52].mxu1 }
 0x5db   : > { %v5101_v6 = vadd.f32 %v5051_v5, %v10270_v25  ;;  %v5053_v44 = vpop.f32.mrb[53].mxu1 }
 0x5dc   : > { %v5102_v7 = vadd.f32 %v5053_v44, %v10273_v27  ;;  %v5055_v8 = vpop.f32.mrb[54].mxu1  ;;  %6595 = vmatpush1.bf16.msra.mxu1 %v9101_v3  ;;  %v5960_v27 = vsub.s32 5, %v10285_v17  ;;  %v5944_v3 = vsub.s32 1, %v10285_v17 }
 0x5dd   : > { %v5056_v10 = vpop.f32.mrb[55].mxu1  ;;  %6596 = vmatprep.subr.bf16.mxu1 %v9106_v4  ;;  %v5941_v4 = vrot.slane %v10289_v2, %v5940_v1 }
 0x5de   : > { %v10301_v34 = vrot.slane %v10289_v2, %v5960_v27 }
 0x5e0   : > { %6597 = vmatpush1.bf16.msra.mxu1 %v9104_v9 }
 0x5e1   : > { %6598 = vmatprep.subr.bf16.mxu1 %v9109_v11 }
 0x5e4   : > { %6599 = vmatpush1.bf16.msra.mxu1 %v9107_v12 }
 0x5e5   : > { %6609 = vmatprep.subr.bf16.mxu1 %v9112_v13 }
 0x5ea   : > { %v5092_v18 = vpop.f32.mrb[56].mxu1 }
 0x5eb   : > { %v5103_v20 = vadd.f32 %v5092_v18, %v10276_v41  ;;  %v5094_v21 = vpop.f32.mrb[57].mxu1 }
 0x5ec   : > { %v5104_v60 = vadd.f32 %v5094_v21, %v10279_v46  ;;  %v5096_v15 = vpop.f32.mrb[58].mxu1  ;;  %v9118_v21 = vld [vmem:[#allocation11 + $0x124] ss:$8 sps:$4 sm:$0xff]  }
 0x5ed   : > { %v5097_v23 = vpop.f32.mrb[59].mxu1  ;;  %v9116_v15 = vld [vmem:[#allocation11 + $0x120] ss:$8 sps:$4 sm:$0xff]  }
 0x5ee   : > { %v9121_v23 = vld [vmem:[#allocation11 + $0x134] ss:$8 sps:$4 sm:$0xff]  }
 0x5fa   : > { %v5287_v24 = vpop.f32.mrb[60].mxu1 }
 0x5fb   : > { %v5376_v25 = vadd.f32 %v5287_v24, %v5099_v55  ;;  %v5289_v26 = vpop.f32.mrb[61].mxu1 }
 0x5fc   : > { %v5377_v28 = vadd.f32 %v5289_v26, %v5100_v57  ;;  %v5291_v31 = vpop.f32.mrb[62].mxu1 }
 0x5fd   : > { %v5292_v33 = vpop.f32.mrb[63].mxu1  ;;  %v9119_v31 = vld [vmem:[#allocation11 + $0x130] ss:$8 sps:$4 sm:$0xff]  }
 0x60a   : > { %v5328_v35 = vpop.f32.mrb[64].mxu1 }
 0x60b   : > { %v5378_v36 = vadd.f32 %v5328_v35, %v5101_v6  ;;  %v5330_v37 = vpop.f32.mrb[65].mxu1  ;;  %v5945_v6 = vrot.slane %v10289_v2, %v5944_v3 }
 0x60c   : > { %v5379_v38 = vadd.f32 %v5330_v37, %v5102_v7  ;;  %v5332_v39 = vpop.f32.mrb[66].mxu1 }
 0x60d   : > { %v5333_v40 = vpop.f32.mrb[67].mxu1  ;;  %v9122_v39 = vld [vmem:[#allocation11 + $0x140] ss:$8 sps:$4 sm:$0xff]  }
 0x60e   : > { %v9127_v40 = vld [vmem:[#allocation11 + $0x154] ss:$8 sps:$4 sm:$0xff]  }
 0x61a   : > { %v5369_v41 = vpop.f32.mrb[68].mxu1 }
 0x61b   : > { %v5380_v42 = vadd.f32 %v5369_v41, %v5103_v20  ;;  %v5371_v46 = vpop.f32.mrb[69].mxu1  ;;  %v9113_v20 = vld [vmem:[#allocation11 + $0x110] ss:$8 sps:$4 sm:$0xff]   ;;  %v9130_v41 = vld [vmem:[#allocation11 + $0x164] ss:$8 sps:$4 sm:$0xff]  }
 0x61c   : > { %v5381_v47 = vadd.f32 %v5371_v46, %v5104_v60  ;;  %v5373_v48 = vpop.f32.mrb[70].mxu1  ;;  %v5952_v60 = vsub.s32 3, %v10285_v17  ;;  %v9133_v46 = vld [vmem:[#allocation11 + $0x174] ss:$8 sps:$4 sm:$0xff]  }
 0x61d   : > { %v5374_v49 = vpop.f32.mrb[71].mxu1 }
 0x61e   : > { %v5953_v29 = vrot.slane %v10289_v2, %v5952_v60  ;;  %v9125_v2 = vld [vmem:[#allocation11 + $0x150] ss:$8 sps:$4 sm:$0xff]   ;;  %v9176_v60 = vld [vmem:[#allocation11 + $0x260] ss:$8 sps:$4 sm:$0xff]  }
 0x62a   : > { %v5564_v50 = vpop.f32.mrb[72].mxu1 }
 0x62b   : > { %v5653_v51 = vadd.f32 %v5564_v50, %v5376_v25  ;;  %v5566_v52 = vpop.f32.mrb[73].mxu1 }
 0x62c   : > { %v5654_v53 = vadd.f32 %v5566_v52, %v5377_v28  ;;  %v5568_v54 = vpop.f32.mrb[74].mxu1 }
 0x62d   : > { %v5569_v30 = vpop.f32.mrb[75].mxu1  ;;  %v9136_v54 = vld [vmem:[#allocation11 + $0x184] ss:$8 sps:$4 sm:$0xff]  }
 0x63a   : > { %v5605_v16 = vpop.f32.mrb[76].mxu1 }
 0x63b   : > { %v5655_v43 = vadd.f32 %v5605_v16, %v5378_v36  ;;  %v5607_v55 = vpop.f32.mrb[77].mxu1  ;;  %v9124_v36 = vld [vmem:[#allocation11 + $0x144] ss:$8 sps:$4 sm:$0xff]   ;;  %v9134_v16 = vld [vmem:[#allocation11 + $0x180] ss:$8 sps:$4 sm:$0xff]  }
 0x63c   : > { %v5656_v56 = vadd.f32 %v5607_v55, %v5379_v38  ;;  %v5609_v57 = vpop.f32.mrb[78].mxu1  ;;  %v9137_v55 = vld [vmem:[#allocation11 + $0x190] ss:$8 sps:$4 sm:$0xff]  }
 0x63d   : > { %v5610_v58 = vpop.f32.mrb[79].mxu1  ;;  %v9140_v57 = vld [vmem:[#allocation11 + $0x1a0] ss:$8 sps:$4 sm:$0xff]  }
 0x63e   : > { %v9145_v58 = vld [vmem:[#allocation11 + $0x1b4] ss:$8 sps:$4 sm:$0xff]  }
 0x64a   : > { %v5646_v59 = vpop.f32.mrb[80].mxu1 }
 0x64b   : > { %v5657_v61 = vadd.f32 %v5646_v59, %v5380_v42  ;;  %v5648_v45 = vpop.f32.mrb[81].mxu1  ;;  %v9128_v42 = vld [vmem:[#allocation11 + $0x160] ss:$8 sps:$4 sm:$0xff]   ;;  %v9148_v59 = vld [vmem:[#allocation11 + $0x1c4] ss:$8 sps:$4 sm:$0xff]  }
 0x64c   : > { %v5658_v62 = vadd.f32 %v5648_v45, %v5381_v47  ;;  %v5650_v63 = vpop.f32.mrb[82].mxu1  ;;  %v9149_v45 = vld [vmem:[#allocation11 + $0x1d0] ss:$8 sps:$4 sm:$0xff]  }
 0x64d   : > { %v5651_v0 = vpop.f32.mrb[83].mxu1  ;;  %v9152_v63 = vld [vmem:[#allocation11 + $0x1e0] ss:$8 sps:$4 sm:$0xff]  }
 0x64e   : > { %v9157_v0 = vld [vmem:[#allocation11 + $0x1f4] ss:$8 sps:$4 sm:$0xff]  }
 0x65a   : > { %v5841_v5 = vpop.f32.mrb[84].mxu1 }
 0x65b   : > { %v5930_v44 = vadd.f32 %v5841_v5, %v5653_v51  ;;  %v5843_v7 = vpop.f32.mrb[85].mxu1  ;;  %v9131_v51 = vld [vmem:[#allocation11 + $0x170] ss:$8 sps:$4 sm:$0xff]   ;;  %v9160_v5 = vld [vmem:[#allocation11 + $0x204] ss:$8 sps:$4 sm:$0xff]  }
 0x65c   : > { %v5931_v8 = vadd.f32 %v5843_v7, %v5654_v53  ;;  %v5845_v9 = vpop.f32.mrb[86].mxu1  ;;  %v9163_v7 = vld [vmem:[#allocation11 + $0x214] ss:$8 sps:$4 sm:$0xff]  }
 0x65d   : > { %v5968_v10 = vadd.f32 %v5941_v4, %v5930_v44  ;;  %v5846_v11 = vpop.f32.mrb[87].mxu1  ;;  %v9155_v4 = vld [vmem:[#allocation11 + $0x1f0] ss:$8 sps:$4 sm:$0xff]  }
 0x65e   : > { %v5969_v12 = vadd.f32 %v5945_v6, %v5931_v8  ;;  %v9158_v6 = vld [vmem:[#allocation11 + $0x200] ss:$8 sps:$4 sm:$0xff]   ;;  %v9161_v9 = vld [vmem:[#allocation11 + $0x210] ss:$8 sps:$4 sm:$0xff]  }
 0x65f   : > { %v5974_v18 = vpack.c.bf16 %v5968_v10, %v5968_v10  ;;  %v9166_v10 = vld [vmem:[#allocation11 + $0x224] ss:$8 sps:$4 sm:$0xff]   ;;  %v9164_v11 = vld [vmem:[#allocation11 + $0x220] ss:$8 sps:$4 sm:$0xff]  }
 0x660   : > { %v5975_v13 = vpack.c.bf16 %v5969_v12, %v5969_v12  ;;  %v9169_v12 = vld [vmem:[#allocation11 + $0x234] ss:$8 sps:$4 sm:$0xff]  }
 0x662   : > { %6600 = vmatprep.mubr.bf16.mxu1 %v5975_v13  ;;  %v9167_v13 = vld [vmem:[#allocation11 + $0x230] ss:$8 sps:$4 sm:$0xff]  }
 0x663   : > { %6601 = vmatmul.mubr.bf16.vlgmr.msra.gmra.mrb[96].mxu1 %v5974_v18  ;;  %v9170_v18 = vld [vmem:[#allocation11 + $0x240] ss:$8 sps:$4 sm:$0xff]  }
 0x664   : > { %6610 = vmatpush1.bf16.msra.mxu1 %v9110_v14  ;;  %v9172_v14 = vld [vmem:[#allocation11 + $0x244] ss:$8 sps:$4 sm:$0xff]  }
 0x665   : > { %6611 = vmatprep.subr.bf16.mxu1 %v9115_v19  ;;  %v9175_v19 = vld [vmem:[#allocation11 + $0x254] ss:$8 sps:$4 sm:$0xff]  }
 0x668   : > { %6612 = vmatpush1.bf16.msra.mxu1 %v9113_v20  ;;  %v9173_v20 = vld [vmem:[#allocation11 + $0x250] ss:$8 sps:$4 sm:$0xff]  }
 0x669   : > { %6613 = vmatprep.subr.bf16.mxu1 %v9118_v21  ;;  %v9178_v21 = vld [vmem:[#allocation11 + $0x264] ss:$8 sps:$4 sm:$0xff]  }
 0x66a   : > { %v5882_v24 = vpop.f32.mrb[88].mxu1 }
 0x66b   : > { %v5932_v25 = vadd.f32 %v5882_v24, %v5655_v43  ;;  %v5884_v26 = vpop.f32.mrb[89].mxu1  ;;  %v9139_v43 = vld [vmem:[#allocation11 + $0x194] ss:$8 sps:$4 sm:$0xff]   ;;  %v9184_v24 = vld [vmem:[#allocation11 + $0x284] ss:$8 sps:$4 sm:$0xff]  }
 0x66c   : > { %v5933_v27 = vadd.f32 %v5884_v26, %v5656_v56  ;;  %6614 = vmatpush1.bf16.msra.mxu1 %v9116_v15  ;;  %v5886_v28 = vpop.f32.mrb[90].mxu1  ;;  %v9142_v56 = vld [vmem:[#allocation11 + $0x1a4] ss:$8 sps:$4 sm:$0xff]   ;;  %v9181_v15 = vld [vmem:[#allocation11 + $0x274] ss:$8 sps:$4 sm:$0xff]  }
 0x66d   : > { %v10314_v33 = vadd.f32 %v10293_v22, %v5932_v25  ;;  %v5887_v35 = vpop.f32.mrb[91].mxu1  ;;  %6615 = vmatprep.subr.bf16.mxu1 %v9121_v23  ;;  %v9179_v23 = vld [vmem:[#allocation11 + $0x270] ss:$8 sps:$4 sm:$0xff]   ;;  %v9187_v25 = vld [vmem:[#allocation11 + $0x294] ss:$8 sps:$4 sm:$0xff]  }
 0x66e   : > { %v5971_v37 = vadd.f32 %v5953_v29, %v5933_v27  ;;  %v9182_v29 = vld [vmem:[#allocation11 + $0x280] ss:$8 sps:$4 sm:$0xff]   ;;  %v9185_v26 = vld [vmem:[#allocation11 + $0x290] ss:$8 sps:$4 sm:$0xff]   ;;  %v9190_v27 = vld [vmem:[#allocation11 + $0x2a4] ss:$8 sps:$4 sm:$0xff]  }
 0x66f   : > { %v5976_v44 = vpack.c.bf16 %v10314_v33, %v10314_v33  ;;  %v9188_v28 = vld [vmem:[#allocation11 + $0x2a0] ss:$8 sps:$4 sm:$0xff]   ;;  %v9191_v33 = vld [vmem:[#allocation11 + $0x2b0] ss:$8 sps:$4 sm:$0xff]   ;;  %v9196_v35 = vld [vmem:[#allocation11 + $0x2c4] ss:$8 sps:$4 sm:$0xff]  }
 0x670   : > { %v5977_v38 = vpack.c.bf16 %v5971_v37, %v5971_v37  ;;  %6616 = vmatpush1.bf16.msra.mxu1 %v9119_v31  ;;  %v9193_v31 = vld [vmem:[#allocation11 + $0x2b4] ss:$8 sps:$4 sm:$0xff]  }
 0x671   : > { %6617 = vmatprep.subr.bf16.mxu1 %v9124_v36  ;;  %v9194_v36 = vld [vmem:[#allocation11 + $0x2c0] ss:$8 sps:$4 sm:$0xff]   ;;  %v9199_v37 = vld [vmem:[#allocation11 + $0x2d4] ss:$8 sps:$4 sm:$0xff]  }
 0x672   : > { %6641 = vmatprep.mubr.bf16.mxu1 %v5977_v38  ;;  %v9197_v38 = vld [vmem:[#allocation11 + $0x2d0] ss:$8 sps:$4 sm:$0xff]  }
 0x674   : > { %6618 = vmatpush1.bf16.msra.mxu1 %v9122_v39  ;;  %v9202_v39 = vld [vmem:[#allocation11 + $0x2e4] ss:$8 sps:$4 sm:$0xff]  }
 0x675   : > { %6619 = vmatprep.subr.bf16.mxu1 %v9127_v40  ;;  %v9200_v40 = vld [vmem:[#allocation11 + $0x2e0] ss:$8 sps:$4 sm:$0xff]  }
 0x678   : > { %6620 = vmatpush1.bf16.msra.mxu1 %v9125_v2  ;;  %v9205_v2 = vld [vmem:[#allocation11 + $0x2f4] ss:$8 sps:$4 sm:$0xff]  }
 0x679   : > { %6621 = vmatprep.subr.bf16.mxu1 %v9130_v41  ;;  %v9203_v41 = vld [vmem:[#allocation11 + $0x2f0] ss:$8 sps:$4 sm:$0xff]  }
 0x67a   : > { %v5923_v22 = vpop.f32.mrb[92].mxu1 }
 0x67b   : > { %v5934_v47 = vadd.f32 %v5923_v22, %v5657_v61  ;;  %v5925_v48 = vpop.f32.mrb[93].mxu1  ;;  %v9146_v61 = vld [vmem:[#allocation11 + $0x1c0] ss:$8 sps:$4 sm:$0xff]  }
 0x67c   : > { %v5935_v49 = vadd.f32 %v5925_v48, %v5658_v62  ;;  %6622 = vmatpush1.bf16.msra.mxu1 %v9128_v42  ;;  %v5927_v50 = vpop.f32.mrb[94].mxu1  ;;  %v9154_v62 = vld [vmem:[#allocation11 + $0x1e4] ss:$8 sps:$4 sm:$0xff]  }
 0x67d   : > { %v10317_v52 = vadd.f32 %v10298_v32, %v5934_v47  ;;  %v5928_v53 = vpop.f32.mrb[95].mxu1  ;;  %6623 = vmatprep.subr.bf16.mxu1 %v9133_v46  ;;  %v9143_v32 = vld [vmem:[#allocation11 + $0x1b0] ss:$8 sps:$4 sm:$0xff]   ;;  %v6076_v46 = vld [vmem:[#allocation13] sm:$0x3] }
 0x67e   : > { %v5973_v30 = vadd.f32 %v10301_v34, %v5935_v49  ;;  %v9151_v34 = vld [vmem:[#allocation11 + $0x1d4] ss:$8 sps:$4 sm:$0xff]   ;;  %v6081_v22 = vrot.slane %v6076_v46, %v5940_v1  ;;  %v6085_v47 = vrot.slane %v6076_v46, %v5944_v3 }
 0x67f   : > { %v5978_v42 = vpack.c.bf16 %v10317_v52, %v10317_v52 }
 0x680   : > { %6624 = vmatpush1.bf16.msra.mxu1 %v9131_v51  ;;  %v5979_v8 = vpack.c.bf16 %v5973_v30, %v5973_v30 }
 0x681   : > { %6625 = vmatprep.subr.bf16.mxu1 %v9136_v54 }
 0x684   : > { %6626 = vmatpush1.bf16.msra.mxu1 %v9134_v16 }
 0x685   : > { %6627 = vmatprep.subr.bf16.mxu1 %v9139_v43 }
 0x688   : > { %6628 = vmatpush1.bf16.msra.mxu1 %v9137_v55 }
 0x689   : > { %6629 = vmatprep.subr.bf16.mxu1 %v9142_v56 }
 0x68c   : > { %6630 = vmatpush1.bf16.msra.mxu1 %v9140_v57 }
 0x68d   : > { %6631 = vmatprep.subr.bf16.mxu1 %v9145_v58 }
 0x690   : > { %6632 = vmatpush1.bf16.msra.mxu1 %v9143_v32 }
 0x691   : > { %6633 = vmatprep.subr.bf16.mxu1 %v9148_v59 }
 0x694   : > { %6634 = vmatpush1.bf16.msra.mxu1 %v9146_v61 }
 0x695   : > { %6635 = vmatprep.subr.bf16.mxu1 %v9151_v34 }
 0x698   : > { %6636 = vmatpush1.bf16.msra.mxu1 %v9149_v45 }
 0x699   : > { %6637 = vmatprep.subr.bf16.mxu1 %v9154_v62 }
 0x69c   : > { %6638 = vmatpush1.bf16.msra.mxu1 %v9152_v63 }
 0x69d   : > { %6639 = vmatprep.subr.bf16.mxu1 %v9157_v0 }
 0x6a0   : > { %6640 = vmatpush1.bf16.msra.mxu1 %v9155_v4 }
 0x6a1   : > { %6650 = vmatprep.subr.bf16.mxu1 %v9160_v5 }
 0x6a3   : > { %6642 = vmatmul.mubr.bf16.vlgmr.msra.gmra.mrb[96].mxu1 %v5976_v44 }
 0x6a4   : > { %6651 = vmatpush1.bf16.msra.mxu1 %v9158_v6  ;;  %6682 = vmatprep.mubr.bf16.mxu1 %v5979_v8 }
 0x6a5   : > { %6652 = vmatprep.subr.bf16.mxu1 %v9163_v7 }
 0x6a8   : > { %6653 = vmatpush1.bf16.msra.mxu1 %v9161_v9 }
 0x6a9   : > { %6654 = vmatprep.subr.bf16.mxu1 %v9166_v10 }
 0x6ac   : > { %6655 = vmatpush1.bf16.msra.mxu1 %v9164_v11 }
 0x6ad   : > { %6656 = vmatprep.subr.bf16.mxu1 %v9169_v12 }
 0x6b0   : > { %6657 = vmatpush1.bf16.msra.mxu1 %v9167_v13 }
 0x6b1   : > { %6658 = vmatprep.subr.bf16.mxu1 %v9172_v14 }
 0x6b4   : > { %6659 = vmatpush1.bf16.msra.mxu1 %v9170_v18 }
 0x6b5   : > { %6660 = vmatprep.subr.bf16.mxu1 %v9175_v19 }
 0x6b8   : > { %6661 = vmatpush1.bf16.msra.mxu1 %v9173_v20 }
 0x6b9   : > { %6662 = vmatprep.subr.bf16.mxu1 %v9178_v21 }
 0x6bc   : > { %6663 = vmatpush1.bf16.msra.mxu1 %v9176_v60 }
 0x6bd   : > { %6664 = vmatprep.subr.bf16.mxu1 %v9181_v15 }
 0x6c0   : > { %6665 = vmatpush1.bf16.msra.mxu1 %v9179_v23 }
 0x6c1   : > { %6666 = vmatprep.subr.bf16.mxu1 %v9184_v24 }
 0x6c4   : > { %6667 = vmatpush1.bf16.msra.mxu1 %v9182_v29 }
 0x6c5   : > { %6668 = vmatprep.subr.bf16.mxu1 %v9187_v25 }
 0x6c8   : > { %6669 = vmatpush1.bf16.msra.mxu1 %v9185_v26 }
 0x6c9   : > { %6670 = vmatprep.subr.bf16.mxu1 %v9190_v27 }
 0x6cc   : > { %6671 = vmatpush1.bf16.msra.mxu1 %v9188_v28 }
 0x6cd   : > { %6672 = vmatprep.subr.bf16.mxu1 %v9193_v31 }
 0x6d0   : > { %6673 = vmatpush1.bf16.msra.mxu1 %v9191_v33 }
 0x6d1   : > { %6674 = vmatprep.subr.bf16.mxu1 %v9196_v35 }
 0x6d4   : > { %6675 = vmatpush1.bf16.msra.mxu1 %v9194_v36 }
 0x6d5   : > { %6676 = vmatprep.subr.bf16.mxu1 %v9199_v37 }
 0x6d8   : > { %6677 = vmatpush1.bf16.msra.mxu1 %v9197_v38 }
 0x6d9   : > { %6678 = vmatprep.subr.bf16.mxu1 %v9202_v39 }
 0x6dc   : > { %6679 = vmatpush1.bf16.msra.mxu1 %v9200_v40 }
 0x6dd   : > { %6680 = vmatprep.subr.bf16.mxu1 %v9205_v2 }
 0x6e0   : > { %6681 = vmatpush1.bf16.msra.mxu1 %v9203_v41 }
 0x6e3   : > { %6683 = vmatmul.mubr.bf16.vlgmr.msra.gmra.mrb[96].mxu1 %v5978_v42 }
 0x7b6   : > { %v6684_v48 = vpop.f32.mrb[96].mxu1 }
 0x7b7   : > { %v8220_v49 = vadd.f32 %v6684_v48, %v6081_v22  ;;  %v6686_v50 = vpop.f32.mrb[97].mxu1 }
 0x7b8   : > { %v8221_v51 = vadd.f32 %v6686_v50, %v6085_v47  ;;  %v6688_v53 = vpop.f32.mrb[98].mxu1 }
 0x7b9   : > { %6691 = vst [vmem:[%s376_s18] sm:$0xff] %v8220_v49  ;;  %v6689_v17 = vpop.f32.mrb[99].mxu1 }
 0x7ba   : > { %6692 = vst [vmem:[%s376_s18 + $0x8] sm:$0xff] %v8221_v51 }
 0x7bb   : > { %9417 = shalt.err (!%p9414_p8)
}
 0x7bc   : > { %s9418_s15 = scalar_lea.hbm %s10333_s10, 256  ;;  %s9422_s8 = scalar_lea.hbm %s10384_s7, 512 }
 0x7bd   : > { %p9419_p7 = scmp.ne.s32.totalorder %s10333_s10, %s9418_s15  ;;  %p9423_p3 = scmp.lt.u32.totalorder %s10333_s10, %s10384_s7 }
 0x7be   : > { %p9424_p6 = scmp.lt.u32.totalorder %s9422_s8, %s9418_s15  ;;  %p9426_p0 = scmp.lt.u32.totalorder %s9418_s15, %s10333_s10 }
 0x7bf   : > { %p9420_p9 = pnand %p9419_p7, %p10411_p5 }
 0x7c0   : > { %p9425_p2 = por %p9424_p6, %p9423_p3 }
 0x7c1   : > { %p9421_p4 = pneg %p9420_p9 }
 0x7c2   : > { %p9427_p10 = por %p9426_p0, %p9425_p2 }
 0x7c4   : > { %p9428_p1 = pnand %p9427_p10, %p9421_p4 }
 0x7c6   : > { %9431 = shalt.err (!%p9428_p1)
}
 0x7c7   : > { %8523 = dma.vmem_to_hbm [thread:$0]  (%p10411_p5), %s10335_s21, 256, %s10333_s10, %s6694_s30  }
 0x7c8 PF: > { %s6720_s18 = sand.u32 1, %s9470_s24   ;;  %p10412_p11 = scmp.ne.s32.totalorder %s10399_s9, 0 }
 0x7c9   : > { %p10413_p12 = scmp.ge.s32.totalorder %s9482_s27, 2  ;;  %s6721_s19 = scalar_lea.sflag [#allocation4], %s6720_s18 }
 0x7cb   : > { %p8549_p13 = pnand %p10413_p12, %p10412_p11 }
 0x7cd   : > { %9465 = dma.done.wait (!%p8549_p13), %s6721_s19, 256  }
 0x7ce   : > { %9467 = vsyncadd (!%p8549_p13), %s6721_s19, 4294967040  ;;  %p23_p8 = scmp.ge.s32.totalorder %s9717_s11, 4   ;;  %s10414_s24 = smov %s9474_s25 }
 0x7cf   : > { %s10415_s25 = smov %s9478_s26  ;;  %s10416_s26 = smov %s9728_s12 }
 0x7d0   : > { %s10417_s27 = smov %s9717_s11  ;;  %25 = sbr.rel (!%p23_p8) target bundleno = 10 (0xa), region = 133 }
 0x7d7   :  { %6726 = vsyncpa [#allocation3], 1 }
 0x7d8   :  { %6728 = vsyncpa [#allocation3 + $0x1], 1 }
 0x7d9   :  { %6729 = vsyncpa [#allocation6], 1 }
 0x7da   :  { %6730 = vsyncpa [#allocation9], 1 }
 0x7db   :  { %6731 = vsyncpa [#allocation12], 1 }
 0x7dc   :  { %6732 = vsyncpa [#allocation4], 1 }
 0x7dd   :  { %6734 = vsyncpa [#allocation4 + $0x1], 1 }

</bundles_post_ra>
